<compile_context>
chip_gen: v6e
topology: v6e:2x2x1
jax: 0.10.0
libtpu: 0.0.40
codegen_flags: <defaults>
</compile_context>

<pallas_src>
import math
import functools
import numpy as np
import jax
import jax.numpy as jnp
from jax.experimental import pallas as pl
from jax.experimental.pallas import tpu as pltpu

# ---- model hyper-parameters (small, consistent with the module) ----
D_MODEL = 32
HEADS = 4
NUM_LAYERS = 2
MAX_LEN = 8
MIDDLE = 2048   # FeedForward default middle_dim
BATCH = 2


def _transformer_kernel(src_ref, convw_ref, convb_ref, pe_ref, bias_ref, pool_ref,
                        wqkv_ref, bqkv_ref, wo_ref, bo_ref, lng_ref, lnb_ref,
                        w1_ref, b1_ref, w2_ref, b2_ref,
                        logw_ref, logb_ref, out_ref, *, heads):
    BS, D = pe_ref.shape
    L = wqkv_ref.shape[0]
    dk = D // heads
    inv_sqrt_dk = 1.0 / math.sqrt(dk)

    # --- Embeddings: ConvTranspose1d(1,1,k=D,stride=D) == per-token scalar*kernel+bias
    x = (src_ref[...] * convw_ref[...] + convb_ref[...]) * math.sqrt(D) + pe_ref[...]
    # x: (BS, D) float32

    # precomputed additive attention bias: 0 for same-batch valid keys, -1e9 else
    attn_bias = bias_ref[...]                                    # (BS, BS)

    def layernorm(y, g, b):
        mu = jnp.mean(y, axis=-1, keepdims=True)
        var = jnp.mean((y - mu) * (y - mu), axis=-1, keepdims=True)
        return (y - mu) * jax.lax.rsqrt(var + 1e-5) * g + b

    def softmax(s):
        s = s - jnp.max(s, axis=-1, keepdims=True)
        e = jnp.exp(s)
        return e * pl.reciprocal(jnp.sum(e, axis=-1, keepdims=True), approx=True)

    # --- Encoder layers (static Python loop: L = 2 is tiny) ---
    for l in range(L):
        wqkv, bqkv = wqkv_ref[l], bqkv_ref[l]
        wo, bo = wo_ref[l], bo_ref[l]
        g, be = lng_ref[l], lnb_ref[l]
        w1, b1 = w1_ref[l], b1_ref[l]
        w2, b2 = w2_ref[l], b2_ref[l]

        # fused QKV projection on the flattened batch: (BS, D) x (D, 3D)
        qkv = jnp.dot(x, wqkv, preferred_element_type=jnp.float32) + bqkv
        q = qkv[:, :D]
        k = qkv[:, D:2 * D]
        v = qkv[:, 2 * D:]

        # multi-head attention; accumulate each head's Wo contribution (no concat)
        acc = x + bo                                             # residual + Wo bias
        for h in range(heads):
            qh = q[:, h * dk:(h + 1) * dk]                       # (BS, dk)
            kh = k[:, h * dk:(h + 1) * dk]
            vh = v[:, h * dk:(h + 1) * dk]
            # scores over the flattened keys; block-diagonal bias keeps batches apart
            s = jax.lax.dot_general(
                qh, kh, (((1,), (1,)), ((), ())),
                preferred_element_type=jnp.float32) * inv_sqrt_dk + attn_bias
            attn = softmax(s)                                    # (BS, BS)
            ctx_h = jnp.dot(attn, vh,
                            preferred_element_type=jnp.float32)  # (BS, dk)
            woh = wo[h * dk:(h + 1) * dk, :]                     # (dk, D)
            acc = acc + jnp.dot(ctx_h, woh,
                                preferred_element_type=jnp.float32)
        x = layernorm(acc, g, be)                                # post-attn residual

        # FFN: bf16 operands, f32 accumulation (dominant FLOPs + dominant DMA)
        hid = jnp.maximum(
            jnp.dot(x.astype(jnp.bfloat16), w1,
                    preferred_element_type=jnp.float32) + b1, 0.0)   # (BS, M)
        ff = jnp.dot(hid.astype(jnp.bfloat16), w2,
                     preferred_element_type=jnp.float32) + b2        # (BS, D)
        x = layernorm(ff + x, g, be)                             # post-FF residual

    # --- mean over seq (pooling matrix) + logit head (Linear(d_model, 1)) ---
    pooled = jnp.dot(pool_ref[...], x,
                     preferred_element_type=jnp.float32)         # (B, D)
    out_ref[...] = (jnp.sum(pooled * logw_ref[...], axis=-1, keepdims=True)
                    + logb_ref[...])                             # (B, 1)


def transformer_forward(src_words, src_mask, P):
    """src_words: (B, 1, max_len) NCL, src_mask: (B, max_len)."""
    B, _, S = src_words.shape
    D = P["conv_w"].shape[0]
    BS = B * S

    src2d = src_words[:, 0, :].reshape(BS, 1).astype(jnp.float32)
    convw = P["conv_w"].reshape(1, D)
    convb = jnp.full((1, 1), P["conv_b_scalar"], jnp.float32)
    pe2d = jnp.tile(P["pe"].reshape(S, D), (B, 1))               # (BS, D)

    # additive attention bias: block-diagonal over batches + key padding
    batch_ids = jnp.arange(BS, dtype=jnp.int32) // S
    same_batch = batch_ids[:, None] == batch_ids[None, :]
    key_valid = (src_mask.astype(jnp.float32).reshape(BS) != 0.0)[None, :]
    attn_bias = jnp.where(same_batch & key_valid, 0.0, -1e9).astype(jnp.float32)

    # pooling matrix: pooled[b] = mean over tokens of batch b
    pool = (batch_ids[None, :] == jnp.arange(B, dtype=jnp.int32)[:, None]
            ).astype(jnp.float32) / float(S)                     # (B, BS)

    # fused QKV weights / biases
    wqkv = jnp.concatenate([P["wq"], P["wk"], P["wv"]], axis=-1)  # (L, D, 3D)
    bqkv = jnp.concatenate([P["bq"], P["bk"], P["bv"]], axis=-1)  # (L, 1, 3D)

    args = (src2d, convw, convb, pe2d, attn_bias, pool,
            wqkv, bqkv, P["wo"], P["bo"], P["lng"], P["lnb"],
            P["w1"].astype(jnp.bfloat16), P["b1"],
            P["w2"].astype(jnp.bfloat16), P["b2"],
            P["logw"], P["logb"])

    vmem = pl.BlockSpec(memory_space=pltpu.MemorySpace.VMEM)
    return pl.pallas_call(
        functools.partial(_transformer_kernel, heads=HEADS),
        out_shape=jax.ShapeDtypeStruct((B, 1), jnp.float32),
        in_specs=[vmem] * len(args),
        out_specs=vmem,
    )(*args)


# -------------------- pure-JAX f32 reference (for a sanity check) --------------------
def reference_forward(src_words, mask, P):
    B, S, D, H, L = src_words.shape[0], MAX_LEN, D_MODEL, HEADS, NUM_LAYERS
    dk = D // H
    hp = jax.lax.Precision.HIGHEST
    emb = src_words[:, 0, :, None] * P["conv_w"][None, None, :] + P["conv_b_scalar"]
    x = emb * math.sqrt(D) + P["pe"]

    def ln(y, g, b):
        mu = y.mean(-1, keepdims=True)
        var = ((y - mu) ** 2).mean(-1, keepdims=True)
        return (y - mu) / jnp.sqrt(var + 1e-5) * g + b

    for l in range(L):
        q = jnp.einsum("bsd,de->bse", x, P["wq"][l], precision=hp) + P["bq"][l]
        k = jnp.einsum("bsd,de->bse", x, P["wk"][l], precision=hp) + P["bk"][l]
        v = jnp.einsum("bsd,de->bse", x, P["wv"][l], precision=hp) + P["bv"][l]
        q = q.reshape(B, S, H, dk).transpose(0, 2, 1, 3)
        k = k.reshape(B, S, H, dk).transpose(0, 2, 1, 3)
        v = v.reshape(B, S, H, dk).transpose(0, 2, 1, 3)
        scores = jnp.einsum("bhqd,bhkd->bhqk", q, k, precision=hp) / math.sqrt(dk)
        scores = jnp.where(mask[:, None, None, :] == 0.0, -1e9, scores)
        w = jax.nn.softmax(scores, axis=-1)
        ctx = jnp.einsum("bhqk,bhkd->bhqd", w, v, precision=hp)
        ctx = ctx.transpose(0, 2, 1, 3).reshape(B, S, D)
        inter = jnp.einsum("bsd,de->bse", ctx, P["wo"][l], precision=hp) + P["bo"][l]
        x = ln(inter + x, P["lng"][l], P["lnb"][l])
        h1 = jax.nn.relu(jnp.einsum("bsd,dm->bsm", x, P["w1"][l], precision=hp) + P["b1"][l])
        ff = jnp.einsum("bsm,md->bsd", h1, P["w2"][l], precision=hp) + P["b2"][l]
        x = ln(ff + x, P["lng"][l], P["lnb"][l])
    pooled = x.mean(axis=1)
    return jnp.sum(pooled * P["logw"], axis=-1, keepdims=True) + P["logb"]


def make_params(key):
    ks = jax.random.split(key, 16)

    def lin(k, fan_in, shape):
        return (jax.random.normal(k, shape, jnp.float32) / math.sqrt(fan_in))

    # positional encoding (exact replica of the canonical PyTorch loop)
    pe = np.zeros((MAX_LEN, D_MODEL), dtype=np.float32)
    for pos in range(MAX_LEN):
        for i in range(0, D_MODEL, 2):
            pe[pos, i] = math.sin(pos / 10000 ** (2 * i / D_MODEL))
            pe[pos, i + 1] = math.cos(pos / 10000 ** (2 * (i + 1) / D_MODEL))

    L, D, M = NUM_LAYERS, D_MODEL, MIDDLE
    P = {
        "conv_w": jax.random.normal(ks[0], (D,), jnp.float32) * 0.2,
        "conv_b_scalar": jnp.float32(0.05),
        "pe": jnp.asarray(pe)[None],                          # (1, S, D)
        "wq": lin(ks[1], D, (L, D, D)), "bq": lin(ks[2], D, (L, 1, D)) * 0.1,
        "wk": lin(ks[3], D, (L, D, D)), "bk": lin(ks[4], D, (L, 1, D)) * 0.1,
        "wv": lin(ks[5], D, (L, D, D)), "bv": lin(ks[6], D, (L, 1, D)) * 0.1,
        "wo": lin(ks[7], D, (L, D, D)), "bo": lin(ks[8], D, (L, 1, D)) * 0.1,
        "lng": jnp.ones((L, 1, D), jnp.float32),              # nn.LayerNorm default
        "lnb": jnp.zeros((L, 1, D), jnp.float32),
        "w1": lin(ks[9], D, (L, D, M)), "b1": lin(ks[10], D, (L, 1, M)) * 0.1,
        "w2": lin(ks[11], M, (L, M, D)), "b2": lin(ks[12], M, (L, 1, D)) * 0.1,
        "logw": lin(ks[13], D, (1, D)),                       # Linear(d_model, 1)
        "logb": lin(ks[14], D, (1, 1)) * 0.1,
    }
    return P


if __name__ == "__main__":
    key = jax.random.PRNGKey(0)
    kp, kx = jax.random.split(key)
    P = make_params(kp)

    # src_words in PyTorch NCL layout (B, C=1, max_len); mask (B, max_len)
    src_words = jax.random.normal(kx, (BATCH, 1, MAX_LEN), jnp.float32)
    mask_np = np.ones((BATCH, MAX_LEN), np.float32)
    mask_np[1, 6:] = 0.0                                       # pad last tokens of batch 1
    src_mask = jnp.asarray(mask_np)

    out = transformer_forward(src_words, src_mask, P)
    out = jax.block_until_ready(out)

    ref = jax.block_until_ready(reference_forward(src_words, src_mask, P))
    assert out.shape == (BATCH, 1)
    assert bool(jnp.all(jnp.isfinite(out)))
    assert np.allclose(np.asarray(out), np.asarray(ref), atol=5e-2, rtol=5e-2), (out, ref)

    print("KERNEL_OK")
</pallas_src>

<mosaic_0001>
module attributes {stable_mosaic.version = 11 : i64} {
  func.func @_transformer_kernel(%arg0: memref<16x1xf32, #tpu.memory_space<vmem>>, %arg1: memref<1x32xf32, #tpu.memory_space<vmem>>, %arg2: memref<1x1xf32, #tpu.memory_space<vmem>>, %arg3: memref<16x32xf32, #tpu.memory_space<vmem>>, %arg4: memref<16x16xf32, #tpu.memory_space<vmem>>, %arg5: memref<2x16xf32, #tpu.memory_space<vmem>>, %arg6: memref<2x32x96xf32, #tpu.memory_space<vmem>>, %arg7: memref<2x1x96xf32, #tpu.memory_space<vmem>>, %arg8: memref<2x32x32xf32, #tpu.memory_space<vmem>>, %arg9: memref<2x1x32xf32, #tpu.memory_space<vmem>>, %arg10: memref<2x1x32xf32, #tpu.memory_space<vmem>>, %arg11: memref<2x1x32xf32, #tpu.memory_space<vmem>>, %arg12: memref<2x32x2048xbf16, #tpu.memory_space<vmem>>, %arg13: memref<2x1x2048xf32, #tpu.memory_space<vmem>>, %arg14: memref<2x2048x32xbf16, #tpu.memory_space<vmem>>, %arg15: memref<2x1x32xf32, #tpu.memory_space<vmem>>, %arg16: memref<1x32xf32, #tpu.memory_space<vmem>>, %arg17: memref<1x1xf32, #tpu.memory_space<vmem>>, %arg18: memref<2x1xf32, #tpu.memory_space<vmem>>) attributes {dimension_semantics = [], scalar_prefetch = 0 : i64, scratch_operands = 0 : i64, tpu.core_type = #tpu.core_type<tc>} {
    %c0 = arith.constant 0 : index
    %c0_0 = arith.constant 0 : index
    %0 = vector.load %arg0[%c0, %c0_0] : memref<16x1xf32, #tpu.memory_space<vmem>>, vector<16x1xf32>
    %c0_1 = arith.constant 0 : index
    %c0_2 = arith.constant 0 : index
    %1 = vector.load %arg1[%c0_1, %c0_2] : memref<1x32xf32, #tpu.memory_space<vmem>>, vector<1x32xf32>
    %2 = vector.broadcast %0 : vector<16x1xf32> to vector<16x32xf32>
    %3 = vector.broadcast %1 : vector<1x32xf32> to vector<16x32xf32>
    %4 = arith.mulf %2, %3 : vector<16x32xf32>
    %c0_3 = arith.constant 0 : index
    %c0_4 = arith.constant 0 : index
    %5 = vector.load %arg2[%c0_3, %c0_4] : memref<1x1xf32, #tpu.memory_space<vmem>>, vector<1x1xf32>
    %6 = vector.broadcast %5 : vector<1x1xf32> to vector<16x32xf32>
    %7 = arith.addf %4, %6 : vector<16x32xf32>
    %cst = arith.constant 5.65685415 : f32
    %8 = vector.broadcast %cst : f32 to vector<16x32xf32>
    %9 = arith.mulf %7, %8 : vector<16x32xf32>
    %c0_5 = arith.constant 0 : index
    %c0_6 = arith.constant 0 : index
    %10 = vector.load %arg3[%c0_5, %c0_6] : memref<16x32xf32, #tpu.memory_space<vmem>>, vector<16x32xf32>
    %11 = arith.addf %9, %10 : vector<16x32xf32>
    %c0_7 = arith.constant 0 : index
    %c0_8 = arith.constant 0 : index
    %12 = vector.load %arg4[%c0_7, %c0_8] : memref<16x16xf32, #tpu.memory_space<vmem>>, vector<16x16xf32>
    %c0_9 = arith.constant 0 : index
    %c0_10 = arith.constant 0 : index
    %c0_11 = arith.constant 0 : index
    %13 = vector.load %arg6[%c0_9, %c0_10, %c0_11] : memref<2x32x96xf32, #tpu.memory_space<vmem>>, vector<1x32x96xf32>
    %14 = vector.shape_cast %13 : vector<1x32x96xf32> to vector<32x96xf32>
    %c0_12 = arith.constant 0 : index
    %c0_13 = arith.constant 0 : index
    %c0_14 = arith.constant 0 : index
    %15 = vector.load %arg7[%c0_12, %c0_13, %c0_14] : memref<2x1x96xf32, #tpu.memory_space<vmem>>, vector<1x1x96xf32>
    %16 = vector.shape_cast %15 : vector<1x1x96xf32> to vector<1x96xf32>
    %c0_15 = arith.constant 0 : index
    %c0_16 = arith.constant 0 : index
    %c0_17 = arith.constant 0 : index
    %17 = vector.load %arg8[%c0_15, %c0_16, %c0_17] : memref<2x32x32xf32, #tpu.memory_space<vmem>>, vector<1x32x32xf32>
    %18 = vector.shape_cast %17 : vector<1x32x32xf32> to vector<32x32xf32>
    %c0_18 = arith.constant 0 : index
    %c0_19 = arith.constant 0 : index
    %c0_20 = arith.constant 0 : index
    %19 = vector.load %arg9[%c0_18, %c0_19, %c0_20] : memref<2x1x32xf32, #tpu.memory_space<vmem>>, vector<1x1x32xf32>
    %20 = vector.shape_cast %19 : vector<1x1x32xf32> to vector<1x32xf32>
    %c0_21 = arith.constant 0 : index
    %c0_22 = arith.constant 0 : index
    %c0_23 = arith.constant 0 : index
    %21 = vector.load %arg10[%c0_21, %c0_22, %c0_23] : memref<2x1x32xf32, #tpu.memory_space<vmem>>, vector<1x1x32xf32>
    %22 = vector.shape_cast %21 : vector<1x1x32xf32> to vector<1x32xf32>
    %c0_24 = arith.constant 0 : index
    %c0_25 = arith.constant 0 : index
    %c0_26 = arith.constant 0 : index
    %23 = vector.load %arg11[%c0_24, %c0_25, %c0_26] : memref<2x1x32xf32, #tpu.memory_space<vmem>>, vector<1x1x32xf32>
    %24 = vector.shape_cast %23 : vector<1x1x32xf32> to vector<1x32xf32>
    %c0_27 = arith.constant 0 : index
    %c0_28 = arith.constant 0 : index
    %c0_29 = arith.constant 0 : index
    %25 = vector.load %arg12[%c0_27, %c0_28, %c0_29] : memref<2x32x2048xbf16, #tpu.memory_space<vmem>>, vector<1x32x2048xbf16>
    %26 = vector.shape_cast %25 : vector<1x32x2048xbf16> to vector<32x2048xbf16>
    %c0_30 = arith.constant 0 : index
    %c0_31 = arith.constant 0 : index
    %c0_32 = arith.constant 0 : index
    %27 = vector.load %arg13[%c0_30, %c0_31, %c0_32] : memref<2x1x2048xf32, #tpu.memory_space<vmem>>, vector<1x1x2048xf32>
    %28 = vector.shape_cast %27 : vector<1x1x2048xf32> to vector<1x2048xf32>
    %c0_33 = arith.constant 0 : index
    %c0_34 = arith.constant 0 : index
    %c0_35 = arith.constant 0 : index
    %29 = vector.load %arg14[%c0_33, %c0_34, %c0_35] : memref<2x2048x32xbf16, #tpu.memory_space<vmem>>, vector<1x2048x32xbf16>
    %30 = vector.shape_cast %29 : vector<1x2048x32xbf16> to vector<2048x32xbf16>
    %c0_36 = arith.constant 0 : index
    %c0_37 = arith.constant 0 : index
    %c0_38 = arith.constant 0 : index
    %31 = vector.load %arg15[%c0_36, %c0_37, %c0_38] : memref<2x1x32xf32, #tpu.memory_space<vmem>>, vector<1x1x32xf32>
    %32 = vector.shape_cast %31 : vector<1x1x32xf32> to vector<1x32xf32>
    %cst_39 = arith.constant dense<0.000000e+00> : vector<16x96xf32>
    %33 = tpu.matmul %11, %14, %cst_39 {dimension_numbers = #tpu.dot_dimension_numbers<[1], [0], [0], [1], [0, 0, 1, 1], [], []>} : vector<16x32xf32>, vector<32x96xf32>, vector<16x96xf32> -> vector<16x96xf32>
    %34 = vector.broadcast %16 : vector<1x96xf32> to vector<16x96xf32>
    %35 = arith.addf %33, %34 : vector<16x96xf32>
    %36 = vector.extract_strided_slice %35 {offsets = [0, 0], sizes = [16, 32], strides = [1, 1]} : vector<16x96xf32> to vector<16x32xf32>
    %37 = vector.extract_strided_slice %35 {offsets = [0, 32], sizes = [16, 32], strides = [1, 1]} : vector<16x96xf32> to vector<16x32xf32>
    %38 = vector.extract_strided_slice %35 {offsets = [0, 64], sizes = [16, 32], strides = [1, 1]} : vector<16x96xf32> to vector<16x32xf32>
    %39 = vector.broadcast %20 : vector<1x32xf32> to vector<16x32xf32>
    %40 = arith.addf %11, %39 : vector<16x32xf32>
    %41 = vector.extract_strided_slice %36 {offsets = [0, 0], sizes = [16, 8], strides = [1, 1]} : vector<16x32xf32> to vector<16x8xf32>
    %42 = vector.extract_strided_slice %37 {offsets = [0, 0], sizes = [16, 8], strides = [1, 1]} : vector<16x32xf32> to vector<16x8xf32>
    %43 = vector.extract_strided_slice %38 {offsets = [0, 0], sizes = [16, 8], strides = [1, 1]} : vector<16x32xf32> to vector<16x8xf32>
    %cst_40 = arith.constant dense<0.000000e+00> : vector<16x16xf32>
    %44 = tpu.matmul %41, %42, %cst_40 {dimension_numbers = #tpu.dot_dimension_numbers<[1], [1], [0], [0], [0, 0, 1, 0], [], []>} : vector<16x8xf32>, vector<16x8xf32>, vector<16x16xf32> -> vector<16x16xf32>
    %cst_41 = arith.constant 0.353553385 : f32
    %45 = vector.broadcast %cst_41 : f32 to vector<16x16xf32>
    %46 = arith.mulf %44, %45 : vector<16x16xf32>
    %47 = arith.addf %46, %12 : vector<16x16xf32>
    %cst_42 = arith.constant dense<0xFF800000> : vector<16xf32>
    %48 = vector.multi_reduction <maximumf>, %47, %cst_42 [1] : vector<16x16xf32> to vector<16xf32>
    %49 = vector.shape_cast %48 : vector<16xf32> to vector<16x1xf32>
    %50 = vector.broadcast %49 : vector<16x1xf32> to vector<16x16xf32>
    %51 = arith.subf %47, %50 : vector<16x16xf32>
    %52 = math.exp %51 : vector<16x16xf32>
    %cst_43 = arith.constant dense<0.000000e+00> : vector<16xf32>
    %53 = vector.multi_reduction <add>, %52, %cst_43 [1] : vector<16x16xf32> to vector<16xf32>
    %54 = vector.shape_cast %53 : vector<16xf32> to vector<16x1xf32>
    %55 = tpu.reciprocal %54 {approx = true} : vector<16x1xf32> -> vector<16x1xf32>
    %56 = vector.broadcast %55 : vector<16x1xf32> to vector<16x16xf32>
    %57 = arith.mulf %52, %56 : vector<16x16xf32>
    %cst_44 = arith.constant dense<0.000000e+00> : vector<16x8xf32>
    %58 = tpu.matmul %57, %43, %cst_44 {dimension_numbers = #tpu.dot_dimension_numbers<[1], [0], [0], [1], [0, 0, 1, 1], [], []>} : vector<16x16xf32>, vector<16x8xf32>, vector<16x8xf32> -> vector<16x8xf32>
    %59 = vector.extract_strided_slice %18 {offsets = [0, 0], sizes = [8, 32], strides = [1, 1]} : vector<32x32xf32> to vector<8x32xf32>
    %cst_45 = arith.constant dense<0.000000e+00> : vector<16x32xf32>
    %60 = tpu.matmul %58, %59, %cst_45 {dimension_numbers = #tpu.dot_dimension_numbers<[1], [0], [0], [1], [0, 0, 1, 1], [], []>} : vector<16x8xf32>, vector<8x32xf32>, vector<16x32xf32> -> vector<16x32xf32>
    %61 = arith.addf %40, %60 : vector<16x32xf32>
    %62 = vector.extract_strided_slice %36 {offsets = [0, 8], sizes = [16, 8], strides = [1, 1]} : vector<16x32xf32> to vector<16x8xf32>
    %63 = vector.extract_strided_slice %37 {offsets = [0, 8], sizes = [16, 8], strides = [1, 1]} : vector<16x32xf32> to vector<16x8xf32>
    %64 = vector.extract_strided_slice %38 {offsets = [0, 8], sizes = [16, 8], strides = [1, 1]} : vector<16x32xf32> to vector<16x8xf32>
    %cst_46 = arith.constant dense<0.000000e+00> : vector<16x16xf32>
    %65 = tpu.matmul %62, %63, %cst_46 {dimension_numbers = #tpu.dot_dimension_numbers<[1], [1], [0], [0], [0, 0, 1, 0], [], []>} : vector<16x8xf32>, vector<16x8xf32>, vector<16x16xf32> -> vector<16x16xf32>
    %cst_47 = arith.constant 0.353553385 : f32
    %66 = vector.broadcast %cst_47 : f32 to vector<16x16xf32>
    %67 = arith.mulf %65, %66 : vector<16x16xf32>
    %68 = arith.addf %67, %12 : vector<16x16xf32>
    %cst_48 = arith.constant dense<0xFF800000> : vector<16xf32>
    %69 = vector.multi_reduction <maximumf>, %68, %cst_48 [1] : vector<16x16xf32> to vector<16xf32>
    %70 = vector.shape_cast %69 : vector<16xf32> to vector<16x1xf32>
    %71 = vector.broadcast %70 : vector<16x1xf32> to vector<16x16xf32>
    %72 = arith.subf %68, %71 : vector<16x16xf32>
    %73 = math.exp %72 : vector<16x16xf32>
    %cst_49 = arith.constant dense<0.000000e+00> : vector<16xf32>
    %74 = vector.multi_reduction <add>, %73, %cst_49 [1] : vector<16x16xf32> to vector<16xf32>
    %75 = vector.shape_cast %74 : vector<16xf32> to vector<16x1xf32>
    %76 = tpu.reciprocal %75 {approx = true} : vector<16x1xf32> -> vector<16x1xf32>
    %77 = vector.broadcast %76 : vector<16x1xf32> to vector<16x16xf32>
    %78 = arith.mulf %73, %77 : vector<16x16xf32>
    %cst_50 = arith.constant dense<0.000000e+00> : vector<16x8xf32>
    %79 = tpu.matmul %78, %64, %cst_50 {dimension_numbers = #tpu.dot_dimension_numbers<[1], [0], [0], [1], [0, 0, 1, 1], [], []>} : vector<16x16xf32>, vector<16x8xf32>, vector<16x8xf32> -> vector<16x8xf32>
    %80 = vector.extract_strided_slice %18 {offsets = [8, 0], sizes = [8, 32], strides = [1, 1]} : vector<32x32xf32> to vector<8x32xf32>
    %cst_51 = arith.constant dense<0.000000e+00> : vector<16x32xf32>
    %81 = tpu.matmul %79, %80, %cst_51 {dimension_numbers = #tpu.dot_dimension_numbers<[1], [0], [0], [1], [0, 0, 1, 1], [], []>} : vector<16x8xf32>, vector<8x32xf32>, vector<16x32xf32> -> vector<16x32xf32>
    %82 = arith.addf %61, %81 : vector<16x32xf32>
    %83 = vector.extract_strided_slice %36 {offsets = [0, 16], sizes = [16, 8], strides = [1, 1]} : vector<16x32xf32> to vector<16x8xf32>
    %84 = vector.extract_strided_slice %37 {offsets = [0, 16], sizes = [16, 8], strides = [1, 1]} : vector<16x32xf32> to vector<16x8xf32>
    %85 = vector.extract_strided_slice %38 {offsets = [0, 16], sizes = [16, 8], strides = [1, 1]} : vector<16x32xf32> to vector<16x8xf32>
    %cst_52 = arith.constant dense<0.000000e+00> : vector<16x16xf32>
    %86 = tpu.matmul %83, %84, %cst_52 {dimension_numbers = #tpu.dot_dimension_numbers<[1], [1], [0], [0], [0, 0, 1, 0], [], []>} : vector<16x8xf32>, vector<16x8xf32>, vector<16x16xf32> -> vector<16x16xf32>
    %cst_53 = arith.constant 0.353553385 : f32
    %87 = vector.broadcast %cst_53 : f32 to vector<16x16xf32>
    %88 = arith.mulf %86, %87 : vector<16x16xf32>
    %89 = arith.addf %88, %12 : vector<16x16xf32>
    %cst_54 = arith.constant dense<0xFF800000> : vector<16xf32>
    %90 = vector.multi_reduction <maximumf>, %89, %cst_54 [1] : vector<16x16xf32> to vector<16xf32>
    %91 = vector.shape_cast %90 : vector<16xf32> to vector<16x1xf32>
    %92 = vector.broadcast %91 : vector<16x1xf32> to vector<16x16xf32>
    %93 = arith.subf %89, %92 : vector<16x16xf32>
    %94 = math.exp %93 : vector<16x16xf32>
    %cst_55 = arith.constant dense<0.000000e+00> : vector<16xf32>
    %95 = vector.multi_reduction <add>, %94, %cst_55 [1] : vector<16x16xf32> to vector<16xf32>
    %96 = vector.shape_cast %95 : vector<16xf32> to vector<16x1xf32>
    %97 = tpu.reciprocal %96 {approx = true} : vector<16x1xf32> -> vector<16x1xf32>
    %98 = vector.broadcast %97 : vector<16x1xf32> to vector<16x16xf32>
    %99 = arith.mulf %94, %98 : vector<16x16xf32>
    %cst_56 = arith.constant dense<0.000000e+00> : vector<16x8xf32>
    %100 = tpu.matmul %99, %85, %cst_56 {dimension_numbers = #tpu.dot_dimension_numbers<[1], [0], [0], [1], [0, 0, 1, 1], [], []>} : vector<16x16xf32>, vector<16x8xf32>, vector<16x8xf32> -> vector<16x8xf32>
    %101 = vector.extract_strided_slice %18 {offsets = [16, 0], sizes = [8, 32], strides = [1, 1]} : vector<32x32xf32> to vector<8x32xf32>
    %cst_57 = arith.constant dense<0.000000e+00> : vector<16x32xf32>
    %102 = tpu.matmul %100, %101, %cst_57 {dimension_numbers = #tpu.dot_dimension_numbers<[1], [0], [0], [1], [0, 0, 1, 1], [], []>} : vector<16x8xf32>, vector<8x32xf32>, vector<16x32xf32> -> vector<16x32xf32>
    %103 = arith.addf %82, %102 : vector<16x32xf32>
    %104 = vector.extract_strided_slice %36 {offsets = [0, 24], sizes = [16, 8], strides = [1, 1]} : vector<16x32xf32> to vector<16x8xf32>
    %105 = vector.extract_strided_slice %37 {offsets = [0, 24], sizes = [16, 8], strides = [1, 1]} : vector<16x32xf32> to vector<16x8xf32>
    %106 = vector.extract_strided_slice %38 {offsets = [0, 24], sizes = [16, 8], strides = [1, 1]} : vector<16x32xf32> to vector<16x8xf32>
    %cst_58 = arith.constant dense<0.000000e+00> : vector<16x16xf32>
    %107 = tpu.matmul %104, %105, %cst_58 {dimension_numbers = #tpu.dot_dimension_numbers<[1], [1], [0], [0], [0, 0, 1, 0], [], []>} : vector<16x8xf32>, vector<16x8xf32>, vector<16x16xf32> -> vector<16x16xf32>
    %cst_59 = arith.constant 0.353553385 : f32
    %108 = vector.broadcast %cst_59 : f32 to vector<16x16xf32>
    %109 = arith.mulf %107, %108 : vector<16x16xf32>
    %110 = arith.addf %109, %12 : vector<16x16xf32>
    %cst_60 = arith.constant dense<0xFF800000> : vector<16xf32>
    %111 = vector.multi_reduction <maximumf>, %110, %cst_60 [1] : vector<16x16xf32> to vector<16xf32>
    %112 = vector.shape_cast %111 : vector<16xf32> to vector<16x1xf32>
    %113 = vector.broadcast %112 : vector<16x1xf32> to vector<16x16xf32>
    %114 = arith.subf %110, %113 : vector<16x16xf32>
    %115 = math.exp %114 : vector<16x16xf32>
    %cst_61 = arith.constant dense<0.000000e+00> : vector<16xf32>
    %116 = vector.multi_reduction <add>, %115, %cst_61 [1] : vector<16x16xf32> to vector<16xf32>
    %117 = vector.shape_cast %116 : vector<16xf32> to vector<16x1xf32>
    %118 = tpu.reciprocal %117 {approx = true} : vector<16x1xf32> -> vector<16x1xf32>
    %119 = vector.broadcast %118 : vector<16x1xf32> to vector<16x16xf32>
    %120 = arith.mulf %115, %119 : vector<16x16xf32>
    %cst_62 = arith.constant dense<0.000000e+00> : vector<16x8xf32>
    %121 = tpu.matmul %120, %106, %cst_62 {dimension_numbers = #tpu.dot_dimension_numbers<[1], [0], [0], [1], [0, 0, 1, 1], [], []>} : vector<16x16xf32>, vector<16x8xf32>, vector<16x8xf32> -> vector<16x8xf32>
    %122 = vector.extract_strided_slice %18 {offsets = [24, 0], sizes = [8, 32], strides = [1, 1]} : vector<32x32xf32> to vector<8x32xf32>
    %cst_63 = arith.constant dense<0.000000e+00> : vector<16x32xf32>
    %123 = tpu.matmul %121, %122, %cst_63 {dimension_numbers = #tpu.dot_dimension_numbers<[1], [0], [0], [1], [0, 0, 1, 1], [], []>} : vector<16x8xf32>, vector<8x32xf32>, vector<16x32xf32> -> vector<16x32xf32>
    %124 = arith.addf %103, %123 : vector<16x32xf32>
    %cst_64 = arith.constant dense<0.000000e+00> : vector<16xf32>
    %125 = vector.multi_reduction <add>, %124, %cst_64 [1] : vector<16x32xf32> to vector<16xf32>
    %126 = vector.shape_cast %125 : vector<16xf32> to vector<16x1xf32>
    %cst_65 = arith.constant 3.200000e+01 : f32
    %127 = vector.broadcast %cst_65 : f32 to vector<16x1xf32>
    %128 = arith.divf %126, %127 : vector<16x1xf32>
    %129 = vector.broadcast %128 : vector<16x1xf32> to vector<16x32xf32>
    %130 = arith.subf %124, %129 : vector<16x32xf32>
    %131 = vector.broadcast %128 : vector<16x1xf32> to vector<16x32xf32>
    %132 = arith.subf %124, %131 : vector<16x32xf32>
    %133 = arith.mulf %130, %132 : vector<16x32xf32>
    %cst_66 = arith.constant dense<0.000000e+00> : vector<16xf32>
    %134 = vector.multi_reduction <add>, %133, %cst_66 [1] : vector<16x32xf32> to vector<16xf32>
    %135 = vector.shape_cast %134 : vector<16xf32> to vector<16x1xf32>
    %cst_67 = arith.constant 3.200000e+01 : f32
    %136 = vector.broadcast %cst_67 : f32 to vector<16x1xf32>
    %137 = arith.divf %135, %136 : vector<16x1xf32>
    %138 = vector.broadcast %128 : vector<16x1xf32> to vector<16x32xf32>
    %139 = arith.subf %124, %138 : vector<16x32xf32>
    %cst_68 = arith.constant 9.99999974E-6 : f32
    %140 = vector.broadcast %cst_68 : f32 to vector<16x1xf32>
    %141 = arith.addf %137, %140 : vector<16x1xf32>
    %142 = math.rsqrt %141 : vector<16x1xf32>
    %143 = vector.broadcast %142 : vector<16x1xf32> to vector<16x32xf32>
    %144 = arith.mulf %139, %143 : vector<16x32xf32>
    %145 = vector.broadcast %22 : vector<1x32xf32> to vector<16x32xf32>
    %146 = arith.mulf %144, %145 : vector<16x32xf32>
    %147 = vector.broadcast %24 : vector<1x32xf32> to vector<16x32xf32>
    %148 = arith.addf %146, %147 : vector<16x32xf32>
    %149 = arith.truncf %148 : vector<16x32xf32> to vector<16x32xbf16>
    %cst_69 = arith.constant dense<0.000000e+00> : vector<16x2048xf32>
    %150 = tpu.matmul %149, %26, %cst_69 {dimension_numbers = #tpu.dot_dimension_numbers<[1], [0], [0], [1], [0, 0, 1, 1], [], []>} : vector<16x32xbf16>, vector<32x2048xbf16>, vector<16x2048xf32> -> vector<16x2048xf32>
    %151 = vector.broadcast %28 : vector<1x2048xf32> to vector<16x2048xf32>
    %152 = arith.addf %150, %151 : vector<16x2048xf32>
    %cst_70 = arith.constant 0.000000e+00 : f32
    %153 = vector.broadcast %cst_70 : f32 to vector<16x2048xf32>
    %154 = arith.maximumf %152, %153 : vector<16x2048xf32>
    %155 = arith.truncf %154 : vector<16x2048xf32> to vector<16x2048xbf16>
    %cst_71 = arith.constant dense<0.000000e+00> : vector<16x32xf32>
    %156 = tpu.matmul %155, %30, %cst_71 {dimension_numbers = #tpu.dot_dimension_numbers<[1], [0], [0], [1], [0, 0, 1, 1], [], []>} : vector<16x2048xbf16>, vector<2048x32xbf16>, vector<16x32xf32> -> vector<16x32xf32>
    %157 = vector.broadcast %32 : vector<1x32xf32> to vector<16x32xf32>
    %158 = arith.addf %156, %157 : vector<16x32xf32>
    %159 = arith.addf %158, %148 : vector<16x32xf32>
    %cst_72 = arith.constant dense<0.000000e+00> : vector<16xf32>
    %160 = vector.multi_reduction <add>, %159, %cst_72 [1] : vector<16x32xf32> to vector<16xf32>
    %161 = vector.shape_cast %160 : vector<16xf32> to vector<16x1xf32>
    %cst_73 = arith.constant 3.200000e+01 : f32
    %162 = vector.broadcast %cst_73 : f32 to vector<16x1xf32>
    %163 = arith.divf %161, %162 : vector<16x1xf32>
    %164 = vector.broadcast %163 : vector<16x1xf32> to vector<16x32xf32>
    %165 = arith.subf %159, %164 : vector<16x32xf32>
    %166 = vector.broadcast %163 : vector<16x1xf32> to vector<16x32xf32>
    %167 = arith.subf %159, %166 : vector<16x32xf32>
    %168 = arith.mulf %165, %167 : vector<16x32xf32>
    %cst_74 = arith.constant dense<0.000000e+00> : vector<16xf32>
    %169 = vector.multi_reduction <add>, %168, %cst_74 [1] : vector<16x32xf32> to vector<16xf32>
    %170 = vector.shape_cast %169 : vector<16xf32> to vector<16x1xf32>
    %cst_75 = arith.constant 3.200000e+01 : f32
    %171 = vector.broadcast %cst_75 : f32 to vector<16x1xf32>
    %172 = arith.divf %170, %171 : vector<16x1xf32>
    %173 = vector.broadcast %163 : vector<16x1xf32> to vector<16x32xf32>
    %174 = arith.subf %159, %173 : vector<16x32xf32>
    %cst_76 = arith.constant 9.99999974E-6 : f32
    %175 = vector.broadcast %cst_76 : f32 to vector<16x1xf32>
    %176 = arith.addf %172, %175 : vector<16x1xf32>
    %177 = math.rsqrt %176 : vector<16x1xf32>
    %178 = vector.broadcast %177 : vector<16x1xf32> to vector<16x32xf32>
    %179 = arith.mulf %174, %178 : vector<16x32xf32>
    %180 = vector.broadcast %22 : vector<1x32xf32> to vector<16x32xf32>
    %181 = arith.mulf %179, %180 : vector<16x32xf32>
    %182 = vector.broadcast %24 : vector<1x32xf32> to vector<16x32xf32>
    %183 = arith.addf %181, %182 : vector<16x32xf32>
    %c1 = arith.constant 1 : index
    %c0_77 = arith.constant 0 : index
    %c0_78 = arith.constant 0 : index
    %184 = vector.load %arg6[%c1, %c0_77, %c0_78] : memref<2x32x96xf32, #tpu.memory_space<vmem>>, vector<1x32x96xf32>
    %185 = vector.shape_cast %184 : vector<1x32x96xf32> to vector<32x96xf32>
    %c1_79 = arith.constant 1 : index
    %c0_80 = arith.constant 0 : index
    %c0_81 = arith.constant 0 : index
    %186 = vector.load %arg7[%c1_79, %c0_80, %c0_81] : memref<2x1x96xf32, #tpu.memory_space<vmem>>, vector<1x1x96xf32>
    %187 = vector.shape_cast %186 : vector<1x1x96xf32> to vector<1x96xf32>
    %c1_82 = arith.constant 1 : index
    %c0_83 = arith.constant 0 : index
    %c0_84 = arith.constant 0 : index
    %188 = vector.load %arg8[%c1_82, %c0_83, %c0_84] : memref<2x32x32xf32, #tpu.memory_space<vmem>>, vector<1x32x32xf32>
    %189 = vector.shape_cast %188 : vector<1x32x32xf32> to vector<32x32xf32>
    %c1_85 = arith.constant 1 : index
    %c0_86 = arith.constant 0 : index
    %c0_87 = arith.constant 0 : index
    %190 = vector.load %arg9[%c1_85, %c0_86, %c0_87] : memref<2x1x32xf32, #tpu.memory_space<vmem>>, vector<1x1x32xf32>
    %191 = vector.shape_cast %190 : vector<1x1x32xf32> to vector<1x32xf32>
    %c1_88 = arith.constant 1 : index
    %c0_89 = arith.constant 0 : index
    %c0_90 = arith.constant 0 : index
    %192 = vector.load %arg10[%c1_88, %c0_89, %c0_90] : memref<2x1x32xf32, #tpu.memory_space<vmem>>, vector<1x1x32xf32>
    %193 = vector.shape_cast %192 : vector<1x1x32xf32> to vector<1x32xf32>
    %c1_91 = arith.constant 1 : index
    %c0_92 = arith.constant 0 : index
    %c0_93 = arith.constant 0 : index
    %194 = vector.load %arg11[%c1_91, %c0_92, %c0_93] : memref<2x1x32xf32, #tpu.memory_space<vmem>>, vector<1x1x32xf32>
    %195 = vector.shape_cast %194 : vector<1x1x32xf32> to vector<1x32xf32>
    %c1_94 = arith.constant 1 : index
    %c0_95 = arith.constant 0 : index
    %c0_96 = arith.constant 0 : index
    %196 = vector.load %arg12[%c1_94, %c0_95, %c0_96] : memref<2x32x2048xbf16, #tpu.memory_space<vmem>>, vector<1x32x2048xbf16>
    %197 = vector.shape_cast %196 : vector<1x32x2048xbf16> to vector<32x2048xbf16>
    %c1_97 = arith.constant 1 : index
    %c0_98 = arith.constant 0 : index
    %c0_99 = arith.constant 0 : index
    %198 = vector.load %arg13[%c1_97, %c0_98, %c0_99] : memref<2x1x2048xf32, #tpu.memory_space<vmem>>, vector<1x1x2048xf32>
    %199 = vector.shape_cast %198 : vector<1x1x2048xf32> to vector<1x2048xf32>
    %c1_100 = arith.constant 1 : index
    %c0_101 = arith.constant 0 : index
    %c0_102 = arith.constant 0 : index
    %200 = vector.load %arg14[%c1_100, %c0_101, %c0_102] : memref<2x2048x32xbf16, #tpu.memory_space<vmem>>, vector<1x2048x32xbf16>
    %201 = vector.shape_cast %200 : vector<1x2048x32xbf16> to vector<2048x32xbf16>
    %c1_103 = arith.constant 1 : index
    %c0_104 = arith.constant 0 : index
    %c0_105 = arith.constant 0 : index
    %202 = vector.load %arg15[%c1_103, %c0_104, %c0_105] : memref<2x1x32xf32, #tpu.memory_space<vmem>>, vector<1x1x32xf32>
    %203 = vector.shape_cast %202 : vector<1x1x32xf32> to vector<1x32xf32>
    %cst_106 = arith.constant dense<0.000000e+00> : vector<16x96xf32>
    %204 = tpu.matmul %183, %185, %cst_106 {dimension_numbers = #tpu.dot_dimension_numbers<[1], [0], [0], [1], [0, 0, 1, 1], [], []>} : vector<16x32xf32>, vector<32x96xf32>, vector<16x96xf32> -> vector<16x96xf32>
    %205 = vector.broadcast %187 : vector<1x96xf32> to vector<16x96xf32>
    %206 = arith.addf %204, %205 : vector<16x96xf32>
    %207 = vector.extract_strided_slice %206 {offsets = [0, 0], sizes = [16, 32], strides = [1, 1]} : vector<16x96xf32> to vector<16x32xf32>
    %208 = vector.extract_strided_slice %206 {offsets = [0, 32], sizes = [16, 32], strides = [1, 1]} : vector<16x96xf32> to vector<16x32xf32>
    %209 = vector.extract_strided_slice %206 {offsets = [0, 64], sizes = [16, 32], strides = [1, 1]} : vector<16x96xf32> to vector<16x32xf32>
    %210 = vector.broadcast %191 : vector<1x32xf32> to vector<16x32xf32>
    %211 = arith.addf %183, %210 : vector<16x32xf32>
    %212 = vector.extract_strided_slice %207 {offsets = [0, 0], sizes = [16, 8], strides = [1, 1]} : vector<16x32xf32> to vector<16x8xf32>
    %213 = vector.extract_strided_slice %208 {offsets = [0, 0], sizes = [16, 8], strides = [1, 1]} : vector<16x32xf32> to vector<16x8xf32>
    %214 = vector.extract_strided_slice %209 {offsets = [0, 0], sizes = [16, 8], strides = [1, 1]} : vector<16x32xf32> to vector<16x8xf32>
    %cst_107 = arith.constant dense<0.000000e+00> : vector<16x16xf32>
    %215 = tpu.matmul %212, %213, %cst_107 {dimension_numbers = #tpu.dot_dimension_numbers<[1], [1], [0], [0], [0, 0, 1, 0], [], []>} : vector<16x8xf32>, vector<16x8xf32>, vector<16x16xf32> -> vector<16x16xf32>
    %cst_108 = arith.constant 0.353553385 : f32
    %216 = vector.broadcast %cst_108 : f32 to vector<16x16xf32>
    %217 = arith.mulf %215, %216 : vector<16x16xf32>
    %218 = arith.addf %217, %12 : vector<16x16xf32>
    %cst_109 = arith.constant dense<0xFF800000> : vector<16xf32>
    %219 = vector.multi_reduction <maximumf>, %218, %cst_109 [1] : vector<16x16xf32> to vector<16xf32>
    %220 = vector.shape_cast %219 : vector<16xf32> to vector<16x1xf32>
    %221 = vector.broadcast %220 : vector<16x1xf32> to vector<16x16xf32>
    %222 = arith.subf %218, %221 : vector<16x16xf32>
    %223 = math.exp %222 : vector<16x16xf32>
    %cst_110 = arith.constant dense<0.000000e+00> : vector<16xf32>
    %224 = vector.multi_reduction <add>, %223, %cst_110 [1] : vector<16x16xf32> to vector<16xf32>
    %225 = vector.shape_cast %224 : vector<16xf32> to vector<16x1xf32>
    %226 = tpu.reciprocal %225 {approx = true} : vector<16x1xf32> -> vector<16x1xf32>
    %227 = vector.broadcast %226 : vector<16x1xf32> to vector<16x16xf32>
    %228 = arith.mulf %223, %227 : vector<16x16xf32>
    %cst_111 = arith.constant dense<0.000000e+00> : vector<16x8xf32>
    %229 = tpu.matmul %228, %214, %cst_111 {dimension_numbers = #tpu.dot_dimension_numbers<[1], [0], [0], [1], [0, 0, 1, 1], [], []>} : vector<16x16xf32>, vector<16x8xf32>, vector<16x8xf32> -> vector<16x8xf32>
    %230 = vector.extract_strided_slice %189 {offsets = [0, 0], sizes = [8, 32], strides = [1, 1]} : vector<32x32xf32> to vector<8x32xf32>
    %cst_112 = arith.constant dense<0.000000e+00> : vector<16x32xf32>
    %231 = tpu.matmul %229, %230, %cst_112 {dimension_numbers = #tpu.dot_dimension_numbers<[1], [0], [0], [1], [0, 0, 1, 1], [], []>} : vector<16x8xf32>, vector<8x32xf32>, vector<16x32xf32> -> vector<16x32xf32>
    %232 = arith.addf %211, %231 : vector<16x32xf32>
    %233 = vector.extract_strided_slice %207 {offsets = [0, 8], sizes = [16, 8], strides = [1, 1]} : vector<16x32xf32> to vector<16x8xf32>
    %234 = vector.extract_strided_slice %208 {offsets = [0, 8], sizes = [16, 8], strides = [1, 1]} : vector<16x32xf32> to vector<16x8xf32>
    %235 = vector.extract_strided_slice %209 {offsets = [0, 8], sizes = [16, 8], strides = [1, 1]} : vector<16x32xf32> to vector<16x8xf32>
    %cst_113 = arith.constant dense<0.000000e+00> : vector<16x16xf32>
    %236 = tpu.matmul %233, %234, %cst_113 {dimension_numbers = #tpu.dot_dimension_numbers<[1], [1], [0], [0], [0, 0, 1, 0], [], []>} : vector<16x8xf32>, vector<16x8xf32>, vector<16x16xf32> -> vector<16x16xf32>
    %cst_114 = arith.constant 0.353553385 : f32
    %237 = vector.broadcast %cst_114 : f32 to vector<16x16xf32>
    %238 = arith.mulf %236, %237 : vector<16x16xf32>
    %239 = arith.addf %238, %12 : vector<16x16xf32>
    %cst_115 = arith.constant dense<0xFF800000> : vector<16xf32>
    %240 = vector.multi_reduction <maximumf>, %239, %cst_115 [1] : vector<16x16xf32> to vector<16xf32>
    %241 = vector.shape_cast %240 : vector<16xf32> to vector<16x1xf32>
    %242 = vector.broadcast %241 : vector<16x1xf32> to vector<16x16xf32>
    %243 = arith.subf %239, %242 : vector<16x16xf32>
    %244 = math.exp %243 : vector<16x16xf32>
    %cst_116 = arith.constant dense<0.000000e+00> : vector<16xf32>
    %245 = vector.multi_reduction <add>, %244, %cst_116 [1] : vector<16x16xf32> to vector<16xf32>
    %246 = vector.shape_cast %245 : vector<16xf32> to vector<16x1xf32>
    %247 = tpu.reciprocal %246 {approx = true} : vector<16x1xf32> -> vector<16x1xf32>
    %248 = vector.broadcast %247 : vector<16x1xf32> to vector<16x16xf32>
    %249 = arith.mulf %244, %248 : vector<16x16xf32>
    %cst_117 = arith.constant dense<0.000000e+00> : vector<16x8xf32>
    %250 = tpu.matmul %249, %235, %cst_117 {dimension_numbers = #tpu.dot_dimension_numbers<[1], [0], [0], [1], [0, 0, 1, 1], [], []>} : vector<16x16xf32>, vector<16x8xf32>, vector<16x8xf32> -> vector<16x8xf32>
    %251 = vector.extract_strided_slice %189 {offsets = [8, 0], sizes = [8, 32], strides = [1, 1]} : vector<32x32xf32> to vector<8x32xf32>
    %cst_118 = arith.constant dense<0.000000e+00> : vector<16x32xf32>
    %252 = tpu.matmul %250, %251, %cst_118 {dimension_numbers = #tpu.dot_dimension_numbers<[1], [0], [0], [1], [0, 0, 1, 1], [], []>} : vector<16x8xf32>, vector<8x32xf32>, vector<16x32xf32> -> vector<16x32xf32>
    %253 = arith.addf %232, %252 : vector<16x32xf32>
    %254 = vector.extract_strided_slice %207 {offsets = [0, 16], sizes = [16, 8], strides = [1, 1]} : vector<16x32xf32> to vector<16x8xf32>
    %255 = vector.extract_strided_slice %208 {offsets = [0, 16], sizes = [16, 8], strides = [1, 1]} : vector<16x32xf32> to vector<16x8xf32>
    %256 = vector.extract_strided_slice %209 {offsets = [0, 16], sizes = [16, 8], strides = [1, 1]} : vector<16x32xf32> to vector<16x8xf32>
    %cst_119 = arith.constant dense<0.000000e+00> : vector<16x16xf32>
    %257 = tpu.matmul %254, %255, %cst_119 {dimension_numbers = #tpu.dot_dimension_numbers<[1], [1], [0], [0], [0, 0, 1, 0], [], []>} : vector<16x8xf32>, vector<16x8xf32>, vector<16x16xf32> -> vector<16x16xf32>
    %cst_120 = arith.constant 0.353553385 : f32
    %258 = vector.broadcast %cst_120 : f32 to vector<16x16xf32>
    %259 = arith.mulf %257, %258 : vector<16x16xf32>
    %260 = arith.addf %259, %12 : vector<16x16xf32>
    %cst_121 = arith.constant dense<0xFF800000> : vector<16xf32>
    %261 = vector.multi_reduction <maximumf>, %260, %cst_121 [1] : vector<16x16xf32> to vector<16xf32>
    %262 = vector.shape_cast %261 : vector<16xf32> to vector<16x1xf32>
    %263 = vector.broadcast %262 : vector<16x1xf32> to vector<16x16xf32>
    %264 = arith.subf %260, %263 : vector<16x16xf32>
    %265 = math.exp %264 : vector<16x16xf32>
    %cst_122 = arith.constant dense<0.000000e+00> : vector<16xf32>
    %266 = vector.multi_reduction <add>, %265, %cst_122 [1] : vector<16x16xf32> to vector<16xf32>
    %267 = vector.shape_cast %266 : vector<16xf32> to vector<16x1xf32>
    %268 = tpu.reciprocal %267 {approx = true} : vector<16x1xf32> -> vector<16x1xf32>
    %269 = vector.broadcast %268 : vector<16x1xf32> to vector<16x16xf32>
    %270 = arith.mulf %265, %269 : vector<16x16xf32>
    %cst_123 = arith.constant dense<0.000000e+00> : vector<16x8xf32>
    %271 = tpu.matmul %270, %256, %cst_123 {dimension_numbers = #tpu.dot_dimension_numbers<[1], [0], [0], [1], [0, 0, 1, 1], [], []>} : vector<16x16xf32>, vector<16x8xf32>, vector<16x8xf32> -> vector<16x8xf32>
    %272 = vector.extract_strided_slice %189 {offsets = [16, 0], sizes = [8, 32], strides = [1, 1]} : vector<32x32xf32> to vector<8x32xf32>
    %cst_124 = arith.constant dense<0.000000e+00> : vector<16x32xf32>
    %273 = tpu.matmul %271, %272, %cst_124 {dimension_numbers = #tpu.dot_dimension_numbers<[1], [0], [0], [1], [0, 0, 1, 1], [], []>} : vector<16x8xf32>, vector<8x32xf32>, vector<16x32xf32> -> vector<16x32xf32>
    %274 = arith.addf %253, %273 : vector<16x32xf32>
    %275 = vector.extract_strided_slice %207 {offsets = [0, 24], sizes = [16, 8], strides = [1, 1]} : vector<16x32xf32> to vector<16x8xf32>
    %276 = vector.extract_strided_slice %208 {offsets = [0, 24], sizes = [16, 8], strides = [1, 1]} : vector<16x32xf32> to vector<16x8xf32>
    %277 = vector.extract_strided_slice %209 {offsets = [0, 24], sizes = [16, 8], strides = [1, 1]} : vector<16x32xf32> to vector<16x8xf32>
    %cst_125 = arith.constant dense<0.000000e+00> : vector<16x16xf32>
    %278 = tpu.matmul %275, %276, %cst_125 {dimension_numbers = #tpu.dot_dimension_numbers<[1], [1], [0], [0], [0, 0, 1, 0], [], []>} : vector<16x8xf32>, vector<16x8xf32>, vector<16x16xf32> -> vector<16x16xf32>
    %cst_126 = arith.constant 0.353553385 : f32
    %279 = vector.broadcast %cst_126 : f32 to vector<16x16xf32>
    %280 = arith.mulf %278, %279 : vector<16x16xf32>
    %281 = arith.addf %280, %12 : vector<16x16xf32>
    %cst_127 = arith.constant dense<0xFF800000> : vector<16xf32>
    %282 = vector.multi_reduction <maximumf>, %281, %cst_127 [1] : vector<16x16xf32> to vector<16xf32>
    %283 = vector.shape_cast %282 : vector<16xf32> to vector<16x1xf32>
    %284 = vector.broadcast %283 : vector<16x1xf32> to vector<16x16xf32>
    %285 = arith.subf %281, %284 : vector<16x16xf32>
    %286 = math.exp %285 : vector<16x16xf32>
    %cst_128 = arith.constant dense<0.000000e+00> : vector<16xf32>
    %287 = vector.multi_reduction <add>, %286, %cst_128 [1] : vector<16x16xf32> to vector<16xf32>
    %288 = vector.shape_cast %287 : vector<16xf32> to vector<16x1xf32>
    %289 = tpu.reciprocal %288 {approx = true} : vector<16x1xf32> -> vector<16x1xf32>
    %290 = vector.broadcast %289 : vector<16x1xf32> to vector<16x16xf32>
    %291 = arith.mulf %286, %290 : vector<16x16xf32>
    %cst_129 = arith.constant dense<0.000000e+00> : vector<16x8xf32>
    %292 = tpu.matmul %291, %277, %cst_129 {dimension_numbers = #tpu.dot_dimension_numbers<[1], [0], [0], [1], [0, 0, 1, 1], [], []>} : vector<16x16xf32>, vector<16x8xf32>, vector<16x8xf32> -> vector<16x8xf32>
    %293 = vector.extract_strided_slice %189 {offsets = [24, 0], sizes = [8, 32], strides = [1, 1]} : vector<32x32xf32> to vector<8x32xf32>
    %cst_130 = arith.constant dense<0.000000e+00> : vector<16x32xf32>
    %294 = tpu.matmul %292, %293, %cst_130 {dimension_numbers = #tpu.dot_dimension_numbers<[1], [0], [0], [1], [0, 0, 1, 1], [], []>} : vector<16x8xf32>, vector<8x32xf32>, vector<16x32xf32> -> vector<16x32xf32>
    %295 = arith.addf %274, %294 : vector<16x32xf32>
    %cst_131 = arith.constant dense<0.000000e+00> : vector<16xf32>
    %296 = vector.multi_reduction <add>, %295, %cst_131 [1] : vector<16x32xf32> to vector<16xf32>
    %297 = vector.shape_cast %296 : vector<16xf32> to vector<16x1xf32>
    %cst_132 = arith.constant 3.200000e+01 : f32
    %298 = vector.broadcast %cst_132 : f32 to vector<16x1xf32>
    %299 = arith.divf %297, %298 : vector<16x1xf32>
    %300 = vector.broadcast %299 : vector<16x1xf32> to vector<16x32xf32>
    %301 = arith.subf %295, %300 : vector<16x32xf32>
    %302 = vector.broadcast %299 : vector<16x1xf32> to vector<16x32xf32>
    %303 = arith.subf %295, %302 : vector<16x32xf32>
    %304 = arith.mulf %301, %303 : vector<16x32xf32>
    %cst_133 = arith.constant dense<0.000000e+00> : vector<16xf32>
    %305 = vector.multi_reduction <add>, %304, %cst_133 [1] : vector<16x32xf32> to vector<16xf32>
    %306 = vector.shape_cast %305 : vector<16xf32> to vector<16x1xf32>
    %cst_134 = arith.constant 3.200000e+01 : f32
    %307 = vector.broadcast %cst_134 : f32 to vector<16x1xf32>
    %308 = arith.divf %306, %307 : vector<16x1xf32>
    %309 = vector.broadcast %299 : vector<16x1xf32> to vector<16x32xf32>
    %310 = arith.subf %295, %309 : vector<16x32xf32>
    %cst_135 = arith.constant 9.99999974E-6 : f32
    %311 = vector.broadcast %cst_135 : f32 to vector<16x1xf32>
    %312 = arith.addf %308, %311 : vector<16x1xf32>
    %313 = math.rsqrt %312 : vector<16x1xf32>
    %314 = vector.broadcast %313 : vector<16x1xf32> to vector<16x32xf32>
    %315 = arith.mulf %310, %314 : vector<16x32xf32>
    %316 = vector.broadcast %193 : vector<1x32xf32> to vector<16x32xf32>
    %317 = arith.mulf %315, %316 : vector<16x32xf32>
    %318 = vector.broadcast %195 : vector<1x32xf32> to vector<16x32xf32>
    %319 = arith.addf %317, %318 : vector<16x32xf32>
    %320 = arith.truncf %319 : vector<16x32xf32> to vector<16x32xbf16>
    %cst_136 = arith.constant dense<0.000000e+00> : vector<16x2048xf32>
    %321 = tpu.matmul %320, %197, %cst_136 {dimension_numbers = #tpu.dot_dimension_numbers<[1], [0], [0], [1], [0, 0, 1, 1], [], []>} : vector<16x32xbf16>, vector<32x2048xbf16>, vector<16x2048xf32> -> vector<16x2048xf32>
    %322 = vector.broadcast %199 : vector<1x2048xf32> to vector<16x2048xf32>
    %323 = arith.addf %321, %322 : vector<16x2048xf32>
    %cst_137 = arith.constant 0.000000e+00 : f32
    %324 = vector.broadcast %cst_137 : f32 to vector<16x2048xf32>
    %325 = arith.maximumf %323, %324 : vector<16x2048xf32>
    %326 = arith.truncf %325 : vector<16x2048xf32> to vector<16x2048xbf16>
    %cst_138 = arith.constant dense<0.000000e+00> : vector<16x32xf32>
    %327 = tpu.matmul %326, %201, %cst_138 {dimension_numbers = #tpu.dot_dimension_numbers<[1], [0], [0], [1], [0, 0, 1, 1], [], []>} : vector<16x2048xbf16>, vector<2048x32xbf16>, vector<16x32xf32> -> vector<16x32xf32>
    %328 = vector.broadcast %203 : vector<1x32xf32> to vector<16x32xf32>
    %329 = arith.addf %327, %328 : vector<16x32xf32>
    %330 = arith.addf %329, %319 : vector<16x32xf32>
    %cst_139 = arith.constant dense<0.000000e+00> : vector<16xf32>
    %331 = vector.multi_reduction <add>, %330, %cst_139 [1] : vector<16x32xf32> to vector<16xf32>
    %332 = vector.shape_cast %331 : vector<16xf32> to vector<16x1xf32>
    %cst_140 = arith.constant 3.200000e+01 : f32
    %333 = vector.broadcast %cst_140 : f32 to vector<16x1xf32>
    %334 = arith.divf %332, %333 : vector<16x1xf32>
    %335 = vector.broadcast %334 : vector<16x1xf32> to vector<16x32xf32>
    %336 = arith.subf %330, %335 : vector<16x32xf32>
    %337 = vector.broadcast %334 : vector<16x1xf32> to vector<16x32xf32>
    %338 = arith.subf %330, %337 : vector<16x32xf32>
    %339 = arith.mulf %336, %338 : vector<16x32xf32>
    %cst_141 = arith.constant dense<0.000000e+00> : vector<16xf32>
    %340 = vector.multi_reduction <add>, %339, %cst_141 [1] : vector<16x32xf32> to vector<16xf32>
    %341 = vector.shape_cast %340 : vector<16xf32> to vector<16x1xf32>
    %cst_142 = arith.constant 3.200000e+01 : f32
    %342 = vector.broadcast %cst_142 : f32 to vector<16x1xf32>
    %343 = arith.divf %341, %342 : vector<16x1xf32>
    %344 = vector.broadcast %334 : vector<16x1xf32> to vector<16x32xf32>
    %345 = arith.subf %330, %344 : vector<16x32xf32>
    %cst_143 = arith.constant 9.99999974E-6 : f32
    %346 = vector.broadcast %cst_143 : f32 to vector<16x1xf32>
    %347 = arith.addf %343, %346 : vector<16x1xf32>
    %348 = math.rsqrt %347 : vector<16x1xf32>
    %349 = vector.broadcast %348 : vector<16x1xf32> to vector<16x32xf32>
    %350 = arith.mulf %345, %349 : vector<16x32xf32>
    %351 = vector.broadcast %193 : vector<1x32xf32> to vector<16x32xf32>
    %352 = arith.mulf %350, %351 : vector<16x32xf32>
    %353 = vector.broadcast %195 : vector<1x32xf32> to vector<16x32xf32>
    %354 = arith.addf %352, %353 : vector<16x32xf32>
    %c0_144 = arith.constant 0 : index
    %c0_145 = arith.constant 0 : index
    %355 = vector.load %arg5[%c0_144, %c0_145] : memref<2x16xf32, #tpu.memory_space<vmem>>, vector<2x16xf32>
    %cst_146 = arith.constant dense<0.000000e+00> : vector<2x32xf32>
    %356 = tpu.matmul %355, %354, %cst_146 {dimension_numbers = #tpu.dot_dimension_numbers<[1], [0], [0], [1], [0, 0, 1, 1], [], []>} : vector<2x16xf32>, vector<16x32xf32>, vector<2x32xf32> -> vector<2x32xf32>
    %c0_147 = arith.constant 0 : index
    %c0_148 = arith.constant 0 : index
    %357 = vector.load %arg16[%c0_147, %c0_148] : memref<1x32xf32, #tpu.memory_space<vmem>>, vector<1x32xf32>
    %358 = vector.broadcast %357 : vector<1x32xf32> to vector<2x32xf32>
    %359 = arith.mulf %356, %358 : vector<2x32xf32>
    %cst_149 = arith.constant dense<0.000000e+00> : vector<2xf32>
    %360 = vector.multi_reduction <add>, %359, %cst_149 [1] : vector<2x32xf32> to vector<2xf32>
    %361 = vector.shape_cast %360 : vector<2xf32> to vector<2x1xf32>
    %c0_150 = arith.constant 0 : index
    %c0_151 = arith.constant 0 : index
    %362 = vector.load %arg17[%c0_150, %c0_151] : memref<1x1xf32, #tpu.memory_space<vmem>>, vector<1x1xf32>
    %363 = vector.broadcast %362 : vector<1x1xf32> to vector<2x1xf32>
    %364 = arith.addf %361, %363 : vector<2x1xf32>
    %c0_152 = arith.constant 0 : index
    %c0_153 = arith.constant 0 : index
    %365 = vector.load %arg18[%c0_152, %c0_153] : memref<2x1xf32, #tpu.memory_space<vmem>>, vector<2x1xf32>
    tpu.vector_store %arg18[%c0_152, %c0_153], %364 {strides = array<i32>} : memref<2x1xf32, #tpu.memory_space<vmem>>, vector<2x1xf32>,
    return
  }
}

</mosaic_0001>

<bundles_post_ra>
// kernel: tpu_custom_call.1
= control target key start
LH: loop header
LB: loop body
LE: loop exit
PB: predicated region body
PF: predicated region fallthrough
CT: control target
= control target key end

     0   :  { %v8651_v0 = vmov 0   ;;  %vm414_vm0 = vcmask 261120   ;;  %vm510_vm1 = vcmask 64512   ;;  %vm598_vm2 = vcmask 130048   ;;  %s8653_s26 = smov 64   ;;  %s8654_s27 = smov 88   ;;  %s10391_s0 = inlined_call_operand.vmem [shape: f32[16,1], index: 0, kind: input, shape index: {}]   ;;  %s10392_s2 = inlined_call_operand.<no memory space> [shape: f32[1,1], index: 2, kind: input, shape index: {}]   ;;  %s10393_s6 = inlined_call_operand.vmem [shape: f32[2,32,96], index: 6, kind: input, shape index: {}]   ;;  %s10394_s1 = inlined_call_operand.vmem [shape: f32[1,32], index: 1, kind: input, shape index: {}]   ;;  %s10395_s3 = inlined_call_operand.vmem [shape: f32[16,32], index: 3, kind: input, shape index: {}]   ;;  %s10396_s7 = inlined_call_operand.vmem [shape: f32[2,1,96], index: 7, kind: input, shape index: {}]   ;;  %s10397_s4 = inlined_call_operand.vmem [shape: f32[16,16], index: 4, kind: input, shape index: {}]   ;;  %s10398_s8 = inlined_call_operand.vmem [shape: f32[2,32,32], index: 8, kind: input, shape index: {}]   ;;  %s10399_s9 = inlined_call_operand.vmem [shape: f32[2,1,32], index: 9, kind: input, shape index: {}]   ;;  %s10400_s12 = inlined_call_operand.vmem [shape: bf16[2,32,2048], index: 12, kind: input, shape index: {}]   ;;  %s10401_s14 = inlined_call_operand.vmem [shape: bf16[2,2048,32], index: 14, kind: input, shape index: {}]   ;;  %s10402_s10 = inlined_call_operand.vmem [shape: f32[2,1,32], index: 10, kind: input, shape index: {}]   ;;  %s10403_s11 = inlined_call_operand.vmem [shape: f32[2,1,32], index: 11, kind: input, shape index: {}]   ;;  %s10404_s13 = inlined_call_operand.vmem [shape: f32[2,1,2048], index: 13, kind: input, shape index: {}]   ;;  %s10405_s15 = inlined_call_operand.vmem [shape: f32[2,1,32], index: 15, kind: input, shape index: {}]   ;;  %s10406_s5 = inlined_call_operand.vmem [shape: f32[2,16], index: 5, kind: input, shape index: {}]   ;;  %s10407_s17 = inlined_call_operand.<no memory space> [shape: f32[1,1], index: 17, kind: input, shape index: {}]   ;;  %s10408_s16 = inlined_call_operand.vmem [shape: f32[1,32], index: 16, kind: input, shape index: {}]   ;;  %s10409_s18 = inlined_call_operand.vmem [shape: f32[2,1], index: 18, kind: output, shape index: {}]  }
   0x1   :  { %10422 = sst [smem:[#allocation4_spill]] %s10391_s0  ;;  %8307 = vset.pattern.permute.xlu0 %v8651_v0  ;;  %8308 = vset.pattern.permute.xlu1 %v8651_v0  ;;  %v6935_v10 = vld [vmem:[%s10394_s1] ss:$0 sm:$0xff]  ;;  %v100_v18 = vld [vmem:[%s10395_s3 + $0x8] sm:$0xff]  ;;  %s8655_s28 = smov 120   ;;  %vm8664_vm3 = vmmov 0  }
   0x2   :  { %10423 = sst [smem:[#allocation5_spill]] %s10392_s2  ;;  %v99_v17 = vld [vmem:[%s10395_s3] sm:$0xff]  ;;  %s8652_s3 = smov 96   ;;  %v8822_v31 = vld [vmem:[%s10397_s4 + $0x8] sm:$0xff]  ;;  %vm6917_vm4 = vcmask 254976   ;;  %vm6929_vm5 = vcmask 1024  }
   0x3   :  { %10424 = sst [smem:[#allocation6_spill]] %s10393_s6  ;;  %v6937_v23 = vld [vmem:[%s10396_s7] ss:$0 sm:$0xff]  ;;  %s8657_s30 = smov 112  }
   0x4   :  { %s10425_s29 = sld [smem:[#allocation4_spill]]  ;;  %v8827_v34 = vld [vmem:[%s10397_s4] sm:$0xff]  ;;  %s10420_s2 = smov 56  }
   0x5   :  { %s10426_s19 = sld [smem:[#allocation5_spill]]  ;;  %s10418_s20 = smov 72  }
   0x6   :  { %s10427_s6 = sld [smem:[#allocation6_spill]]  ;;  %s10416_s22 = smov 104  }
   0x7   :  { %s10414_s25 = smov 48   ;;  %s10412_s1 = smov 40  }
   0x8   :  { %s10430_s0 = smov 104   ;;  %s10431_s21 = smov 48  }
   0xa   :  { %v64_v1 = vld [vmem:[%s10425_s29] sm:$0xff]  ;;  %v65_v3 = vld [vmem:[%s10425_s29 + $0x8] sm:$0xff]  ;;  %s8656_s29 = smov 80  }
   0xb   :  { %v23_v2 = vstv %s10426_s19  ;;  %69 = vperm.xlu0 %8307, %v64_v1  }
   0xc   :  { %24 = vst [vmem:[#allocation2] sm:$0x1] %v23_v2  ;;  %v108_v4 = vld [vmem:[%s10427_s6 + $0x18] sm:$0xff]  ;;  %v107_v5 = vld [vmem:[%s10427_s6 + $0x10] sm:$0xff]  ;;  %v106_v6 = vld [vmem:[%s10427_s6 + $0x8] sm:$0xff] }
   0xd   :  { %8112 = vmatprep.subr.mxu0 %v108_v4  ;;  %v105_v7 = vld [vmem:[%s10427_s6] sm:$0xff] }
   0xe   :  { %8113 = vmatpush3.msra.mxu0 %v108_v4 }
   0xf   :  { %74 = vperm.xlu0 %8307, %v65_v3   ;;  %8114 = vmatprep.subr.mxu0 %v107_v5  ;;  %v110_v3 = vld [vmem:[%s10398_s8] sm:$0xff] }
  0x10   :  { %8115 = vmatpush3.msra.mxu0 %v107_v5 }
  0x11   :  { %8116 = vmatprep.subr.mxu0 %v106_v6 }
  0x12   :  { %8117 = vmatpush3.msra.mxu0 %v106_v6 }
  0x13   :  { %v6936_v8 = vld [vmem:[#allocation2] ss:$0 sm:$0xff]  ;;  %8118 = vmatprep.subr.mxu0 %v105_v7 }
  0x14   :  { %92 = vperm.xlu1 %8308, %v6936_v8   ;;  %8119 = vmatpush3.msra.mxu0 %v105_v7 }
  0x86   :  { %v70_v9 = vpop.permute.xlu0 %69 }
  0x87   :  { %v83_v12 = vmul.f32 %v6935_v10, %v70_v9 }
  0x8a   :  { %v75_v11 = vpop.permute.xlu0 %74 }
  0x8b   :  { %v84_v13 = vmul.f32 %v6935_v10, %v75_v11 }
  0x8f   :  { %v93_v14 = vpop.permute.xlu1 %92 }
  0x90   :  { %v95_v15 = vadd.f32 %v93_v14, %v83_v12  ;;  %v96_v16 = vadd.f32 %v93_v14, %v84_v13 }
  0x92   :  { %v97_v19 = vmul.f32 5.656854, %v95_v15  ;;  %v98_v20 = vmul.f32 5.656854, %v96_v16 }
  0x94   :  { %v8792_v21 = vadd.f32 %v99_v17, %v97_v19  ;;  %v8794_v22 = vadd.f32 %v100_v18, %v98_v20 }
  0x96   :  { %8120 = vmatprep.mubr.msk.f32.mxu0 %vm414_vm0, %v8792_v21 }
  0x97   :  { %8121 = vmatmul.mubr.msk.f32.vlgmr.msra.gmra.mxu0 %vm414_vm0, %v8794_v22 }
 0x157   :  { %v8122_v24 = vpop.f32.mrf.mxu0 }
 0x158   :  { %v8803_v25 = vadd.f32 %v8122_v24, %v6937_v23 }
 0x159   :  { %v487_v26 = vpop.f32.mrf.mxu0 }
 0x15a   :  { %v8805_v27 = vadd.f32 %v6937_v23, %v487_v26  ;;  %508 = vrot.lane.b32.xlu1 %v8803_v25, %s8652_s3 }
 0x15c   :  { %506 = vrot.lane.b32.xlu0 %v8805_v27, %s8652_s3  ;;  %8127 = vmatprep.mubr.msk.f32.mxu1 %vm510_vm1, %v8805_v27 }
 0x1cc   :  { %v509_v28 = vpop.permute.xlu1 %508 }
 0x1cd   :  { %8123 = vmatprep.subr.msk.mxu1 %vm510_vm1, %v509_v28 }
 0x1ce   :  { %8124 = vmatpush3.xpose.msk.msra.mxu1 %vm510_vm1, %v509_v28  ;;  %v507_v29 = vpop.permute.xlu0 %506  ;;  %v8887_v28 = vld [vmem:[%s10399_s9] ss:$0 sm:$0xff] }
 0x1cf   :  { %8125 = vmatprep.subr.msk.mxu1 %vm510_vm1, %v507_v29 }
 0x1d2   :  { %8126 = vmatpush3.xpose.msk.msra.mxu1 %vm510_vm1, %v507_v29  ;;  %v503_v29 = vadd.f32 %v8887_v28, %v8794_v22 }
 0x1d3   :  { %8137 = vmatprep.subr.mxu1 %v110_v3 }
 0x1d5   :  { %8128 = vmatmul.mubr.msk.f32.vlgmr.msra.gmra.mxu1 %vm510_vm1, %v8803_v25 }
 0x1d6   :  { %8138 = vmatpush3.msra.mxu1 %v110_v3 }
 0x295   :  { %v8129_v30 = vpop.f32.mrf.mxu1 }
 0x296   :  { %v595_v32 = vmul.f32 0.35355338, %v8129_v30 }
 0x297   :  { %v585_v33 = vpop.f32.mrf.mxu1 }
 0x298   :  { %v594_v35 = vmul.f32 0.35355338, %v585_v33  ;;  %v597_v36 = vadd.f32 %v595_v32, %v8822_v31 }
 0x29a   :  { %v602_v37 = vsel %vm598_vm2, %v597_v36, -inf  ;;  %v596_v38 = vadd.f32 %v594_v35, %v8827_v34 }
 0x29b   :  { %603 = vmax.xlane.f32.xlu0 %v602_v37 }
 0x29c   :  { %v599_v39 = vsel %vm598_vm2, %v596_v38, -inf }
 0x29d   :  { %600 = vmax.xlane.f32.xlu1 %v599_v39 }
 0x324   :  { %v604_v40 = vpop.xlane.xlu0 %603 }
 0x325   :  { %v606_v41 = vsub.f32 %v597_v36, %v604_v40 }
 0x326   :  { %v601_v42 = vpop.xlane.xlu1 %600 }
 0x327   :  { %v609_v43 = vmul.f32 1.442695, %v606_v41  ;;  %v605_v44 = vsub.f32 %v596_v38, %v601_v42 }
 0x329   :  { %8565 = vpow2.f32 %v609_v43  ;;  %v607_v45 = vmul.f32 1.442695, %v605_v44 }
 0x32b   :  { %8567 = vpow2.f32 %v607_v45 }
 0x336   :  { %v8566_v46 = vpop.eup %8565 }
 0x337   :  { %v614_v47 = vsel %vm598_vm2, %v8566_v46, 0.0 }
 0x338   :  { %v8568_v48 = vpop.eup %8567  ;;  %615 = vadd.xlane.f32.xlu1 %v614_v47 }
 0x339   :  { %v611_v49 = vsel %vm598_vm2, %v8568_v48, 0.0 }
 0x33a   :  { %612 = vadd.xlane.f32.xlu0 %v611_v49 }
 0x349   :  { %621 = vrot.lane.b32.xlu1 %v8805_v27, %s8653_s26 }
 0x34d   :  { %797 = vrot.lane.b32.xlu1 %v8803_v25, %s8654_s27 }
 0x350   :  { %623 = vrot.lane.b32.xlu0 %v8803_v25, %s8653_s26 }
 0x351   :  { %791 = vrot.lane.b32.xlu1 %v8805_v27, %s8655_s28 }
 0x354   :  { %795 = vrot.lane.b32.xlu0 %v8805_v27, %s8654_s27 }
 0x355   :  { %1084 = vrot.lane.b32.xlu1 %v8803_v25, %s8656_s29 }
 0x358   :  { %793 = vrot.lane.b32.xlu0 %v8803_v25, %s8655_s28 }
 0x359   :  { %1078 = vrot.lane.b32.xlu1 %v8805_v27, %s8657_s30 }
 0x35c   :  { %1082 = vrot.lane.b32.xlu0 %v8805_v27, %s8656_s29 }
 0x360   :  { %1080 = vrot.lane.b32.xlu0 %v8803_v25, %s8657_s30 }
 0x3c1   :  { %v616_v50 = vpop.xlane.xlu1 %615 }
 0x3c2   :  { %8569 = vrcp.f32 %v616_v50 }
 0x3c3   :  { %v613_v51 = vpop.xlane.xlu0 %612 }
 0x3c4   :  { %8571 = vrcp.f32 %v613_v51 }
 0x3c5   :  { %v622_v52 = vpop.permute.xlu1 %621 }
 0x3c7   :  { %v624_v53 = vpop.permute.xlu0 %623 }
 0x3c8   :  { %8130 = vmatprep.subr.mxu0 %v624_v53 }
 0x3c9   :  { %8131 = vmatpush3.msra.mxu0 %v624_v53  ;;  %v798_v54 = vpop.permute.xlu1 %797 }
 0x3ca   :  { %8132 = vmatprep.subr.mxu0 %v622_v52 }
 0x3cb   :  { %8133 = vmatpush3.msra.mxu0 %v622_v52  ;;  %v796_v58 = vpop.permute.xlu0 %795 }
 0x3cc   :  { %8142 = vmatprep.subr.msk.mxu0 %vm510_vm1, %v798_v54 }
 0x3cd   :  { %v792_v57 = vpop.permute.xlu1 %791 }
 0x3cf   :  { %v8570_v55 = vpop.eup %8569  ;;  %v794_v62 = vpop.permute.xlu0 %793 }
 0x3d0   :  { %v620_v60 = vmul.f32 %v8570_v55, %v8566_v46 }
 0x3d1   :  { %v8572_v56 = vpop.eup %8571  ;;  %v1085_v61 = vpop.permute.xlu1 %1084 }
 0x3d2   :  { %v619_v59 = vmul.f32 %v8572_v56, %v8568_v48 }
 0x3d3   :  { %v1083_v1 = vpop.permute.xlu0 %1082 }
 0x3d4   :  { %8134 = vmatprep.mubr.msk.f32.mxu0 %vm598_vm2, %v619_v59 }
 0x3d5   :  { %8135 = vmatmul.mubr.msk.f32.vlgmr.msra.gmra.mxu0 %vm598_vm2, %v620_v60  ;;  %v1079_v63 = vpop.permute.xlu1 %1078 }
 0x3d6   :  { %8143 = vmatpush3.xpose.msk.msra.mxu0 %vm510_vm1, %v798_v54  ;;  %8146 = vmatprep.mubr.msk.f32.mxu0 %vm510_vm1, %v792_v57 }
 0x3d7   :  { %8144 = vmatprep.subr.msk.mxu0 %vm510_vm1, %v796_v58  ;;  %v1081_v2 = vpop.permute.xlu0 %1080 }
 0x3da   :  { %8145 = vmatpush3.xpose.msk.msra.mxu0 %vm510_vm1, %v796_v58 }
 0x3db   :  { %8161 = vmatprep.subr.msk.mxu0 %vm510_vm1, %v1085_v61 }
 0x3dd   :  { %8147 = vmatmul.mubr.msk.f32.vlgmr.msra.gmra.mxu0 %vm510_vm1, %v794_v62 }
 0x3de   :  { %8162 = vmatpush3.xpose.msk.msra.mxu0 %vm510_vm1, %v1085_v61  ;;  %8165 = vmatprep.mubr.msk.f32.mxu0 %vm510_vm1, %v1079_v63  ;;  %v111_v63 = vld [vmem:[%s10398_s8 + $0x8] sm:$0xff] }
 0x3df   :  { %8163 = vmatprep.subr.msk.mxu0 %vm510_vm1, %v1083_v1 }
 0x3e2   :  { %8164 = vmatpush3.xpose.msk.msra.mxu0 %vm510_vm1, %v1083_v1 }
 0x3e5   :  { %8166 = vmatmul.mubr.msk.f32.vlgmr.msra.gmra.mxu0 %vm510_vm1, %v1081_v2 }
 0x495   :  { %v8136_v4 = vpop.f32.mrf.mxu0 }
 0x497   :  { %v699_v5 = vpop.f32.mrf.mxu0 }
 0x498   :  { %8139 = vmatprep.mubr.msk.f32.mxu1 %vm510_vm1, %v699_v5 }
 0x499   :  { %8140 = vmatmul.mubr.msk.f32.vlgmr.msra.gmra.mxu1 %vm510_vm1, %v8136_v4 }
 0x49d   :  { %v8148_v6 = vpop.f32.mrf.mxu0 }
 0x49e   :  { %v883_v7 = vmul.f32 0.35355338, %v8148_v6 }
 0x49f   :  { %v873_v8 = vpop.f32.mrf.mxu0 }
 0x4a0   :  { %v882_v9 = vmul.f32 0.35355338, %v873_v8  ;;  %v885_v10 = vadd.f32 %v883_v7, %v8822_v31 }
 0x4a2   :  { %v889_v11 = vsel %vm598_vm2, %v885_v10, -inf  ;;  %v884_v12 = vadd.f32 %v882_v9, %v8827_v34 }
 0x4a3   :  { %890 = vmax.xlane.f32.xlu0 %v889_v11 }
 0x4a4   :  { %v886_v13 = vsel %vm598_vm2, %v884_v12, -inf }
 0x4a5   :  { %887 = vmax.xlane.f32.xlu1 %v886_v13  ;;  %v8167_v33 = vpop.f32.mrf.mxu0 }
 0x4a6   :  { %v1170_v37 = vmul.f32 0.35355338, %v8167_v33 }
 0x4a7   :  { %v1160_v35 = vpop.f32.mrf.mxu0 }
 0x4a8   :  { %v1169_v36 = vmul.f32 0.35355338, %v1160_v35  ;;  %v1172_v22 = vadd.f32 %v1170_v37, %v8822_v31  ;;  %v502_v37 = vadd.f32 %v8887_v28, %v8792_v21 }
 0x4aa   :  { %v1171_v38 = vadd.f32 %v1169_v36, %v8827_v34  ;;  %v1176_v40 = vsel %vm598_vm2, %v1172_v22, -inf }
 0x4ac   :  { %v1173_v39 = vsel %vm598_vm2, %v1171_v38, -inf }
 0x52c   :  { %v891_v14 = vpop.xlane.xlu0 %890 }
 0x52d   :  { %v893_v15 = vsub.f32 %v885_v10, %v891_v14 }
 0x52e   :  { %v888_v16 = vpop.xlane.xlu1 %887 }
 0x52f   :  { %v896_v17 = vmul.f32 1.442695, %v893_v15  ;;  %v892_v18 = vsub.f32 %v884_v12, %v888_v16 }
 0x531   :  { %8573 = vpow2.f32 %v896_v17  ;;  %v894_v19 = vmul.f32 1.442695, %v892_v18  ;;  %v112_v18 = vld [vmem:[%s10398_s8 + $0x10] sm:$0xff] }
 0x533   :  { %8575 = vpow2.f32 %v894_v19 }
 0x53e   :  { %v8574_v20 = vpop.eup %8573 }
 0x53f   :  { %v901_v23 = vsel %vm598_vm2, %v8574_v20, 0.0 }
 0x540   :  { %v8576_v24 = vpop.eup %8575  ;;  %902 = vadd.xlane.f32.xlu1 %v901_v23 }
 0x541   :  { %v898_v26 = vsel %vm598_vm2, %v8576_v24, 0.0 }
 0x542   :  { %899 = vadd.xlane.f32.xlu0 %v898_v26 }
 0x551   :  { %908 = vrot.lane.b32.xlu1 %v8805_v27, %s10420_s2 }
 0x555   :  { %1371 = vrot.lane.b32.xlu1 %v8803_v25, %s10418_s20 }
 0x558   :  { %910 = vrot.lane.b32.xlu0 %v8803_v25, %s10420_s2 }
 0x559   :  { %1365 = vrot.lane.b32.xlu1 %v8805_v27, %s10416_s22  ;;  %v8141_v30 = vpop.f32.mrf.mxu1 }
 0x55a   :  { %v8895_v32 = vadd.f32 %v8141_v30, %v503_v29 }
 0x55b   :  { %v780_v2 = vpop.f32.mrf.mxu1 }
 0x55c   :  { %1369 = vrot.lane.b32.xlu0 %v8805_v27, %s10418_s20 }
 0x560   :  { %1367 = vrot.lane.b32.xlu0 %v8803_v25, %s10416_s22 }
 0x57d   :  { %1174 = vmax.xlane.f32.xlu1 %v1173_v39 }
 0x57f   :  { %1177 = vmax.xlane.f32.xlu0 %v1176_v40 }
 0x5c9   :  { %v903_v41 = vpop.xlane.xlu1 %902 }
 0x5ca   :  { %8577 = vrcp.f32 %v903_v41 }
 0x5cb   :  { %v900_v42 = vpop.xlane.xlu0 %899 }
 0x5cc   :  { %8579 = vrcp.f32 %v900_v42 }
 0x5cd   :  { %v909_v43 = vpop.permute.xlu1 %908 }
 0x5cf   :  { %v911_v44 = vpop.permute.xlu0 %910 }
 0x5d0   :  { %8149 = vmatprep.subr.mxu1 %v911_v44 }
 0x5d1   :  { %8150 = vmatpush3.msra.mxu1 %v911_v44  ;;  %v1372_v45 = vpop.permute.xlu1 %1371 }
 0x5d2   :  { %8151 = vmatprep.subr.mxu1 %v909_v43  ;;  %8180 = vmatprep.subr.msk.mxu0 %vm510_vm1, %v1372_v45 }
 0x5d3   :  { %v1370_v46 = vpop.permute.xlu0 %1369  ;;  %8152 = vmatpush3.msra.mxu1 %v909_v43  ;;  %8181 = vmatpush3.xpose.msk.msra.mxu0 %vm510_vm1, %v1372_v45 }
 0x5d4   :  { %8182 = vmatprep.subr.msk.mxu0 %vm510_vm1, %v1370_v46  ;;  %8156 = vmatprep.subr.mxu1 %v111_v63 }
 0x5d5   :  { %v1366_v47 = vpop.permute.xlu1 %1365 }
 0x5d6   :  { %8184 = vmatprep.mubr.msk.f32.mxu0 %vm510_vm1, %v1366_v47  ;;  %v113_v47 = vld [vmem:[%s10398_s8 + $0x18] sm:$0xff] }
 0x5d7   :  { %8183 = vmatpush3.xpose.msk.msra.mxu0 %vm510_vm1, %v1370_v46  ;;  %v8578_v48 = vpop.eup %8577  ;;  %v1368_v50 = vpop.permute.xlu0 %1367 }
 0x5d8   :  { %v907_v52 = vmul.f32 %v8578_v48, %v8574_v20 }
 0x5d9   :  { %v8580_v49 = vpop.eup %8579 }
 0x5da   :  { %8185 = vmatmul.mubr.msk.f32.vlgmr.msra.gmra.mxu0 %vm510_vm1, %v1368_v50  ;;  %v906_v51 = vmul.f32 %v8580_v49, %v8576_v24 }
 0x5db   :  { %1973 = vmatprep.mubr.bf16.mxu0 %v8651_v0 }
 0x5dc   :  { %8153 = vmatprep.mubr.msk.f32.mxu1 %vm598_vm2, %v906_v51 }
 0x5dd   :  { %8154 = vmatmul.mubr.msk.f32.vlgmr.msra.gmra.mxu1 %vm598_vm2, %v907_v52 }
 0x5de   :  { %8157 = vmatpush3.msra.mxu1 %v111_v63 }
 0x606   :  { %v1175_v53 = vpop.xlane.xlu1 %1174 }
 0x607   :  { %v1179_v54 = vsub.f32 %v1171_v38, %v1175_v53 }
 0x608   :  { %v1178_v55 = vpop.xlane.xlu0 %1177 }
 0x609   :  { %v1181_v56 = vmul.f32 1.442695, %v1179_v54  ;;  %v1180_v57 = vsub.f32 %v1172_v22, %v1178_v55  ;;  %v789_v22 = vadd.f32 %v780_v2, %v502_v37 }
 0x60b   :  { %8581 = vpow2.f32 %v1181_v56  ;;  %v1183_v58 = vmul.f32 1.442695, %v1180_v57 }
 0x60d   :  { %8583 = vpow2.f32 %v1183_v58 }
 0x618   :  { %v8582_v59 = vpop.eup %8581 }
 0x619   :  { %v1185_v60 = vsel %vm598_vm2, %v8582_v59, 0.0 }
 0x61a   :  { %v8584_v61 = vpop.eup %8583  ;;  %1186 = vadd.xlane.f32.xlu0 %v1185_v60 }
 0x61b   :  { %v1188_v62 = vsel %vm598_vm2, %v8584_v61, 0.0 }
 0x61c   :  { %1189 = vadd.xlane.f32.xlu1 %v1188_v62 }
 0x62d   :  { %1195 = vrot.lane.b32.xlu1 %v8805_v27, %s10414_s25 }
 0x630   :  { %1197 = vrot.lane.b32.xlu0 %v8803_v25, %s10414_s25 }
 0x69a   :  { %v8186_v1 = vpop.f32.mrf.mxu0 }
 0x69b   :  { %v1457_v3 = vmul.f32 0.35355338, %v8186_v1 }
 0x69c   :  { %v1447_v4 = vpop.f32.mrf.mxu0 }
 0x69d   :  { %v1456_v5 = vmul.f32 0.35355338, %v1447_v4  ;;  %v8155_v6 = vpop.f32.mrf.mxu1  ;;  %v1459_v7 = vadd.f32 %v1457_v3, %v8822_v31 }
 0x69f   :  { %v986_v8 = vpop.f32.mrf.mxu1  ;;  %v1463_v9 = vsel %vm598_vm2, %v1459_v7, -inf  ;;  %v1458_v10 = vadd.f32 %v1456_v5, %v8827_v34 }
 0x6a0   :  { %8158 = vmatprep.mubr.msk.f32.mxu1 %vm510_vm1, %v986_v8  ;;  %1464 = vmax.xlane.f32.xlu0 %v1463_v9  ;;  %v141_v8 = vld [vmem:[%s10400_s12 + $0xc0] sm:$0xff]  ;;  %v134_v9 = vld [vmem:[%s10400_s12 + $0x88] sm:$0xff] }
 0x6a1   :  { %8159 = vmatmul.mubr.msk.f32.vlgmr.msra.gmra.mxu1 %vm510_vm1, %v8155_v6  ;;  %v1460_v11 = vsel %vm598_vm2, %v1458_v10, -inf }
 0x6a2   :  { %1461 = vmax.xlane.f32.xlu1 %v1460_v11  ;;  %v142_v11 = vld [vmem:[%s10400_s12 + $0xc8] sm:$0xff] }
 0x6a3   :  { %v1187_v12 = vpop.xlane.xlu0 %1186 }
 0x6a4   :  { %8585 = vrcp.f32 %v1187_v12 }
 0x6a5   :  { %v1190_v13 = vpop.xlane.xlu1 %1189 }
 0x6a6   :  { %8587 = vrcp.f32 %v1190_v13  ;;  %v6993_v13 = vcombine.low %v134_v9, %v142_v11 }
 0x6a7   :  { %v1198_v14 = vpop.permute.xlu0 %1197 }
 0x6a8   :  { %8168 = vmatprep.subr.mxu1 %v1198_v14 }
 0x6a9   :  { %8169 = vmatpush3.msra.mxu1 %v1198_v14  ;;  %v1196_v31 = vpop.permute.xlu1 %1195  ;;  %v6994_v14 = vcombine.high %v134_v9, %v142_v11 }
 0x6aa   :  { %8170 = vmatprep.subr.mxu1 %v1196_v31 }
 0x6ab   :  { %8171 = vmatpush3.msra.mxu1 %v1196_v31  ;;  %v117_v31 = vld [vmem:[%s10400_s12] sm:$0xff] }
 0x6ac   :  { %8175 = vmatprep.subr.mxu1 %v112_v18 }
 0x6b1   :  { %v8586_v15 = vpop.eup %8585 }
 0x6b2   :  { %v1193_v34 = vmul.f32 %v8586_v15, %v8582_v59  ;;  %v125_v15 = vld [vmem:[%s10400_s12 + $0x40] sm:$0xff] }
 0x6b3   :  { %v8588_v16 = vpop.eup %8587 }
 0x6b4   :  { %8172 = vmatprep.mubr.msk.f32.mxu1 %vm598_vm2, %v1193_v34  ;;  %v1194_v17 = vmul.f32 %v8588_v16, %v8584_v61  ;;  %v118_v34 = vld [vmem:[%s10400_s12 + $0x8] sm:$0xff]  ;;  %v6976_v16 = vcombine.high %v117_v31, %v125_v15 }
 0x6b6   :  { %8173 = vmatmul.mubr.msk.f32.vlgmr.msra.gmra.mxu1 %vm598_vm2, %v1194_v17  ;;  %v126_v17 = vld [vmem:[%s10400_s12 + $0x48] sm:$0xff] }
 0x6b7   :  { %8176 = vmatpush3.msra.mxu1 %v112_v18  ;;  %v6975_v18 = vcombine.low %v117_v31, %v125_v15  ;;  %v124_v31 = vld [vmem:[%s10400_s12 + $0x38] sm:$0xff] }
 0x6b8   :  { %v132_v15 = vld [vmem:[%s10400_s12 + $0x78] sm:$0xff] }
 0x729   :  { %v1465_v19 = vpop.xlane.xlu0 %1464 }
 0x72a   :  { %v1467_v20 = vsub.f32 %v1459_v7, %v1465_v19  ;;  %v133_v7 = vld [vmem:[%s10400_s12 + $0x80] sm:$0xff]  ;;  %v6977_v19 = vcombine.low %v118_v34, %v126_v17 }
 0x72b   :  { %v1462_v23 = vpop.xlane.xlu1 %1461  ;;  %v6991_v12 = vcombine.low %v133_v7, %v141_v8 }
 0x72c   :  { %v1470_v24 = vmul.f32 1.442695, %v1467_v20  ;;  %v1466_v26 = vsub.f32 %v1458_v10, %v1462_v23  ;;  %v6992_v10 = vcombine.high %v133_v7, %v141_v8  ;;  %v6978_v20 = vcombine.high %v118_v34, %v126_v17  ;;  %v135_v23 = vld [vmem:[%s10400_s12 + $0x90] sm:$0xff]  ;;  %v140_v7 = vld [vmem:[%s10400_s12 + $0xb8] sm:$0xff] }
 0x72d   :  { %v148_v8 = vld [vmem:[%s10400_s12 + $0xf8] sm:$0xff] }
 0x72e   :  { %8589 = vpow2.f32 %v1470_v24  ;;  %v1468_v29 = vmul.f32 1.442695, %v1466_v26  ;;  %1953 = vmatprep.subr.bf16.mxu0 %v6992_v10  ;;  %v143_v24 = vld [vmem:[%s10400_s12 + $0xd0] sm:$0xff]  ;;  %v136_v26 = vld [vmem:[%s10400_s12 + $0x98] sm:$0xff] }
 0x72f   :  { %1954 = vmatpush1.bf16.msra.mxu0 %v6991_v12 }
 0x730   :  { %8591 = vpow2.f32 %v1468_v29  ;;  %1955 = vmatprep.subr.bf16.mxu0 %v6976_v16  ;;  %v6996_v29 = vcombine.high %v135_v23, %v143_v24  ;;  %v7006_v16 = vcombine.high %v140_v7, %v148_v8 }
 0x733   :  { %1956 = vmatpush1.bf16.msra.mxu0 %v6975_v18  ;;  %v7005_v18 = vcombine.low %v140_v7, %v148_v8 }
 0x734   :  { %2039 = vmatprep.subr.bf16.mxu0 %v6996_v29  ;;  %v6989_v29 = vcombine.low %v124_v31, %v132_v15 }
 0x73b   :  { %v8590_v30 = vpop.eup %8589 }
 0x73c   :  { %v1475_v33 = vsel %vm598_vm2, %v8590_v30, 0.0 }
 0x73d   :  { %v8592_v35 = vpop.eup %8591  ;;  %1476 = vadd.xlane.f32.xlu1 %v1475_v33  ;;  %v6995_v33 = vcombine.low %v135_v23, %v143_v24  ;;  %v8309_v23 = vld [vmem:[%s10401_s14 + $0x78] sm:$0xff]  }
 0x73e   :  { %v1472_v36 = vsel %vm598_vm2, %v8592_v35, 0.0  ;;  %v8310_v24 = vld [vmem:[%s10401_s14 + $0xf8] sm:$0xff]  }
 0x73f   :  { %1473 = vadd.xlane.f32.xlu0 %v1472_v36 }
 0x74e   :  { %1482 = vrot.lane.b32.xlu1 %v8805_v27, %s10412_s1 }
 0x755   :  { %1484 = vrot.lane.b32.xlu0 %v8803_v25, %s10412_s1 }
 0x761   :  { %v8160_v38 = vpop.f32.mrf.mxu1 }
 0x762   :  { %v1077_v39 = vadd.f32 %v8160_v38, %v8895_v32 }
 0x763   :  { %v1067_v40 = vpop.f32.mrf.mxu1 }
 0x764   :  { %v1076_v41 = vadd.f32 %v1067_v40, %v789_v22 }
 0x776   :  { %v8174_v42 = vpop.f32.mrf.mxu1 }
 0x778   :  { %v1273_v43 = vpop.f32.mrf.mxu1 }
 0x779   :  { %8177 = vmatprep.mubr.msk.f32.mxu1 %vm510_vm1, %v1273_v43 }
 0x77a   :  { %8178 = vmatmul.mubr.msk.f32.vlgmr.msra.gmra.mxu1 %vm510_vm1, %v8174_v42  ;;  %v6973_v42 = vld [vmem:[%s10402_s10] ss:$0 sm:$0xff] }
 0x7c6   :  { %v1477_v44 = vpop.xlane.xlu1 %1476 }
 0x7c7   :  { %8593 = vrcp.f32 %v1477_v44 }
 0x7c8   :  { %v1474_v27 = vpop.xlane.xlu0 %1473 }
 0x7c9   :  { %8595 = vrcp.f32 %v1474_v27 }
 0x7ca   :  { %v1483_v45 = vpop.permute.xlu1 %1482 }
 0x7cc   :  { %v1485_v25 = vpop.permute.xlu0 %1484 }
 0x7cd   :  { %8187 = vmatprep.subr.mxu1 %v1485_v25 }
 0x7ce   :  { %8188 = vmatpush3.msra.mxu1 %v1485_v25  ;;  %v6974_v25 = vld [vmem:[%s10403_s11] ss:$0 sm:$0xff] }
 0x7cf   :  { %8189 = vmatprep.subr.mxu1 %v1483_v45 }
 0x7d0   :  { %8190 = vmatpush3.msra.mxu1 %v1483_v45 }
 0x7d1   :  { %8194 = vmatprep.subr.mxu1 %v113_v47 }
 0x7d4   :  { %v8594_v21 = vpop.eup %8593 }
 0x7d5   :  { %v1481_v46 = vmul.f32 %v8594_v21, %v8590_v30  ;;  %v144_v30 = vld [vmem:[%s10400_s12 + $0xd8] sm:$0xff] }
 0x7d6   :  { %v8596_v28 = vpop.eup %8595  ;;  %v6998_v36 = vcombine.high %v136_v26, %v144_v30 }
 0x7d7   :  { %v1480_v32 = vmul.f32 %v8596_v28, %v8592_v35  ;;  %v6997_v35 = vcombine.low %v136_v26, %v144_v30  ;;  %v119_v28 = vld [vmem:[%s10400_s12 + $0x10] sm:$0xff]  ;;  %v8311_v30 = vld [vmem:[%s10401_s14 + $0x38] sm:$0xff]  }
 0x7d9   :  { %8191 = vmatprep.mubr.msk.f32.mxu1 %vm598_vm2, %v1480_v32  ;;  %v127_v32 = vld [vmem:[%s10400_s12 + $0x50] sm:$0xff] }
 0x7da   :  { %8192 = vmatmul.mubr.msk.f32.vlgmr.msra.gmra.mxu1 %vm598_vm2, %v1481_v46  ;;  %v120_v46 = vld [vmem:[%s10400_s12 + $0x18] sm:$0xff] }
 0x7db   :  { %8195 = vmatpush3.msra.mxu1 %v113_v47  ;;  %v128_v47 = vld [vmem:[%s10400_s12 + $0x58] sm:$0xff] }
 0x7dc   :  { %1996 = vmatprep.subr.bf16.mxu1 %v6994_v14  ;;  %v131_v14 = vld [vmem:[%s10400_s12 + $0x70] sm:$0xff] }
 0x83a   :  { %v8179_v48 = vpop.f32.mrf.mxu1 }
 0x83b   :  { %v1364_v49 = vadd.f32 %v8179_v48, %v1077_v39 }
 0x83c   :  { %v1354_v50 = vpop.f32.mrf.mxu1 }
 0x83d   :  { %v1363_v54 = vadd.f32 %v1354_v50, %v1076_v41 }
 0x89a   :  { %v8193_v51 = vpop.f32.mrf.mxu1 }
 0x89c   :  { %v1560_v52 = vpop.f32.mrf.mxu1 }
 0x89d   :  { %8196 = vmatprep.mubr.msk.f32.mxu1 %vm510_vm1, %v1560_v52  ;;  %v145_v52 = vld [vmem:[%s10400_s12 + $0xe0] sm:$0xff] }
 0x89e   :  { %8197 = vmatmul.mubr.msk.f32.vlgmr.msra.gmra.mxu1 %vm510_vm1, %v8193_v51  ;;  %v137_v51 = vld [vmem:[%s10400_s12 + $0xa0] sm:$0xff] }
 0x89f   :  { %2016 = vmatprep.mubr.bf16.mxu1 %v8651_v0  ;;  %1997 = vmatpush1.bf16.msra.mxu1 %v6993_v13  ;;  %v123_v13 = vld [vmem:[%s10400_s12 + $0x30] sm:$0xff] }
 0x8a0   :  { %1998 = vmatprep.subr.bf16.mxu1 %v6978_v20  ;;  %v6990_v20 = vcombine.high %v124_v31, %v132_v15  ;;  %v6987_v26 = vcombine.low %v123_v13, %v131_v14 }
 0x8a3   :  { %1999 = vmatpush1.bf16.msra.mxu1 %v6977_v19  ;;  %v6988_v19 = vcombine.high %v123_v13, %v131_v14 }
 0x8a4   :  { %2082 = vmatprep.subr.bf16.mxu1 %v6998_v36  ;;  %v8314_v36 = vld [vmem:[%s10401_s14 + $0xf0] sm:$0xff]  }
 0x95e   :  { %v8198_v53 = vpop.f32.mrf.mxu1 }
 0x95f   :  { %v1651_v55 = vadd.f32 %v8198_v53, %v1364_v49  ;;  %v138_v53 = vld [vmem:[%s10400_s12 + $0xa8] sm:$0xff] }
 0x960   :  { %v1641_v56 = vpop.f32.mrf.mxu1 }
 0x961   :  { %v1650_v57 = vadd.f32 %v1641_v56, %v1363_v54  ;;  %v1655_v58 = vsel %vm414_vm0, %v1651_v55, 0.0  ;;  %v146_v54 = vld [vmem:[%s10400_s12 + $0xe8] sm:$0xff]  ;;  %v6980_v56 = vcombine.high %v119_v28, %v127_v32 }
 0x962   :  { %1656 = vadd.xlane.f32.xlu0 %v1655_v58  ;;  %v6979_v58 = vcombine.low %v119_v28, %v127_v32  ;;  %v8328_v28 = vld [vmem:[%s10401_s14 + $0x98] sm:$0xff]   ;;  %v8329_v32 = vld [vmem:[%s10401_s14 + $0x50] sm:$0xff]  }
 0x963   :  { %v1652_v59 = vsel %vm414_vm0, %v1650_v57, 0.0 }
 0x964   :  { %1653 = vadd.xlane.f32.xlu1 %v1652_v59  ;;  %v6981_v59 = vcombine.low %v120_v46, %v128_v47 }
 0x9eb   :  { %v1657_v60 = vpop.xlane.xlu0 %1656 }
 0x9ec   :  { %v1660_v61 = vmul.f32 0.03125, %v1657_v60  ;;  %v121_v60 = vld [vmem:[%s10400_s12 + $0x20] sm:$0xff] }
 0x9ed   :  { %v1654_v62 = vpop.xlane.xlu1 %1653 }
 0x9ee   :  { %v1662_v63 = vsub.f32 %v1651_v55, %v1660_v61  ;;  %v1659_v1 = vmul.f32 0.03125, %v1654_v62  ;;  %v129_v61 = vld [vmem:[%s10400_s12 + $0x60] sm:$0xff]  ;;  %v122_v62 = vld [vmem:[%s10400_s12 + $0x28] sm:$0xff] }
 0x9ef   :  { %v6984_v9 = vcombine.high %v121_v60, %v129_v61  ;;  %v6983_v11 = vcombine.low %v121_v60, %v129_v61  ;;  %v8342_v60 = vld [vmem:[%s10401_s14 + $0x1f8] sm:$0xff]   ;;  %v1698_v61 = vlaneseq }
 0x9f0   :  { %v1661_v2 = vsub.f32 %v1650_v57, %v1659_v1  ;;  %v1664_v3 = vmul.f32 %v1662_v63, %v1662_v63  ;;  %v6982_v57 = vcombine.high %v120_v46, %v128_v47  ;;  %v7000_v1 = vcombine.high %v137_v51, %v145_v52  ;;  %v8330_v46 = vld [vmem:[%s10401_s14 + $0xd0] sm:$0xff]  }
 0x9f1   :  { %v8331_v47 = vld [vmem:[%s10401_s14 + $0x10] sm:$0xff]  }
 0x9f2   :  { %v1668_v4 = vsel %vm414_vm0, %v1664_v3, 0.0  ;;  %v1663_v5 = vmul.f32 %v1661_v2, %v1661_v2  ;;  %v6999_v3 = vcombine.low %v137_v51, %v145_v52  ;;  %v8333_v51 = vld [vmem:[%s10401_s14 + $0x48] sm:$0xff]  }
 0x9f3   :  { %1669 = vadd.xlane.f32.xlu1 %v1668_v4  ;;  %v7001_v4 = vcombine.low %v138_v53, %v146_v54  ;;  %v8334_v52 = vld [vmem:[%s10401_s14 + $0xc8] sm:$0xff]  }
 0x9f4   :  { %v1665_v6 = vsel %vm414_vm0, %v1663_v5, 0.0  ;;  %v139_v5 = vld [vmem:[%s10400_s12 + $0xb0] sm:$0xff] }
 0x9f5   :  { %1666 = vadd.xlane.f32.xlu0 %v1665_v6  ;;  %v147_v6 = vld [vmem:[%s10400_s12 + $0xf0] sm:$0xff] }
 0x9f6   :  { %v7004_v34 = vcombine.high %v139_v5, %v147_v6  ;;  %v7003_v17 = vcombine.low %v139_v5, %v147_v6 }
 0xa7c   :  { %v1670_v37 = vpop.xlane.xlu1 %1669 }
 0xa7d   :  { %v1672_v38 = vmul.f32 0.03125, %v1670_v37  ;;  %v8315_v37 = vld [vmem:[%s10401_s14 + $0x30] sm:$0xff]  }
 0xa7e   :  { %v1667_v22 = vpop.xlane.xlu0 %1666 }
 0xa7f   :  { %v1674_v39 = vadd.f32 1e-05, %v1672_v38  ;;  %v1671_v40 = vmul.f32 0.03125, %v1667_v22  ;;  %v8316_v38 = vld [vmem:[%s10401_s14 + $0xb0] sm:$0xff]   ;;  %v8317_v22 = vld [vmem:[%s10401_s14 + $0x68] sm:$0xff]  }
 0xa81   :  { %8597 = vrsqrt.f32 %v1674_v39  ;;  %v1673_v41 = vadd.f32 1e-05, %v1671_v40  ;;  %v8318_v39 = vld [vmem:[%s10401_s14 + $0xe8] sm:$0xff]  }
 0xa82   :  { %v8319_v40 = vld [vmem:[%s10401_s14 + $0x28] sm:$0xff]  }
 0xa83   :  { %8599 = vrsqrt.f32 %v1673_v41  ;;  %v8320_v41 = vld [vmem:[%s10401_s14 + $0xa8] sm:$0xff]  }
 0xa8e   :  { %v8598_v43 = vpop.eup %8597 }
 0xa8f   :  { %v1678_v44 = vmul.f32 %v8598_v43, %v1662_v63  ;;  %v130_v63 = vld [vmem:[%s10400_s12 + $0x68] sm:$0xff]  ;;  %v8322_v43 = vld [vmem:[%s10401_s14 + $0xe0] sm:$0xff]  }
 0xa90   :  { %v8600_v27 = vpop.eup %8599  ;;  %v6986_v10 = vcombine.high %v122_v62, %v130_v63  ;;  %v6985_v12 = vcombine.low %v122_v62, %v130_v63  ;;  %v9191_v62 = vshrl.u32 %v1698_v61, 7  ;;  %v8349_v61 = vld [vmem:[%s10401_s14 + $0x168] sm:$0xff]  }
 0xa91   :  { %v1686_v45 = vmul.f32 %v6973_v42, %v1678_v44  ;;  %v1677_v21 = vmul.f32 %v8600_v27, %v1661_v2  ;;  %v7002_v2 = vcombine.high %v138_v53, %v146_v54  ;;  %v8323_v44 = vld [vmem:[%s10401_s14 + $0x20] sm:$0xff]   ;;  %v8335_v53 = vld [vmem:[%s10401_s14 + $0x8] sm:$0xff]  }
 0xa92   :  { %v8324_v27 = vld [vmem:[%s10401_s14 + $0xa0] sm:$0xff]   ;;  %v8336_v54 = vld [vmem:[%s10401_s14 + $0x88] sm:$0xff]   ;;  %v9194_v63 = vsub.s32 1, %v9191_v62  ;;  %v9219_v31 = vsub.s32 5, %v9191_v62  ;;  %v9222_v15 = vsub.s32 7, %v9191_v62 }
 0xa93   :  { %v1685_v48 = vmul.f32 %v6973_v42, %v1677_v21  ;;  %v9011_v49 = vadd.f32 %v6974_v25, %v1686_v45  ;;  %v8321_v42 = vld [vmem:[%s10401_s14 + $0x60] sm:$0xff]   ;;  %v8326_v45 = vld [vmem:[%s10401_s14 + $0xd8] sm:$0xff]  }
 0xa94   :  { %v8327_v21 = vld [vmem:[%s10401_s14 + $0x18] sm:$0xff]  }
 0xa95   :  { %v9013_v50 = vadd.f32 %v6974_v25, %v1685_v48  ;;  %v8325_v25 = vld [vmem:[%s10401_s14 + $0x58] sm:$0xff]   ;;  %v8332_v48 = vld [vmem:[%s10401_s14 + $0x90] sm:$0xff]  }
 0xa97   :  { %v9029_v55 = vpack.c.bf16 %v9011_v49, %v9013_v50 }
 0xa99   :  { %7007 = vmatmul.mubr.msk.bf16.vlgmr.msra.gmra.mxu0 %vm414_vm0, %v9029_v55  ;;  %7008 = vmatmul.mubr.msk.bf16.vlgmr.msra.gmra.mxu1 %vm414_vm0, %v9029_v55 }
 0xa9a   :  { %2040 = vmatpush1.bf16.msra.mxu0 %v6995_v33  ;;  %2083 = vmatpush1.bf16.msra.mxu1 %v6997_v35  ;;  %v8312_v33 = vld [vmem:[%s10401_s14 + $0xb8] sm:$0xff]   ;;  %v8313_v35 = vld [vmem:[%s10401_s14 + $0x70] sm:$0xff]  }
 0xa9b   :  { %2041 = vmatprep.subr.bf16.mxu0 %v6980_v56  ;;  %2084 = vmatprep.subr.bf16.mxu1 %v6982_v57  ;;  %v8338_v56 = vld [vmem:[%s10401_s14 + $0xc0] sm:$0xff]  }
 0xa9c   :  { %2059 = vmatprep.mubr.bf16.mxu0 %v8651_v0  ;;  %2102 = vmatprep.mubr.bf16.mxu1 %v8651_v0  ;;  %v8339_v57 = vld [vmem:[%s10401_s14] sm:$0xff]  }
 0xa9e   :  { %2042 = vmatpush1.bf16.msra.mxu0 %v6979_v58  ;;  %2085 = vmatpush1.bf16.msra.mxu1 %v6981_v59  ;;  %v8340_v58 = vld [vmem:[%s10401_s14 + $0x80] sm:$0xff]   ;;  %v8341_v59 = vld [vmem:[%s10401_s14 + $0x178] sm:$0xff]  }
 0xa9f   :  { %2125 = vmatprep.subr.bf16.mxu0 %v7000_v1  ;;  %2168 = vmatprep.subr.bf16.mxu1 %v7002_v2  ;;  %v9197_v1 = vsub.s32 3, %v9191_v62  ;;  %v9200_v2 = vsub.s32 0, %v9191_v62 }
 0xaa1   :  { %7009 = vmatmul.mubr.msk.bf16.vlgmr.msra.gmra.mxu0 %vm414_vm0, %v9029_v55  ;;  %7010 = vmatmul.mubr.msk.bf16.vlgmr.msra.gmra.mxu1 %vm414_vm0, %v9029_v55 }
 0xaa2   :  { %2126 = vmatpush1.bf16.msra.mxu0 %v6999_v3  ;;  %2169 = vmatpush1.bf16.msra.mxu1 %v7001_v4  ;;  %v9203_v3 = vsub.s32 2, %v9191_v62  ;;  %v9208_v4 = vld [vmem:[%s10404_s13] sm:$0xff] }
 0xaa3   :  { %2127 = vmatprep.subr.bf16.mxu0 %v6984_v9  ;;  %2170 = vmatprep.subr.bf16.mxu1 %v6986_v10  ;;  %v1705_v7 = vrot.slane %v9208_v4, %v9194_v63  ;;  %v1713_v8 = vrot.slane %v9208_v4, %v9197_v1  ;;  %v1701_v9 = vrot.slane %v9208_v4, %v9200_v2 }
 0xaa4   :  { %2145 = vmatprep.mubr.bf16.mxu0 %v8651_v0  ;;  %2188 = vmatprep.mubr.bf16.mxu1 %v8651_v0  ;;  %v1709_v10 = vrot.slane %v9208_v4, %v9203_v3 }
 0xaa6   :  { %2128 = vmatpush1.bf16.msra.mxu0 %v6983_v11  ;;  %2171 = vmatpush1.bf16.msra.mxu1 %v6985_v12 }
 0xaa7   :  { %2211 = vmatprep.subr.bf16.mxu0 %v7004_v34  ;;  %2254 = vmatprep.subr.bf16.mxu1 %v7006_v16 }
 0xaa9   :  { %7011 = vmatmul.mubr.msk.bf16.vlgmr.msra.gmra.mxu0 %vm414_vm0, %v9029_v55  ;;  %7012 = vmatmul.mubr.msk.bf16.vlgmr.msra.gmra.mxu1 %vm414_vm0, %v9029_v55 }
 0xaaa   :  { %2212 = vmatpush1.bf16.msra.mxu0 %v7003_v17  ;;  %2255 = vmatpush1.bf16.msra.mxu1 %v7005_v18 }
 0xaab   :  { %2213 = vmatprep.subr.bf16.mxu0 %v6988_v19  ;;  %2256 = vmatprep.subr.bf16.mxu1 %v6990_v20 }
 0xaac   :  { %2231 = vmatprep.mubr.bf16.mxu0 %v8651_v0  ;;  %2274 = vmatprep.mubr.bf16.mxu1 %v8651_v0 }
 0xaae   :  { %2214 = vmatpush1.bf16.msra.mxu0 %v6987_v26  ;;  %2257 = vmatpush1.bf16.msra.mxu1 %v6989_v29 }
 0xaaf   :  { %7707 = vmatprep.subr.bf16.mxu0 %v8309_v23  ;;  %7729 = vmatprep.subr.bf16.mxu1 %v8310_v24 }
 0xab1   :  { %7013 = vmatmul.mubr.msk.bf16.vlgmr.msra.gmra.mxu0 %vm414_vm0, %v9029_v55  ;;  %7014 = vmatmul.mubr.msk.bf16.vlgmr.msra.gmra.mxu1 %vm414_vm0, %v9029_v55  ;;  %v8337_v55 = vld [vmem:[%s10401_s14 + $0x40] sm:$0xff]  }
 0xab2   :  { %7708 = vmatpush3.bf16.msra.mxu0 %v8311_v30  ;;  %7730 = vmatpush3.bf16.msra.mxu1 %v8312_v33 }
 0xab3   :  { %7709 = vmatprep.subr.bf16.mxu0 %v8313_v35  ;;  %7731 = vmatprep.subr.bf16.mxu1 %v8314_v36 }
 0xab6   :  { %7710 = vmatpush3.bf16.msra.mxu0 %v8315_v37  ;;  %7732 = vmatpush3.bf16.msra.mxu1 %v8316_v38  ;;  %v1721_v37 = vrot.slane %v9208_v4, %v9219_v31  ;;  %v1729_v38 = vrot.slane %v9208_v4, %v9222_v15 }
 0xab7   :  { %7711 = vmatprep.subr.bf16.mxu0 %v8317_v22  ;;  %7733 = vmatprep.subr.bf16.mxu1 %v8318_v39 }
 0xaba   :  { %7712 = vmatpush3.bf16.msra.mxu0 %v8319_v40  ;;  %7734 = vmatpush3.bf16.msra.mxu1 %v8320_v41 }
 0xabb   :  { %7713 = vmatprep.subr.bf16.mxu0 %v8321_v42  ;;  %7735 = vmatprep.subr.bf16.mxu1 %v8322_v43 }
 0xabe   :  { %7714 = vmatpush3.bf16.msra.mxu0 %v8323_v44  ;;  %7736 = vmatpush3.bf16.msra.mxu1 %v8324_v27 }
 0xabf   :  { %7715 = vmatprep.subr.bf16.mxu0 %v8325_v25  ;;  %7737 = vmatprep.subr.bf16.mxu1 %v8326_v45 }
 0xac2   :  { %7716 = vmatpush3.bf16.msra.mxu0 %v8327_v21  ;;  %7738 = vmatpush3.bf16.msra.mxu1 %v8328_v28  ;;  %v8343_v21 = vld [vmem:[%s10401_s14 + $0x138] sm:$0xff]  }
 0xac3   :  { %7717 = vmatprep.subr.bf16.mxu0 %v8329_v32  ;;  %7739 = vmatprep.subr.bf16.mxu1 %v8330_v46  ;;  %v8344_v28 = vld [vmem:[%s10401_s14 + $0x1b8] sm:$0xff]  }
 0xac6   :  { %7718 = vmatpush3.bf16.msra.mxu0 %v8331_v47  ;;  %7740 = vmatpush3.bf16.msra.mxu1 %v8332_v48 }
 0xac7   :  { %7719 = vmatprep.subr.bf16.mxu0 %v8333_v51  ;;  %7741 = vmatprep.subr.bf16.mxu1 %v8334_v52  ;;  %v8345_v51 = vld [vmem:[%s10401_s14 + $0x170] sm:$0xff]  }
 0xac8   :  { %v8346_v52 = vld [vmem:[%s10401_s14 + $0x1f0] sm:$0xff]  }
 0xaca   :  { %7720 = vmatpush3.bf16.msra.mxu0 %v8335_v53  ;;  %7742 = vmatpush3.bf16.msra.mxu1 %v8336_v54 }
 0xacb   :  { %7721 = vmatprep.subr.bf16.mxu0 %v8337_v55  ;;  %7743 = vmatprep.subr.bf16.mxu1 %v8338_v56 }
 0xace   :  { %7722 = vmatpush3.bf16.msra.mxu0 %v8339_v57  ;;  %7744 = vmatpush3.bf16.msra.mxu1 %v8340_v58 }
 0xacf   :  { %7751 = vmatprep.subr.bf16.mxu0 %v8341_v59  ;;  %7773 = vmatprep.subr.bf16.mxu1 %v8342_v60  ;;  %v8347_v59 = vld [vmem:[%s10401_s14 + $0x130] sm:$0xff]  }
 0xad0   :  { %v8348_v60 = vld [vmem:[%s10401_s14 + $0x1b0] sm:$0xff]  }
 0xb59   :  { %v1975_v5 = vpop.f32.mrf.mxu0  ;;  %v2018_v6 = vpop.f32.mrf.mxu1 }
 0xb5a   :  { %v1976_v19 = vadd.f32 %v1975_v5, %v1701_v9  ;;  %v2019_v20 = vadd.f32 %v2018_v6, %v1709_v10 }
 0xb5b   :  { %v1977_v11 = vpop.f32.mrf.mxu0  ;;  %v2020_v12 = vpop.f32.mrf.mxu1 }
 0xb5c   :  { %v1978_v34 = vadd.f32 %v1977_v11, %v1705_v7  ;;  %v2021_v16 = vadd.f32 %v2020_v12, %v1713_v8  ;;  %v2285_v42 = vmax.f32 %v1976_v19, 0.0  ;;  %v2287_v43 = vmax.f32 %v2019_v20, 0.0  ;;  %v8351_v12 = vld [vmem:[%s10401_s14 + $0x128] sm:$0xff]   ;;  %v8356_v19 = vld [vmem:[%s10401_s14 + $0x1a0] sm:$0xff]   ;;  %v8357_v20 = vld [vmem:[%s10401_s14 + $0x158] sm:$0xff]  }
 0xb5d   :  { %v1979_v13 = vpop.f32.mrf.mxu0  ;;  %v2022_v14 = vpop.f32.mrf.mxu1 }
 0xb5e   :  { %v1980_v17 = vadd.f32 %v1979_v13, %v1701_v9  ;;  %v2023_v18 = vadd.f32 %v2022_v14, %v1709_v10  ;;  %v2286_v22 = vmax.f32 %v1978_v34, 0.0  ;;  %v2288_v39 = vmax.f32 %v2021_v16, 0.0  ;;  %v8350_v9 = vld [vmem:[%s10401_s14 + $0x1e8] sm:$0xff]   ;;  %v8353_v14 = vld [vmem:[%s10401_s14 + $0x160] sm:$0xff]  }
 0xb5f   :  { %v1981_v23 = vpop.f32.mrf.mxu0  ;;  %v2024_v24 = vpop.f32.mrf.mxu1  ;;  %v8352_v13 = vld [vmem:[%s10401_s14 + $0x1a8] sm:$0xff]   ;;  %v8354_v34 = vld [vmem:[%s10401_s14 + $0x1e0] sm:$0xff]  }
 0xb60   :  { %v1982_v26 = vadd.f32 %v1981_v23, %v1705_v7  ;;  %v2025_v29 = vadd.f32 %v2024_v24, %v1713_v8  ;;  %v2301_v30 = vmax.f32 %v1980_v17, 0.0  ;;  %v2303_v33 = vmax.f32 %v2023_v18, 0.0  ;;  %v8355_v17 = vld [vmem:[%s10401_s14 + $0x120] sm:$0xff]   ;;  %v8358_v23 = vld [vmem:[%s10401_s14 + $0x1d8] sm:$0xff]  }
 0xb61   :  { %v9224_v35 = vpop.f32.mrf.mxu0  ;;  %v9226_v36 = vpop.f32.mrf.mxu1 }
 0xb62   :  { %v2302_v40 = vmax.f32 %v1982_v26, 0.0  ;;  %v2304_v41 = vmax.f32 %v2025_v29, 0.0  ;;  %v2317_v32 = vpack.c.bf16 %v2301_v30, %v2285_v42  ;;  %v2319_v46 = vpack.c.bf16 %v2303_v33, %v2287_v43  ;;  %v8359_v26 = vld [vmem:[%s10401_s14 + $0x118] sm:$0xff]   ;;  %v8361_v33 = vld [vmem:[%s10401_s14 + $0x150] sm:$0xff]   ;;  %v8366_v43 = vld [vmem:[%s10401_s14 + $0x1c8] sm:$0xff]  }
 0xb63   :  { %v2063_v44 = vpop.f32.mrf.mxu0  ;;  %v2106_v27 = vpop.f32.mrf.mxu1  ;;  %v8360_v30 = vld [vmem:[%s10401_s14 + $0x198] sm:$0xff]   ;;  %v8364_v42 = vld [vmem:[%s10401_s14 + $0x190] sm:$0xff]  }
 0xb64   :  { %v2318_v25 = vpack.c.bf16 %v2302_v40, %v2286_v22  ;;  %v2320_v45 = vpack.c.bf16 %v2304_v41, %v2288_v39  ;;  %v2064_v53 = vadd.f32 %v2063_v44, %v1721_v37  ;;  %v2107_v54 = vadd.f32 %v2106_v27, %v1729_v38  ;;  %v8363_v40 = vld [vmem:[%s10401_s14 + $0x110] sm:$0xff]  }
 0xb65   :  { %v9238_v47 = vpop.f32.mrf.mxu0  ;;  %v9240_v48 = vpop.f32.mrf.mxu1  ;;  %v9304_v22 = vsub.s32 6, %v9191_v62 }
 0xb66   :  { %3139 = vmatprep.mubr.bf16.mxu0 %v2318_v25  ;;  %3180 = vmatprep.mubr.bf16.mxu1 %v2320_v45  ;;  %v2290_v5 = vmax.f32 %v2064_v53, 0.0  ;;  %v2292_v6 = vmax.f32 %v2107_v54, 0.0  ;;  %v9329_v25 = vld [vmem:[%s10404_s13 + $0x8] sm:$0xff] }
 0xb67   :  { %v2067_v55 = vpop.f32.mrf.mxu0  ;;  %v2110_v56 = vpop.f32.mrf.mxu1  ;;  %3140 = vmatmul.mubr.bf16.vlgmr.msra.gmra.mxu0 %v2317_v32  ;;  %3181 = vmatmul.mubr.bf16.vlgmr.msra.gmra.mxu1 %v2319_v46  ;;  %v1725_v27 = vrot.slane %v9208_v4, %v9304_v22  ;;  %v1737_v32 = vrot.slane %v9329_v25, %v9194_v63  ;;  %v1745_v53 = vrot.slane %v9329_v25, %v9197_v1 }
 0xb68   :  { %v2068_v57 = vadd.f32 %v2067_v55, %v1721_v37  ;;  %v2111_v58 = vadd.f32 %v2110_v56, %v1729_v38  ;;  %7752 = vmatpush3.bf16.msra.mxu0 %v8343_v21  ;;  %7774 = vmatpush3.bf16.msra.mxu1 %v8344_v28  ;;  %v8362_v37 = vld [vmem:[%s10401_s14 + $0x1d0] sm:$0xff]   ;;  %v9301_v38 = vsub.s32 4, %v9191_v62  ;;  %v8365_v62 = vld [vmem:[%s10401_s14 + $0x148] sm:$0xff]  }
 0xb69   :  { %7753 = vmatprep.subr.bf16.mxu0 %v8345_v51  ;;  %7775 = vmatprep.subr.bf16.mxu1 %v8346_v52  ;;  %v9272_v16 = vpop.f32.mrf.mxu0  ;;  %v9277_v18 = vpop.f32.mrf.mxu1  ;;  %v8367_v21 = vld [vmem:[%s10401_s14 + $0x108] sm:$0xff]   ;;  %v8369_v51 = vld [vmem:[%s10401_s14 + $0x140] sm:$0xff]   ;;  %v2109_v52 = vadd.f32 %v9240_v48, %v1725_v27  ;;  %v2105_v56 = vadd.f32 %v9226_v36, %v1725_v27 }
 0xb6a   :  { %v2306_v7 = vmax.f32 %v2068_v57, 0.0  ;;  %v2308_v8 = vmax.f32 %v2111_v58, 0.0  ;;  %v1717_v44 = vrot.slane %v9208_v4, %v9301_v38  ;;  %v8368_v4 = vld [vmem:[%s10401_s14 + $0x188] sm:$0xff]   ;;  %v8371_v58 = vld [vmem:[%s10401_s14 + $0x100] sm:$0xff]  }
 0xb6b   :  { %v2149_v24 = vpop.f32.mrf.mxu0  ;;  %v2192_v29 = vpop.f32.mrf.mxu1  ;;  %v8388_v27 = vld [vmem:[%s10401_s14 + $0x2a0] sm:$0xff]  }
 0xb6c   :  { %v2322_v10 = vpack.c.bf16 %v2306_v7, %v2290_v5  ;;  %v2324_v11 = vpack.c.bf16 %v2308_v8, %v2292_v6  ;;  %7754 = vmatpush3.bf16.msra.mxu0 %v8347_v59  ;;  %7776 = vmatpush3.bf16.msra.mxu1 %v8348_v60  ;;  %v2066_v28 = vadd.f32 %v9238_v47, %v1717_v44  ;;  %v8370_v47 = vld [vmem:[%s10401_s14 + $0x1c0] sm:$0xff]   ;;  %v8374_v5 = vld [vmem:[%s10401_s14 + $0x2f8] sm:$0xff]   ;;  %v2291_v8 = vmax.f32 %v2105_v56, 0.0  ;;  %v8397_v56 = vld [vmem:[%s10401_s14 + $0x248] sm:$0xff]  }
 0xb6d   :  { %7755 = vmatprep.subr.bf16.mxu0 %v8349_v61  ;;  %7777 = vmatprep.subr.bf16.mxu1 %v8350_v9  ;;  %v9306_v39 = vpop.f32.mrf.mxu0  ;;  %v9311_v41 = vpop.f32.mrf.mxu1  ;;  %v2062_v54 = vadd.f32 %v9224_v35, %v1717_v44  ;;  %v2150_v59 = vadd.f32 %v2149_v24, %v1737_v32  ;;  %v8372_v60 = vld [vmem:[%s10401_s14 + $0x180] sm:$0xff]   ;;  %v8373_v35 = vld [vmem:[%s10401_s14 + $0x278] sm:$0xff]   ;;  %v2307_v61 = vmax.f32 %v2109_v52, 0.0  ;;  %v2193_v36 = vadd.f32 %v2192_v29, %v1745_v53  ;;  %v8379_v24 = vld [vmem:[%s10401_s14 + $0x230] sm:$0xff]  }
 0xb6e   :  { %3221 = vmatprep.mubr.bf16.mxu0 %v2322_v10  ;;  %3262 = vmatprep.mubr.bf16.mxu1 %v2324_v11  ;;  %v2305_v48 = vmax.f32 %v2066_v28, 0.0  ;;  %v8375_v10 = vld [vmem:[%s10401_s14 + $0x238] sm:$0xff]   ;;  %v8381_v29 = vld [vmem:[%s10401_s14 + $0x268] sm:$0xff]   ;;  %v8394_v52 = vld [vmem:[%s10401_s14 + $0x2d0] sm:$0xff]  }
 0xb6f   :  { %v2153_v45 = vpop.f32.mrf.mxu0  ;;  %v2196_v46 = vpop.f32.mrf.mxu1  ;;  %v2289_v6 = vmax.f32 %v2062_v54, 0.0 }
 0xb70   :  { %7756 = vmatpush3.bf16.msra.mxu0 %v8351_v12  ;;  %7778 = vmatpush3.bf16.msra.mxu1 %v8352_v13  ;;  %v2154_v55 = vadd.f32 %v2153_v45, %v1737_v32  ;;  %v2197_v57 = vadd.f32 %v2196_v46, %v1745_v53  ;;  %v2294_v12 = vmax.f32 %v2150_v59, 0.0  ;;  %v8376_v13 = vld [vmem:[%s10401_s14 + $0x2b8] sm:$0xff]  }
 0xb71   :  { %7757 = vmatprep.subr.bf16.mxu0 %v8353_v14  ;;  %7779 = vmatprep.subr.bf16.mxu1 %v8354_v34  ;;  %v2321_v11 = vpack.c.bf16 %v2305_v48, %v2289_v6  ;;  %v2323_v14 = vpack.c.bf16 %v2307_v61, %v2291_v8  ;;  %v2296_v34 = vmax.f32 %v2193_v36, 0.0  ;;  %v9404_v44 = vpop.f32.mrf.mxu1  ;;  %v8389_v45 = vld [vmem:[%s10401_s14 + $0x258] sm:$0xff]   ;;  %v1741_v48 = vrot.slane %v9329_v25, %v9203_v3  ;;  %v8401_v6 = vld [vmem:[%s10401_s14 + $0x240] sm:$0xff]  }
 0xb72   :  { %v2310_v7 = vmax.f32 %v2154_v55, 0.0  ;;  %v2312_v9 = vmax.f32 %v2197_v57, 0.0  ;;  %v8391_v32 = vld [vmem:[%s10401_s14 + $0x218] sm:$0xff]   ;;  %v8396_v55 = vld [vmem:[%s10401_s14 + $0x290] sm:$0xff]   ;;  %v8398_v57 = vld [vmem:[%s10401_s14 + $0x2c8] sm:$0xff]   ;;  %v1753_v61 = vrot.slane %v9329_v25, %v9219_v31  ;;  %v1761_v8 = vrot.slane %v9329_v25, %v9222_v15 }
 0xb73   :  { %v2278_v46 = vpop.f32.mrf.mxu1 }
 0xb74   :  { %7758 = vmatpush3.bf16.msra.mxu0 %v8355_v17  ;;  %7780 = vmatpush3.bf16.msra.mxu1 %v8356_v19  ;;  %v8377_v17 = vld [vmem:[%s10401_s14 + $0x270] sm:$0xff]   ;;  %v2326_v19 = vpack.c.bf16 %v2310_v7, %v2294_v12  ;;  %v2195_v7 = vadd.f32 %v9311_v41, %v1741_v48 }
 0xb75   :  { %7759 = vmatprep.subr.bf16.mxu0 %v8357_v20  ;;  %7781 = vmatprep.subr.bf16.mxu1 %v8358_v23  ;;  %v8378_v20 = vld [vmem:[%s10401_s14 + $0x2f0] sm:$0xff]   ;;  %v2328_v23 = vpack.c.bf16 %v2312_v9, %v2296_v34  ;;  %v9432_v54 = vpop.f32.mrf.mxu1  ;;  %v8404_v34 = vld [vmem:[%s10401_s14 + $0x280] sm:$0xff]  }
 0xb77   :  { %v2282_v36 = vpop.f32.mrf.mxu1 }
 0xb78   :  { %7760 = vmatpush3.bf16.msra.mxu0 %v8359_v26  ;;  %7782 = vmatpush3.bf16.msra.mxu1 %v8360_v30  ;;  %v8380_v26 = vld [vmem:[%s10401_s14 + $0x2b0] sm:$0xff]   ;;  %v8382_v30 = vld [vmem:[%s10401_s14 + $0x2e8] sm:$0xff]   ;;  %v2283_v12 = vadd.f32 %v2282_v36, %v1761_v8 }
 0xb79   :  { %7761 = vmatprep.subr.bf16.mxu0 %v8361_v33  ;;  %7783 = vmatprep.subr.bf16.mxu1 %v8362_v37  ;;  %v8383_v33 = vld [vmem:[%s10401_s14 + $0x228] sm:$0xff]   ;;  %v8427_v36 = vld [vmem:[%s10401_s14 + $0x310] sm:$0xff]  }
 0xb7a   :  { %v8384_v37 = vld [vmem:[%s10401_s14 + $0x2a8] sm:$0xff]  }
 0xb7c   :  { %7762 = vmatpush3.bf16.msra.mxu0 %v8363_v40  ;;  %7784 = vmatpush3.bf16.msra.mxu1 %v8364_v42  ;;  %v8385_v40 = vld [vmem:[%s10401_s14 + $0x260] sm:$0xff]  }
 0xb7d   :  { %7763 = vmatprep.subr.bf16.mxu0 %v8365_v62  ;;  %7785 = vmatprep.subr.bf16.mxu1 %v8366_v43  ;;  %v8386_v42 = vld [vmem:[%s10401_s14 + $0x2e0] sm:$0xff]   ;;  %v9399_v62 = vpop.f32.mrf.mxu0 }
 0xb7e   :  { %v8387_v43 = vld [vmem:[%s10401_s14 + $0x220] sm:$0xff]  }
 0xb7f   :  { %v2235_v28 = vpop.f32.mrf.mxu0 }
 0xb80   :  { %7764 = vmatpush3.bf16.msra.mxu0 %v8367_v21  ;;  %7786 = vmatpush3.bf16.msra.mxu1 %v8368_v4  ;;  %v8390_v21 = vld [vmem:[%s10401_s14 + $0x2d8] sm:$0xff]  }
 0xb81   :  { %7765 = vmatprep.subr.bf16.mxu0 %v8369_v51  ;;  %7787 = vmatprep.subr.bf16.mxu1 %v8370_v47  ;;  %v8392_v4 = vld [vmem:[%s10401_s14 + $0x298] sm:$0xff]   ;;  %v8393_v51 = vld [vmem:[%s10401_s14 + $0x250] sm:$0xff]   ;;  %v9427_v53 = vpop.f32.mrf.mxu0 }
 0xb82   :  { %v8395_v47 = vld [vmem:[%s10401_s14 + $0x210] sm:$0xff]  }
 0xb83   :  { %v2239_v59 = vpop.f32.mrf.mxu0 }
 0xb84   :  { %7766 = vmatpush3.bf16.msra.mxu0 %v8371_v58  ;;  %7788 = vmatpush3.bf16.msra.mxu1 %v8372_v60  ;;  %v1733_v58 = vrot.slane %v9329_v25, %v9200_v2  ;;  %v8399_v60 = vld [vmem:[%s10401_s14 + $0x208] sm:$0xff]  }
 0xb85   :  { %7795 = vmatprep.subr.bf16.mxu0 %v8373_v35  ;;  %7817 = vmatprep.subr.bf16.mxu1 %v8374_v5  ;;  %v8400_v5 = vld [vmem:[%s10401_s14 + $0x288] sm:$0xff]  }
 0xb86   :  { %v2152_v35 = vadd.f32 %v9306_v39, %v1733_v58  ;;  %v8402_v39 = vld [vmem:[%s10401_s14 + $0x2c0] sm:$0xff]   ;;  %v2148_v9 = vadd.f32 %v9272_v16, %v1733_v58  ;;  %v8405_v16 = vld [vmem:[%s10401_s14 + $0x378] sm:$0xff]  }
 0xb87   :  { %3222 = vmatmul.mubr.bf16.vlgmr.msra.gmra.mxu0 %v2321_v11  ;;  %3263 = vmatmul.mubr.bf16.vlgmr.msra.gmra.mxu1 %v2323_v14  ;;  %v2191_v11 = vadd.f32 %v9277_v18, %v1741_v48  ;;  %v2236_v14 = vadd.f32 %v2235_v28, %v1753_v61  ;;  %v2279_v18 = vadd.f32 %v2278_v46, %v1761_v8  ;;  %v8411_v28 = vld [vmem:[%s10401_s14 + $0x330] sm:$0xff]   ;;  %v8413_v46 = vld [vmem:[%s10401_s14 + $0x368] sm:$0xff]   ;;  %v8421_v58 = vld [vmem:[%s10401_s14 + $0x358] sm:$0xff]  }
 0xb88   :  { %7796 = vmatpush3.bf16.msra.mxu0 %v8375_v10  ;;  %3303 = vmatprep.mubr.bf16.mxu0 %v2326_v19  ;;  %v2240_v10 = vadd.f32 %v2239_v59, %v1753_v61  ;;  %v2309_v41 = vmax.f32 %v2152_v35, 0.0  ;;  %v8406_v19 = vld [vmem:[%s10401_s14 + $0x3f8] sm:$0xff]   ;;  %v8425_v35 = vld [vmem:[%s10401_s14 + $0x350] sm:$0xff]   ;;  %v1749_v8 = vrot.slane %v9329_v25, %v9301_v38 }
 0xb89   :  { %7818 = vmatpush3.bf16.msra.mxu1 %v8376_v13  ;;  %3344 = vmatprep.mubr.bf16.mxu1 %v2328_v23  ;;  %v8403_v13 = vld [vmem:[%s10401_s14 + $0x200] sm:$0xff]   ;;  %v8422_v48 = vld [vmem:[%s10401_s14 + $0x3d8] sm:$0xff]   ;;  %v8426_v61 = vld [vmem:[%s10401_s14 + $0x3d0] sm:$0xff]  }
 0xb8a   :  { %7797 = vmatprep.subr.bf16.mxu0 %v8377_v17  ;;  %7819 = vmatprep.subr.bf16.mxu1 %v8378_v20  ;;  %v2311_v17 = vmax.f32 %v2195_v7, 0.0  ;;  %v2293_v20 = vmax.f32 %v2148_v9, 0.0  ;;  %v2314_v23 = vmax.f32 %v2240_v10, 0.0  ;;  %v8423_v59 = vld [vmem:[%s10401_s14 + $0x318] sm:$0xff]   ;;  %v8430_v7 = vld [vmem:[%s10401_s14 + $0x3c8] sm:$0xff]   ;;  %v2238_v10 = vadd.f32 %v9427_v53, %v1749_v8 }
 0xb8b   :  { %v8431_v9 = vld [vmem:[%s10401_s14 + $0x308] sm:$0xff]  }
 0xb8c   :  { %7798 = vmatpush3.bf16.msra.mxu0 %v8379_v24  ;;  %v2295_v24 = vmax.f32 %v2191_v11, 0.0  ;;  %v8432_v11 = vld [vmem:[%s10401_s14 + $0x388] sm:$0xff]  }
 0xb8d   :  { %7820 = vmatpush3.bf16.msra.mxu1 %v8380_v26  ;;  %7799 = vmatprep.subr.bf16.mxu0 %v8381_v29  ;;  %v2316_v26 = vmax.f32 %v2283_v12, 0.0  ;;  %v8407_v29 = vld [vmem:[%s10401_s14 + $0x338] sm:$0xff]   ;;  %v8433_v12 = vld [vmem:[%s10401_s14 + $0x340] sm:$0xff]  }
 0xb8e   :  { %7821 = vmatprep.subr.bf16.mxu1 %v8382_v30  ;;  %v2325_v30 = vpack.c.bf16 %v2309_v41, %v2293_v20  ;;  %v2234_v41 = vadd.f32 %v9399_v62, %v1749_v8 }
 0xb90   :  { %7800 = vmatpush3.bf16.msra.mxu0 %v8383_v33  ;;  %v2298_v33 = vmax.f32 %v2236_v14, 0.0  ;;  %v8435_v14 = vld [vmem:[%s10401_s14 + $0x300] sm:$0xff]  }
 0xb91   :  { %7822 = vmatpush3.bf16.msra.mxu1 %v8384_v37  ;;  %7801 = vmatprep.subr.bf16.mxu0 %v8385_v40  ;;  %v8408_v37 = vld [vmem:[%s10401_s14 + $0x3b8] sm:$0xff]   ;;  %v2327_v40 = vpack.c.bf16 %v2311_v17, %v2295_v24  ;;  %v2297_v17 = vmax.f32 %v2234_v41, 0.0 }
 0xb92   :  { %7823 = vmatprep.subr.bf16.mxu1 %v8386_v42  ;;  %v2300_v42 = vmax.f32 %v2279_v18, 0.0 }
 0xb94   :  { %7802 = vmatpush3.bf16.msra.mxu0 %v8387_v43  ;;  %v8409_v43 = vld [vmem:[%s10401_s14 + $0x370] sm:$0xff]  }
 0xb95   :  { %7824 = vmatpush3.bf16.msra.mxu1 %v8388_v27  ;;  %7803 = vmatprep.subr.bf16.mxu0 %v8389_v45  ;;  %v2330_v27 = vpack.c.bf16 %v2314_v23, %v2298_v33  ;;  %v8410_v45 = vld [vmem:[%s10401_s14 + $0x3f0] sm:$0xff]  }
 0xb96   :  { %7825 = vmatprep.subr.bf16.mxu1 %v8390_v21  ;;  %v2332_v21 = vpack.c.bf16 %v2316_v26, %v2300_v42 }
 0xb98   :  { %7804 = vmatpush3.bf16.msra.mxu0 %v8391_v32  ;;  %v8412_v32 = vld [vmem:[%s10401_s14 + $0x3b0] sm:$0xff]  }
 0xb99   :  { %7826 = vmatpush3.bf16.msra.mxu1 %v8392_v4  ;;  %7805 = vmatprep.subr.bf16.mxu0 %v8393_v51  ;;  %v8414_v4 = vld [vmem:[%s10401_s14 + $0x3e8] sm:$0xff]  }
 0xb9a   :  { %7827 = vmatprep.subr.bf16.mxu1 %v8394_v52  ;;  %v8415_v51 = vld [vmem:[%s10401_s14 + $0x328] sm:$0xff]  }
 0xb9b   :  { %v8416_v52 = vld [vmem:[%s10401_s14 + $0x3a8] sm:$0xff]  }
 0xb9c   :  { %7806 = vmatpush3.bf16.msra.mxu0 %v8395_v47  ;;  %v8417_v47 = vld [vmem:[%s10401_s14 + $0x360] sm:$0xff]  }
 0xb9d   :  { %7828 = vmatpush3.bf16.msra.mxu1 %v8396_v55  ;;  %7807 = vmatprep.subr.bf16.mxu0 %v8397_v56  ;;  %v8418_v55 = vld [vmem:[%s10401_s14 + $0x3e0] sm:$0xff]  }
 0xb9e   :  { %7829 = vmatprep.subr.bf16.mxu1 %v8398_v57  ;;  %v8419_v56 = vld [vmem:[%s10401_s14 + $0x320] sm:$0xff]  }
 0xb9f   :  { %v8420_v57 = vld [vmem:[%s10401_s14 + $0x3a0] sm:$0xff]  }
 0xba0   :  { %7808 = vmatpush3.bf16.msra.mxu0 %v8399_v60  ;;  %v8424_v60 = vld [vmem:[%s10401_s14 + $0x398] sm:$0xff]  }
 0xba1   :  { %7830 = vmatpush3.bf16.msra.mxu1 %v8400_v5  ;;  %7809 = vmatprep.subr.bf16.mxu0 %v8401_v6  ;;  %v8428_v5 = vld [vmem:[%s10401_s14 + $0x390] sm:$0xff]   ;;  %v8429_v6 = vld [vmem:[%s10401_s14 + $0x348] sm:$0xff]  }
 0xba2   :  { %7831 = vmatprep.subr.bf16.mxu1 %v8402_v39  ;;  %v1757_v39 = vrot.slane %v9329_v25, %v9304_v22  ;;  %v8434_v25 = vld [vmem:[%s10401_s14 + $0x3c0] sm:$0xff]  }
 0xba4   :  { %7810 = vmatpush3.bf16.msra.mxu0 %v8403_v13  ;;  %v2281_v13 = vadd.f32 %v9432_v54, %v1757_v39  ;;  %v2277_v53 = vadd.f32 %v9404_v44, %v1757_v39  ;;  %v8436_v54 = vld [vmem:[%s10401_s14 + $0x380] sm:$0xff]  }
 0xba5   :  { %7832 = vmatpush3.bf16.msra.mxu1 %v8404_v34  ;;  %7839 = vmatprep.subr.bf16.mxu0 %v8405_v16  ;;  %v2313_v34 = vmax.f32 %v2238_v10, 0.0 }
 0xba6   :  { %7861 = vmatprep.subr.bf16.mxu1 %v8406_v19  ;;  %v2315_v16 = vmax.f32 %v2281_v13, 0.0  ;;  %v2299_v18 = vmax.f32 %v2277_v53, 0.0 }
 0xba7   :  { %3304 = vmatmul.mubr.bf16.vlgmr.msra.gmra.mxu0 %v2325_v30  ;;  %v2329_v62 = vpack.c.bf16 %v2313_v34, %v2297_v17 }
 0xba8   :  { %3345 = vmatmul.mubr.bf16.vlgmr.msra.gmra.mxu1 %v2327_v40  ;;  %7840 = vmatpush3.bf16.msra.mxu0 %v8407_v29  ;;  %v2331_v44 = vpack.c.bf16 %v2315_v16, %v2299_v18 }
 0xba9   :  { %3385 = vmatprep.mubr.bf16.mxu0 %v2330_v27  ;;  %7862 = vmatpush3.bf16.msra.mxu1 %v8408_v37 }
 0xbaa   :  { %3426 = vmatprep.mubr.bf16.mxu1 %v2332_v21  ;;  %7841 = vmatprep.subr.bf16.mxu0 %v8409_v43 }
 0xbab   :  { %7863 = vmatprep.subr.bf16.mxu1 %v8410_v45 }
 0xbac   :  { %7842 = vmatpush3.bf16.msra.mxu0 %v8411_v28 }
 0xbad   :  { %7864 = vmatpush3.bf16.msra.mxu1 %v8412_v32  ;;  %7843 = vmatprep.subr.bf16.mxu0 %v8413_v46  ;;  %v7015_v32 = vld [vmem:[%s10405_s15] ss:$0 sm:$0xff] }
 0xbae   :  { %7865 = vmatprep.subr.bf16.mxu1 %v8414_v4 }
 0xbb0   :  { %7844 = vmatpush3.bf16.msra.mxu0 %v8415_v51 }
 0xbb1   :  { %7866 = vmatpush3.bf16.msra.mxu1 %v8416_v52  ;;  %7845 = vmatprep.subr.bf16.mxu0 %v8417_v47 }
 0xbb2   :  { %7867 = vmatprep.subr.bf16.mxu1 %v8418_v55 }
 0xbb4   :  { %7846 = vmatpush3.bf16.msra.mxu0 %v8419_v56 }
 0xbb5   :  { %7868 = vmatpush3.bf16.msra.mxu1 %v8420_v57  ;;  %7847 = vmatprep.subr.bf16.mxu0 %v8421_v58 }
 0xbb6   :  { %7869 = vmatprep.subr.bf16.mxu1 %v8422_v48 }
 0xbb8   :  { %7848 = vmatpush3.bf16.msra.mxu0 %v8423_v59 }
 0xbb9   :  { %7870 = vmatpush3.bf16.msra.mxu1 %v8424_v60  ;;  %7849 = vmatprep.subr.bf16.mxu0 %v8425_v35 }
 0xbba   :  { %7871 = vmatprep.subr.bf16.mxu1 %v8426_v61 }
 0xbbc   :  { %7850 = vmatpush3.bf16.msra.mxu0 %v8427_v36 }
 0xbbd   :  { %7872 = vmatpush3.bf16.msra.mxu1 %v8428_v5  ;;  %7851 = vmatprep.subr.bf16.mxu0 %v8429_v6 }
 0xbbe   :  { %7873 = vmatprep.subr.bf16.mxu1 %v8430_v7 }
 0xbc0   :  { %7852 = vmatpush3.bf16.msra.mxu0 %v8431_v9 }
 0xbc1   :  { %7874 = vmatpush3.bf16.msra.mxu1 %v8432_v11  ;;  %7853 = vmatprep.subr.bf16.mxu0 %v8433_v12 }
 0xbc2   :  { %7875 = vmatprep.subr.bf16.mxu1 %v8434_v25 }
 0xbc4   :  { %7854 = vmatpush3.bf16.msra.mxu0 %v8435_v14 }
 0xbc5   :  { %7876 = vmatpush3.bf16.msra.mxu1 %v8436_v54 }
 0xbc7   :  { %3386 = vmatmul.mubr.bf16.vlgmr.msra.gmra.mxu0 %v2329_v62 }
 0xbc8   :  { %3427 = vmatmul.mubr.bf16.vlgmr.msra.gmra.mxu1 %v2331_v44 }
 0xc27   :  { %v7723_v19 = vpop.f32.mrf.mxu0  ;;  %v7745_v20 = vpop.f32.mrf.mxu1 }
 0xc29   :  { %v7724_v23 = vpop.f32.mrf.mxu0  ;;  %v7746_v24 = vpop.f32.mrf.mxu1 }
 0xc2a   :  { %v7725_v28 = vadd.f32 %v7724_v23, %v7723_v19  ;;  %v7747_v56 = vadd.f32 %v7746_v24, %v7745_v20 }
 0xc2b   :  { %v7726_v26 = vpop.f32.mrf.mxu0  ;;  %v7748_v29 = vpop.f32.mrf.mxu1 }
 0xc2c   :  { %v3142_v51 = vadd.f32 %v7725_v28, %v7015_v32 }
 0xc2d   :  { %v7727_v30 = vpop.f32.mrf.mxu0  ;;  %v7749_v37 = vpop.f32.mrf.mxu1 }
 0xc2e   :  { %v7728_v52 = vadd.f32 %v7727_v30, %v7726_v26  ;;  %v3183_v58 = vadd.f32 %v7747_v56, %v3142_v51  ;;  %v7750_v35 = vadd.f32 %v7749_v37, %v7748_v29 }
 0xc30   :  { %v3145_v48 = vadd.f32 %v7728_v52, %v7015_v32 }
 0xc32   :  { %v3186_v5 = vadd.f32 %v7750_v35, %v3145_v48  ;;  %v7145_v48 = vld [vmem:[%s10427_s6 + $0x28] sm:$0xff] }
 0xc47   :  { %v7767_v33 = vpop.f32.mrf.mxu0  ;;  %v7789_v40 = vpop.f32.mrf.mxu1 }
 0xc49   :  { %v7768_v42 = vpop.f32.mrf.mxu0  ;;  %v7790_v43 = vpop.f32.mrf.mxu1 }
 0xc4a   :  { %v7769_v57 = vadd.f32 %v7768_v42, %v7767_v33  ;;  %v7791_v6 = vadd.f32 %v7790_v43, %v7789_v40 }
 0xc4b   :  { %v7770_v27 = vpop.f32.mrf.mxu0  ;;  %v7792_v45 = vpop.f32.mrf.mxu1 }
 0xc4c   :  { %v3224_v61 = vadd.f32 %v7769_v57, %v3183_v58  ;;  %v7146_v58 = vld [vmem:[%s10427_s6 + $0x30] sm:$0xff] }
 0xc4d   :  { %v7771_v21 = vpop.f32.mrf.mxu0  ;;  %v7793_v4 = vpop.f32.mrf.mxu1 }
 0xc4e   :  { %v7772_v36 = vadd.f32 %v7771_v21, %v7770_v27  ;;  %v3265_v9 = vadd.f32 %v7791_v6, %v3224_v61  ;;  %v7794_v11 = vadd.f32 %v7793_v4, %v7792_v45 }
 0xc50   :  { %v3227_v10 = vadd.f32 %v7772_v36, %v3186_v5 }
 0xc52   :  { %v3268_v53 = vadd.f32 %v7794_v11, %v3227_v10 }
 0xc67   :  { %v7811_v46 = vpop.f32.mrf.mxu0 }
 0xc68   :  { %v7833_v47 = vpop.f32.mrf.mxu1 }
 0xc69   :  { %v7812_v55 = vpop.f32.mrf.mxu0 }
 0xc6a   :  { %v7834_v59 = vpop.f32.mrf.mxu1  ;;  %v7813_v7 = vadd.f32 %v7812_v55, %v7811_v46 }
 0xc6b   :  { %v7814_v60 = vpop.f32.mrf.mxu0  ;;  %v7835_v14 = vadd.f32 %v7834_v59, %v7833_v47  ;;  %v7144_v59 = vld [vmem:[%s10427_s6 + $0x20] sm:$0xff] }
 0xc6c   :  { %v7836_v8 = vpop.f32.mrf.mxu1  ;;  %v3306_v12 = vadd.f32 %v7813_v7, %v3265_v9 }
 0xc6d   :  { %v7815_v39 = vpop.f32.mrf.mxu0 }
 0xc6e   :  { %v7816_v13 = vadd.f32 %v7815_v39, %v7814_v60  ;;  %v7837_v25 = vpop.f32.mrf.mxu1  ;;  %v3347_v16 = vadd.f32 %v7835_v14, %v3306_v12  ;;  %v8645_v39 = vld [vmem:[%s10402_s10] ss:$0 sm:$0xff] }
 0xc6f   :  { %v7838_v19 = vadd.f32 %v7837_v25, %v7836_v8  ;;  %v8646_v12 = vld [vmem:[%s10403_s11] ss:$0 sm:$0xff] }
 0xc70   :  { %v3309_v17 = vadd.f32 %v7816_v13, %v3268_v53  ;;  %v7447_v53 = vld [vmem:[%s10396_s7 + $0x1] ss:$0 sm:$0xff] }
 0xc72   :  { %v3350_v29 = vadd.f32 %v7838_v19, %v3309_v17 }
 0xc87   :  { %v7855_v41 = vpop.f32.mrf.mxu0 }
 0xc88   :  { %v7877_v34 = vpop.f32.mrf.mxu1 }
 0xc89   :  { %v7856_v54 = vpop.f32.mrf.mxu0 }
 0xc8a   :  { %v7857_v18 = vadd.f32 %v7856_v54, %v7855_v41  ;;  %v7878_v62 = vpop.f32.mrf.mxu1 }
 0xc8b   :  { %v7858_v44 = vpop.f32.mrf.mxu0  ;;  %v7879_v23 = vadd.f32 %v7878_v62, %v7877_v34 }
 0xc8c   :  { %v3388_v20 = vadd.f32 %v7857_v18, %v3347_v16  ;;  %v7880_v24 = vpop.f32.mrf.mxu1 }
 0xc8d   :  { %v7859_v26 = vpop.f32.mrf.mxu0 }
 0xc8e   :  { %v3429_v30 = vadd.f32 %v7879_v23, %v3388_v20  ;;  %v7860_v33 = vadd.f32 %v7859_v26, %v7858_v44  ;;  %v7881_v37 = vpop.f32.mrf.mxu1  ;;  %v9634_v23 = vld [vmem:[%s10397_s4 + $0x8] sm:$0xff] }
 0xc8f   :  { %v7882_v42 = vadd.f32 %v7881_v37, %v7880_v24 }
 0xc90   :  { %v3391_v40 = vadd.f32 %v7860_v33, %v3350_v29  ;;  %v3435_v43 = vadd.f32 %v3429_v30, %v9013_v50  ;;  %v9641_v29 = vld [vmem:[%s10397_s4] sm:$0xff] }
 0xc92   :  { %v3432_v27 = vadd.f32 %v7882_v42, %v3391_v40  ;;  %v3437_v45 = vsel %vm414_vm0, %v3435_v43, 0.0 }
 0xc93   :  { %3438 = vadd.xlane.f32.xlu0 %v3437_v45 }
 0xc94   :  { %v3436_v21 = vadd.f32 %v3432_v27, %v9011_v49  ;;  %v7147_v49 = vld [vmem:[%s10427_s6 + $0x38] sm:$0xff]  ;;  %s10432_s6 = smov 40  }
 0xc95   :  { %8199 = vmatprep.subr.mxu0 %v7147_v49 }
 0xc96   :  { %v3440_v28 = vsel %vm414_vm0, %v3436_v21, 0.0  ;;  %8200 = vmatpush3.msra.mxu0 %v7147_v49 }
 0xc97   :  { %3441 = vadd.xlane.f32.xlu1 %v3440_v28  ;;  %8201 = vmatprep.subr.mxu0 %v7146_v58 }
 0xc98   :  { %8202 = vmatpush3.msra.mxu0 %v7146_v58 }
 0xc99   :  { %8203 = vmatprep.subr.mxu0 %v7145_v48 }
 0xc9a   :  { %8204 = vmatpush3.msra.mxu0 %v7145_v48 }
 0xc9b   :  { %8205 = vmatprep.subr.mxu0 %v7144_v59 }
 0xc9c   :  { %8206 = vmatpush3.msra.mxu0 %v7144_v59 }
 0xd1c   :  { %v3439_v32 = vpop.xlane.xlu0 %3438 }
 0xd1d   :  { %v3443_v46 = vmul.f32 0.03125, %v3439_v32 }
 0xd1f   :  { %v3445_v4 = vsub.f32 %v3435_v43, %v3443_v46 }
 0xd20   :  { %v3442_v51 = vpop.xlane.xlu1 %3441 }
 0xd21   :  { %v3444_v52 = vmul.f32 0.03125, %v3442_v51  ;;  %v3447_v47 = vmul.f32 %v3445_v4, %v3445_v4 }
 0xd23   :  { %v3446_v55 = vsub.f32 %v3436_v21, %v3444_v52  ;;  %v3449_v56 = vsel %vm414_vm0, %v3447_v47, 0.0 }
 0xd24   :  { %3450 = vadd.xlane.f32.xlu0 %v3449_v56 }
 0xd25   :  { %v3448_v50 = vmul.f32 %v3446_v55, %v3446_v55 }
 0xd27   :  { %v3452_v57 = vsel %vm414_vm0, %v3448_v50, 0.0 }
 0xd28   :  { %3453 = vadd.xlane.f32.xlu1 %v3452_v57 }
 0xdad   :  { %v3451_v60 = vpop.xlane.xlu0 %3450 }
 0xdae   :  { %v3455_v35 = vmul.f32 0.03125, %v3451_v60 }
 0xdb0   :  { %v3457_v61 = vadd.f32 1e-05, %v3455_v35 }
 0xdb1   :  { %v3454_v36 = vpop.xlane.xlu1 %3453 }
 0xdb2   :  { %8601 = vrsqrt.f32 %v3457_v61  ;;  %v3456_v5 = vmul.f32 0.03125, %v3454_v36 }
 0xdb4   :  { %v3458_v6 = vadd.f32 1e-05, %v3456_v5  ;;  %v7149_v5 = vld [vmem:[%s10398_s8 + $0x20] sm:$0xff] }
 0xdb6   :  { %8603 = vrsqrt.f32 %v3458_v6 }
 0xdbf   :  { %v8602_v7 = vpop.eup %8601 }
 0xdc0   :  { %v3461_v8 = vmul.f32 %v8602_v7, %v3445_v4 }
 0xdc2   :  { %v3463_v9 = vmul.f32 %v8645_v39, %v3461_v8 }
 0xdc3   :  { %v8604_v10 = vpop.eup %8603 }
 0xdc4   :  { %v3462_v11 = vmul.f32 %v8604_v10, %v3446_v55  ;;  %v9604_v13 = vadd.f32 %v8646_v12, %v3463_v9 }
 0xdc6   :  { %8207 = vmatprep.mubr.msk.f32.mxu0 %vm414_vm0, %v9604_v13  ;;  %v3464_v25 = vmul.f32 %v8645_v39, %v3462_v11 }
 0xdc8   :  { %v9608_v41 = vadd.f32 %v8646_v12, %v3464_v25 }
 0xdca   :  { %8208 = vmatmul.mubr.msk.f32.vlgmr.msra.gmra.mxu0 %vm414_vm0, %v9608_v41 }
 0xe8a   :  { %v8209_v14 = vpop.f32.mrf.mxu0 }
 0xe8b   :  { %v9615_v34 = vadd.f32 %v8209_v14, %v7447_v53 }
 0xe8c   :  { %v3858_v54 = vpop.f32.mrf.mxu0 }
 0xe8d   :  { %v9617_v16 = vadd.f32 %v7447_v53, %v3858_v54  ;;  %3879 = vrot.lane.b32.xlu0 %v9615_v34, %s8652_s3 }
 0xe8f   :  { %3877 = vrot.lane.b32.xlu1 %v9617_v16, %s8652_s3  ;;  %8214 = vmatprep.mubr.msk.f32.mxu1 %vm510_vm1, %v9617_v16 }
 0xeff   :  { %v3880_v17 = vpop.permute.xlu0 %3879 }
 0xf00   :  { %8210 = vmatprep.subr.msk.mxu1 %vm510_vm1, %v3880_v17 }
 0xf01   :  { %8211 = vmatpush3.xpose.msk.msra.mxu1 %vm510_vm1, %v3880_v17  ;;  %v3878_v18 = vpop.permute.xlu1 %3877 }
 0xf02   :  { %8212 = vmatprep.subr.msk.mxu1 %vm510_vm1, %v3878_v18 }
 0xf05   :  { %8213 = vmatpush3.xpose.msk.msra.mxu1 %vm510_vm1, %v3878_v18 }
 0xf06   :  { %8224 = vmatprep.subr.mxu1 %v7149_v5 }
 0xf08   :  { %8215 = vmatmul.mubr.msk.f32.vlgmr.msra.gmra.mxu1 %vm510_vm1, %v9615_v34 }
 0xf09   :  { %8225 = vmatpush3.msra.mxu1 %v7149_v5 }
 0xfc8   :  { %v8216_v62 = vpop.f32.mrf.mxu1 }
 0xfc9   :  { %v3965_v44 = vmul.f32 0.35355338, %v8216_v62 }
 0xfca   :  { %v3955_v19 = vpop.f32.mrf.mxu1 }
 0xfcb   :  { %v3964_v20 = vmul.f32 0.35355338, %v3955_v19  ;;  %v3967_v24 = vadd.f32 %v9634_v23, %v3965_v44 }
 0xfcd   :  { %v3971_v26 = vsel %vm598_vm2, %v3967_v24, -inf  ;;  %v3966_v30 = vadd.f32 %v9641_v29, %v3964_v20 }
 0xfce   :  { %3972 = vmax.xlane.f32.xlu0 %v3971_v26 }
 0xfcf   :  { %v3968_v33 = vsel %vm598_vm2, %v3966_v30, -inf }
 0xfd0   :  { %3969 = vmax.xlane.f32.xlu1 %v3968_v33 }
0x1057   :  { %v3973_v37 = vpop.xlane.xlu0 %3972 }
0x1058   :  { %v3975_v40 = vsub.f32 %v3967_v24, %v3973_v37 }
0x1059   :  { %v3970_v42 = vpop.xlane.xlu1 %3969 }
0x105a   :  { %v3978_v43 = vmul.f32 1.442695, %v3975_v40  ;;  %v3974_v27 = vsub.f32 %v3966_v30, %v3970_v42  ;;  %v9699_v30 = vld [vmem:[%s10399_s9 + $0x1] ss:$0 sm:$0xff] }
0x105b   :  { %v3874_v33 = vadd.f32 %v9699_v30, %v9608_v41 }
0x105c   :  { %8605 = vpow2.f32 %v3978_v43  ;;  %v3976_v45 = vmul.f32 1.442695, %v3974_v27 }
0x105e   :  { %8607 = vpow2.f32 %v3976_v45 }
0x1069   :  { %v8606_v21 = vpop.eup %8605 }
0x106a   :  { %v3983_v28 = vsel %vm598_vm2, %v8606_v21, 0.0 }
0x106b   :  { %v8608_v32 = vpop.eup %8607  ;;  %3984 = vadd.xlane.f32.xlu1 %v3983_v28 }
0x106c   :  { %v3980_v46 = vsel %vm598_vm2, %v8608_v32, 0.0 }
0x106d   :  { %3981 = vadd.xlane.f32.xlu0 %v3980_v46 }
0x107c   :  { %3990 = vrot.lane.b32.xlu1 %v9617_v16, %s8653_s26 }
0x1080   :  { %4166 = vrot.lane.b32.xlu1 %v9615_v34, %s8654_s27 }
0x1083   :  { %3992 = vrot.lane.b32.xlu0 %v9615_v34, %s8653_s26 }
0x1084   :  { %4160 = vrot.lane.b32.xlu1 %v9617_v16, %s8655_s28 }
0x1087   :  { %4164 = vrot.lane.b32.xlu0 %v9617_v16, %s8654_s27  ;;  %s10428_s27 = smov 56  }
0x1088   :  { %4453 = vrot.lane.b32.xlu1 %v9615_v34, %s8656_s29 }
0x108b   :  { %4162 = vrot.lane.b32.xlu0 %v9615_v34, %s8655_s28  ;;  %s10429_s28 = smov 72  }
0x108c   :  { %4447 = vrot.lane.b32.xlu1 %v9617_v16, %s8657_s30 }
0x108f   :  { %4451 = vrot.lane.b32.xlu0 %v9617_v16, %s8656_s29 }
0x1093   :  { %4449 = vrot.lane.b32.xlu0 %v9615_v34, %s8657_s30 }
0x10f4   :  { %v3985_v4 = vpop.xlane.xlu1 %3984 }
0x10f5   :  { %8609 = vrcp.f32 %v3985_v4 }
0x10f6   :  { %v3982_v51 = vpop.xlane.xlu0 %3981 }
0x10f7   :  { %8611 = vrcp.f32 %v3982_v51 }
0x10f8   :  { %v3991_v52 = vpop.permute.xlu1 %3990 }
0x10fa   :  { %v3993_v47 = vpop.permute.xlu0 %3992 }
0x10fb   :  { %8217 = vmatprep.subr.mxu0 %v3993_v47 }
0x10fc   :  { %8218 = vmatpush3.msra.mxu0 %v3993_v47  ;;  %v4167_v55 = vpop.permute.xlu1 %4166 }
0x10fd   :  { %8219 = vmatprep.subr.mxu0 %v3991_v52 }
0x10fe   :  { %8220 = vmatpush3.msra.mxu0 %v3991_v52  ;;  %v4165_v49 = vpop.permute.xlu0 %4164 }
0x10ff   :  { %8229 = vmatprep.subr.msk.mxu0 %vm510_vm1, %v4167_v55 }
0x1100   :  { %v4161_v57 = vpop.permute.xlu1 %4160 }
0x1102   :  { %v8610_v56 = vpop.eup %8609  ;;  %v4163_v60 = vpop.permute.xlu0 %4162 }
0x1103   :  { %v3989_v48 = vmul.f32 %v8610_v56, %v8606_v21 }
0x1104   :  { %v8612_v50 = vpop.eup %8611  ;;  %v4454_v59 = vpop.permute.xlu1 %4453 }
0x1105   :  { %v3988_v58 = vmul.f32 %v8612_v50, %v8608_v32 }
0x1106   :  { %v4452_v61 = vpop.permute.xlu0 %4451 }
0x1107   :  { %8221 = vmatprep.mubr.msk.f32.mxu0 %vm598_vm2, %v3988_v58 }
0x1108   :  { %8222 = vmatmul.mubr.msk.f32.vlgmr.msra.gmra.mxu0 %vm598_vm2, %v3989_v48  ;;  %v4448_v35 = vpop.permute.xlu1 %4447 }
0x1109   :  { %8230 = vmatpush3.xpose.msk.msra.mxu0 %vm510_vm1, %v4167_v55  ;;  %8233 = vmatprep.mubr.msk.f32.mxu0 %vm510_vm1, %v4161_v57 }
0x110a   :  { %8231 = vmatprep.subr.msk.mxu0 %vm510_vm1, %v4165_v49  ;;  %v4450_v36 = vpop.permute.xlu0 %4449 }
0x110d   :  { %8232 = vmatpush3.xpose.msk.msra.mxu0 %vm510_vm1, %v4165_v49 }
0x110e   :  { %8248 = vmatprep.subr.msk.mxu0 %vm510_vm1, %v4454_v59 }
0x1110   :  { %8234 = vmatmul.mubr.msk.f32.vlgmr.msra.gmra.mxu0 %vm510_vm1, %v4163_v60 }
0x1111   :  { %8249 = vmatpush3.xpose.msk.msra.mxu0 %vm510_vm1, %v4454_v59  ;;  %8252 = vmatprep.mubr.msk.f32.mxu0 %vm510_vm1, %v4448_v35 }
0x1112   :  { %8250 = vmatprep.subr.msk.mxu0 %vm510_vm1, %v4452_v61 }
0x1115   :  { %8251 = vmatpush3.xpose.msk.msra.mxu0 %vm510_vm1, %v4452_v61 }
0x1118   :  { %8253 = vmatmul.mubr.msk.f32.vlgmr.msra.gmra.mxu0 %vm510_vm1, %v4450_v36 }
0x11c8   :  { %v8223_v6 = vpop.f32.mrf.mxu0 }
0x11ca   :  { %v4068_v7 = vpop.f32.mrf.mxu0 }
0x11cb   :  { %8226 = vmatprep.mubr.msk.f32.mxu1 %vm510_vm1, %v4068_v7 }
0x11cc   :  { %8227 = vmatmul.mubr.msk.f32.vlgmr.msra.gmra.mxu1 %vm510_vm1, %v8223_v6 }
0x11d0   :  { %v8235_v8 = vpop.f32.mrf.mxu0 }
0x11d1   :  { %v4252_v39 = vmul.f32 0.35355338, %v8235_v8 }
0x11d2   :  { %v4242_v9 = vpop.f32.mrf.mxu0 }
0x11d3   :  { %v4251_v10 = vmul.f32 0.35355338, %v4242_v9  ;;  %v4254_v11 = vadd.f32 %v9634_v23, %v4252_v39  ;;  %v7150_v9 = vld [vmem:[%s10398_s8 + $0x28] sm:$0xff] }
0x11d5   :  { %v4258_v12 = vsel %vm598_vm2, %v4254_v11, -inf  ;;  %v4253_v25 = vadd.f32 %v9641_v29, %v4251_v10 }
0x11d6   :  { %4259 = vmax.xlane.f32.xlu0 %v4258_v12 }
0x11d7   :  { %v4255_v53 = vsel %vm598_vm2, %v4253_v25, -inf }
0x11d8   :  { %4256 = vmax.xlane.f32.xlu1 %v4255_v53  ;;  %v8254_v42 = vpop.f32.mrf.mxu0 }
0x11d9   :  { %v4539_v45 = vmul.f32 0.35355338, %v8254_v42  ;;  %v7151_v42 = vld [vmem:[%s10398_s8 + $0x30] sm:$0xff] }
0x11da   :  { %v4529_v43 = vpop.f32.mrf.mxu0 }
0x11db   :  { %v4538_v27 = vmul.f32 0.35355338, %v4529_v43  ;;  %v4541_v41 = vadd.f32 %v9634_v23, %v4539_v45 }
0x11dd   :  { %v4540_v21 = vadd.f32 %v9641_v29, %v4538_v27  ;;  %v4545_v32 = vsel %vm598_vm2, %v4541_v41, -inf }
0x11df   :  { %v4542_v28 = vsel %vm598_vm2, %v4540_v21, -inf }
0x125f   :  { %v4260_v14 = vpop.xlane.xlu0 %4259 }
0x1260   :  { %v4262_v54 = vsub.f32 %v4254_v11, %v4260_v14 }
0x1261   :  { %v4257_v17 = vpop.xlane.xlu1 %4256 }
0x1262   :  { %v4265_v18 = vmul.f32 1.442695, %v4262_v54  ;;  %v4261_v62 = vsub.f32 %v4253_v25, %v4257_v17 }
0x1264   :  { %8613 = vpow2.f32 %v4265_v18  ;;  %v4263_v44 = vmul.f32 1.442695, %v4261_v62 }
0x1266   :  { %8615 = vpow2.f32 %v4263_v44 }
0x1271   :  { %v8614_v19 = vpop.eup %8613 }
0x1272   :  { %v4270_v20 = vsel %vm598_vm2, %v8614_v19, 0.0 }
0x1273   :  { %v8616_v24 = vpop.eup %8615  ;;  %4271 = vadd.xlane.f32.xlu1 %v4270_v20 }
0x1274   :  { %v4267_v26 = vsel %vm598_vm2, %v8616_v24, 0.0 }
0x1275   :  { %4268 = vadd.xlane.f32.xlu0 %v4267_v26 }
0x1284   :  { %4277 = vrot.lane.b32.xlu1 %v9617_v16, %s10428_s27 }
0x1288   :  { %4740 = vrot.lane.b32.xlu1 %v9615_v34, %s10429_s28 }
0x128b   :  { %4279 = vrot.lane.b32.xlu0 %v9615_v34, %s10428_s27 }
0x128c   :  { %4734 = vrot.lane.b32.xlu1 %v9617_v16, %s10430_s0  ;;  %v8228_v37 = vpop.f32.mrf.mxu1 }
0x128d   :  { %v9707_v40 = vadd.f32 %v8228_v37, %v3874_v33 }
0x128e   :  { %v4149_v11 = vpop.f32.mrf.mxu1 }
0x128f   :  { %4738 = vrot.lane.b32.xlu0 %v9617_v16, %s10429_s28 }
0x1293   :  { %4736 = vrot.lane.b32.xlu0 %v9615_v34, %s10430_s0 }
0x12b0   :  { %4543 = vmax.xlane.f32.xlu1 %v4542_v28 }
0x12b2   :  { %4546 = vmax.xlane.f32.xlu0 %v4545_v32 }
0x12fc   :  { %v4272_v46 = vpop.xlane.xlu1 %4271 }
0x12fd   :  { %8617 = vrcp.f32 %v4272_v46 }
0x12fe   :  { %v4269_v4 = vpop.xlane.xlu0 %4268 }
0x12ff   :  { %8619 = vrcp.f32 %v4269_v4 }
0x1300   :  { %v4278_v51 = vpop.permute.xlu1 %4277 }
0x1302   :  { %v4280_v52 = vpop.permute.xlu0 %4279 }
0x1303   :  { %8236 = vmatprep.subr.mxu1 %v4280_v52 }
0x1304   :  { %8237 = vmatpush3.msra.mxu1 %v4280_v52  ;;  %v4741_v47 = vpop.permute.xlu1 %4740  ;;  %v3873_v52 = vadd.f32 %v9699_v30, %v9604_v13 }
0x1305   :  { %8238 = vmatprep.subr.mxu1 %v4278_v51  ;;  %8267 = vmatprep.subr.msk.mxu0 %vm510_vm1, %v4741_v47 }
0x1306   :  { %v4739_v55 = vpop.permute.xlu0 %4738  ;;  %8239 = vmatpush3.msra.mxu1 %v4278_v51  ;;  %8268 = vmatpush3.xpose.msk.msra.mxu0 %vm510_vm1, %v4741_v47 }
0x1307   :  { %8269 = vmatprep.subr.msk.mxu0 %vm510_vm1, %v4739_v55  ;;  %8243 = vmatprep.subr.mxu1 %v7150_v9 }
0x1308   :  { %v4735_v56 = vpop.permute.xlu1 %4734 }
0x1309   :  { %8271 = vmatprep.mubr.msk.f32.mxu0 %vm510_vm1, %v4735_v56 }
0x130a   :  { %8270 = vmatpush3.xpose.msk.msra.mxu0 %vm510_vm1, %v4739_v55  ;;  %v8618_v50 = vpop.eup %8617  ;;  %v4737_v49 = vpop.permute.xlu0 %4736  ;;  %v4158_v55 = vadd.f32 %v4149_v11, %v3873_v52  ;;  %v7174_v52 = vld [vmem:[%s10400_s12 + $0x190] sm:$0xff] }
0x130b   :  { %v4276_v48 = vmul.f32 %v8618_v50, %v8614_v19 }
0x130c   :  { %v8620_v57 = vpop.eup %8619 }
0x130d   :  { %8272 = vmatmul.mubr.msk.f32.vlgmr.msra.gmra.mxu0 %vm510_vm1, %v4737_v49  ;;  %v4275_v58 = vmul.f32 %v8620_v57, %v8616_v24 }
0x130e   :  { %5341 = vmatprep.mubr.bf16.mxu0 %v8651_v0 }
0x130f   :  { %8240 = vmatprep.mubr.msk.f32.mxu1 %vm598_vm2, %v4275_v58 }
0x1310   :  { %8241 = vmatmul.mubr.msk.f32.vlgmr.msra.gmra.mxu1 %vm598_vm2, %v4276_v48 }
0x1311   :  { %8244 = vmatpush3.msra.mxu1 %v7150_v9 }
0x1339   :  { %v4544_v59 = vpop.xlane.xlu1 %4543 }
0x133a   :  { %v4548_v60 = vsub.f32 %v4540_v21, %v4544_v59 }
0x133b   :  { %v4547_v35 = vpop.xlane.xlu0 %4546 }
0x133c   :  { %v4550_v61 = vmul.f32 1.442695, %v4548_v60  ;;  %v4549_v36 = vsub.f32 %v4541_v41, %v4547_v35  ;;  %v7152_v35 = vld [vmem:[%s10398_s8 + $0x38] sm:$0xff] }
0x133e   :  { %8621 = vpow2.f32 %v4550_v61  ;;  %v4552_v5 = vmul.f32 1.442695, %v4549_v36 }
0x1340   :  { %8623 = vpow2.f32 %v4552_v5 }
0x134b   :  { %v8622_v6 = vpop.eup %8621 }
0x134c   :  { %v4554_v7 = vsel %vm598_vm2, %v8622_v6, 0.0 }
0x134d   :  { %v8624_v8 = vpop.eup %8623  ;;  %4555 = vadd.xlane.f32.xlu0 %v4554_v7 }
0x134e   :  { %v4557_v39 = vsel %vm598_vm2, %v8624_v8, 0.0 }
0x134f   :  { %4558 = vadd.xlane.f32.xlu1 %v4557_v39 }
0x1360   :  { %4564 = vrot.lane.b32.xlu1 %v9617_v16, %s10431_s21 }
0x1363   :  { %4566 = vrot.lane.b32.xlu0 %v9615_v34, %s10431_s21 }
0x13cd   :  { %v8273_v10 = vpop.f32.mrf.mxu0 }
0x13ce   :  { %v4826_v12 = vmul.f32 0.35355338, %v8273_v10 }
0x13cf   :  { %v4816_v25 = vpop.f32.mrf.mxu0 }
0x13d0   :  { %v4825_v53 = vmul.f32 0.35355338, %v4816_v25  ;;  %v8242_v14 = vpop.f32.mrf.mxu1  ;;  %v4828_v54 = vadd.f32 %v9634_v23, %v4826_v12 }
0x13d2   :  { %v4355_v17 = vpop.f32.mrf.mxu1  ;;  %v4832_v18 = vsel %vm598_vm2, %v4828_v54, -inf  ;;  %v4827_v62 = vadd.f32 %v9641_v29, %v4825_v53 }
0x13d3   :  { %8245 = vmatprep.mubr.msk.f32.mxu1 %vm510_vm1, %v4355_v17  ;;  %4833 = vmax.xlane.f32.xlu0 %v4832_v18 }
0x13d4   :  { %8246 = vmatmul.mubr.msk.f32.vlgmr.msra.gmra.mxu1 %vm510_vm1, %v8242_v14  ;;  %v4829_v44 = vsel %vm598_vm2, %v4827_v62, -inf }
0x13d5   :  { %4830 = vmax.xlane.f32.xlu1 %v4829_v44 }
0x13d6   :  { %v4556_v19 = vpop.xlane.xlu0 %4555 }
0x13d7   :  { %8625 = vrcp.f32 %v4556_v19 }
0x13d8   :  { %v4559_v20 = vpop.xlane.xlu1 %4558 }
0x13d9   :  { %8627 = vrcp.f32 %v4559_v20 }
0x13da   :  { %v4567_v24 = vpop.permute.xlu0 %4566 }
0x13db   :  { %8255 = vmatprep.subr.mxu1 %v4567_v24 }
0x13dc   :  { %8256 = vmatpush3.msra.mxu1 %v4567_v24  ;;  %v4565_v23 = vpop.permute.xlu1 %4564 }
0x13dd   :  { %8257 = vmatprep.subr.mxu1 %v4565_v23 }
0x13de   :  { %8258 = vmatpush3.msra.mxu1 %v4565_v23  ;;  %v7172_v23 = vld [vmem:[%s10400_s12 + $0x180] sm:$0xff] }
0x13df   :  { %8262 = vmatprep.subr.mxu1 %v7151_v42 }
0x13e4   :  { %v8626_v26 = vpop.eup %8625 }
0x13e5   :  { %v4562_v29 = vmul.f32 %v8626_v26, %v8622_v6  ;;  %v7180_v26 = vld [vmem:[%s10400_s12 + $0x1c0] sm:$0xff] }
0x13e6   :  { %v8628_v33 = vpop.eup %8627 }
0x13e7   :  { %8259 = vmatprep.mubr.msk.f32.mxu1 %vm598_vm2, %v4562_v29  ;;  %v4563_v37 = vmul.f32 %v8628_v33, %v8624_v8  ;;  %v7173_v29 = vld [vmem:[%s10400_s12 + $0x188] sm:$0xff]  ;;  %v7502_v33 = vcombine.high %v7172_v23, %v7180_v26 }
0x13e9   :  { %8260 = vmatmul.mubr.msk.f32.vlgmr.msra.gmra.mxu1 %vm598_vm2, %v4563_v37  ;;  %v7181_v37 = vld [vmem:[%s10400_s12 + $0x1c8] sm:$0xff]  ;;  %5321 = vmatprep.subr.bf16.mxu0 %v7502_v33 }
0x13ea   :  { %8263 = vmatpush3.msra.mxu1 %v7151_v42  ;;  %v7501_v42 = vcombine.low %v7172_v23, %v7180_v26  ;;  %v7160_v23 = vld [vmem:[%s10400_s12 + $0x120] sm:$0xff]  ;;  %v7169_v33 = vld [vmem:[%s10400_s12 + $0x168] sm:$0xff] }
0x13eb   :  { %v7168_v26 = vld [vmem:[%s10400_s12 + $0x160] sm:$0xff] }
0x13ec   :  { %5322 = vmatpush1.bf16.msra.mxu0 %v7501_v42 }
0x145c   :  { %v4834_v43 = vpop.xlane.xlu0 %4833 }
0x145d   :  { %v4836_v27 = vsub.f32 %v4828_v54, %v4834_v43  ;;  %v7503_v43 = vcombine.low %v7173_v29, %v7181_v37 }
0x145e   :  { %v4831_v45 = vpop.xlane.xlu1 %4830 }
0x145f   :  { %v4839_v21 = vmul.f32 1.442695, %v4836_v27  ;;  %v4835_v41 = vsub.f32 %v4827_v62, %v4831_v45  ;;  %v7504_v27 = vcombine.high %v7173_v29, %v7181_v37  ;;  %v7156_v45 = vld [vmem:[%s10400_s12 + $0x100] sm:$0xff]  ;;  %v7161_v29 = vld [vmem:[%s10400_s12 + $0x128] sm:$0xff] }
0x1461   :  { %8629 = vpow2.f32 %v4839_v21  ;;  %v4837_v28 = vmul.f32 1.442695, %v4835_v41  ;;  %v7164_v21 = vld [vmem:[%s10400_s12 + $0x140] sm:$0xff]  ;;  %v7157_v41 = vld [vmem:[%s10400_s12 + $0x108] sm:$0xff] }
0x1463   :  { %8631 = vpow2.f32 %v4837_v28  ;;  %v7486_v28 = vcombine.high %v7156_v45, %v7164_v21 }
0x1465   :  { %5323 = vmatprep.subr.bf16.mxu0 %v7486_v28  ;;  %v7187_v28 = vld [vmem:[%s10400_s12 + $0x1f8] sm:$0xff] }
0x146e   :  { %v8630_v32 = vpop.eup %8629 }
0x146f   :  { %v4844_v46 = vsel %vm598_vm2, %v8630_v32, 0.0 }
0x1470   :  { %v8632_v4 = vpop.eup %8631  ;;  %4845 = vadd.xlane.f32.xlu1 %v4844_v46  ;;  %v7485_v46 = vcombine.low %v7156_v45, %v7164_v21  ;;  %v7178_v45 = vld [vmem:[%s10400_s12 + $0x1b0] sm:$0xff] }
0x1471   :  { %v4841_v51 = vsel %vm598_vm2, %v8632_v4, 0.0  ;;  %v7186_v21 = vld [vmem:[%s10400_s12 + $0x1f0] sm:$0xff] }
0x1472   :  { %4842 = vadd.xlane.f32.xlu0 %v4841_v51  ;;  %5324 = vmatpush1.bf16.msra.mxu0 %v7485_v46  ;;  %v7495_v46 = vcombine.low %v7161_v29, %v7169_v33 }
0x1481   :  { %4851 = vrot.lane.b32.xlu1 %v9617_v16, %s10432_s6 }
0x1488   :  { %4853 = vrot.lane.b32.xlu0 %v9615_v34, %s10432_s6 }
0x1494   :  { %v8247_v47 = vpop.f32.mrf.mxu1 }
0x1495   :  { %v4446_v56 = vadd.f32 %v8247_v47, %v9707_v40  ;;  %v7182_v47 = vld [vmem:[%s10400_s12 + $0x1d0] sm:$0xff] }
0x1496   :  { %v4436_v50 = vpop.f32.mrf.mxu1 }
0x1497   :  { %v4445_v57 = vadd.f32 %v4436_v50, %v4158_v55  ;;  %v7175_v55 = vld [vmem:[%s10400_s12 + $0x198] sm:$0xff] }
0x1498   :  { %v7183_v50 = vld [vmem:[%s10400_s12 + $0x1d8] sm:$0xff] }
0x14a9   :  { %v8261_v49 = vpop.f32.mrf.mxu1 }
0x14ab   :  { %v4642_v58 = vpop.f32.mrf.mxu1 }
0x14ac   :  { %8264 = vmatprep.mubr.msk.f32.mxu1 %vm510_vm1, %v4642_v58  ;;  %v7508_v58 = vcombine.high %v7175_v55, %v7183_v50 }
0x14ad   :  { %8265 = vmatmul.mubr.msk.f32.vlgmr.msra.gmra.mxu1 %vm510_vm1, %v8261_v49  ;;  %v7507_v49 = vcombine.low %v7175_v55, %v7183_v50  ;;  %v7163_v55 = vld [vmem:[%s10400_s12 + $0x138] sm:$0xff]  ;;  %v7513_v50 = vcombine.low %v7178_v45, %v7186_v21 }
0x14f9   :  { %v4846_v48 = vpop.xlane.xlu1 %4845 }
0x14fa   :  { %8633 = vrcp.f32 %v4846_v48 }
0x14fb   :  { %v4843_v16 = vpop.xlane.xlu0 %4842 }
0x14fc   :  { %8635 = vrcp.f32 %v4843_v16 }
0x14fd   :  { %v4852_v59 = vpop.permute.xlu1 %4851 }
0x14ff   :  { %v4854_v34 = vpop.permute.xlu0 %4853 }
0x1500   :  { %8274 = vmatprep.subr.mxu1 %v4854_v34 }
0x1501   :  { %8275 = vmatpush3.msra.mxu1 %v4854_v34 }
0x1502   :  { %8276 = vmatprep.subr.mxu1 %v4852_v59 }
0x1503   :  { %8277 = vmatpush3.msra.mxu1 %v4852_v59 }
0x1504   :  { %8281 = vmatprep.subr.mxu1 %v7152_v35 }
0x1507   :  { %v8634_v13 = vpop.eup %8633 }
0x1508   :  { %v4850_v60 = vmul.f32 %v8634_v13, %v8630_v32  ;;  %v7165_v32 = vld [vmem:[%s10400_s12 + $0x148] sm:$0xff] }
0x1509   :  { %v8636_v30 = vpop.eup %8635  ;;  %v7488_v51 = vcombine.high %v7157_v41, %v7165_v32 }
0x150a   :  { %v4849_v40 = vmul.f32 %v8636_v30, %v8632_v4  ;;  %v7487_v4 = vcombine.low %v7157_v41, %v7165_v32  ;;  %v7179_v41 = vld [vmem:[%s10400_s12 + $0x1b8] sm:$0xff]  ;;  %v7493_v32 = vcombine.low %v7160_v23, %v7168_v26 }
0x150c   :  { %8278 = vmatprep.mubr.msk.f32.mxu1 %vm598_vm2, %v4849_v40 }
0x150d   :  { %8279 = vmatmul.mubr.msk.f32.vlgmr.msra.gmra.mxu1 %vm598_vm2, %v4850_v60  ;;  %v7483_v60 = vld [vmem:[%s10402_s10 + $0x1] ss:$0 sm:$0xff] }
0x150e   :  { %8282 = vmatpush3.msra.mxu1 %v7152_v35 }
0x150f   :  { %5364 = vmatprep.subr.bf16.mxu1 %v7504_v27  ;;  %v7496_v27 = vcombine.high %v7161_v29, %v7169_v33  ;;  %v8467_v29 = vld [vmem:[%s10401_s14 + $0x400] sm:$0xff]  }
0x1510   :  { %v8468_v33 = vld [vmem:[%s10401_s14 + $0x480] sm:$0xff]  }
0x156d   :  { %v8266_v61 = vpop.f32.mrf.mxu1 }
0x156e   :  { %v4733_v36 = vadd.f32 %v8266_v61, %v4446_v56  ;;  %v7506_v56 = vcombine.high %v7174_v52, %v7182_v47 }
0x156f   :  { %v4723_v5 = vpop.f32.mrf.mxu1 }
0x1570   :  { %v4732_v39 = vadd.f32 %v4723_v5, %v4445_v57  ;;  %v7505_v57 = vcombine.low %v7174_v52, %v7182_v47  ;;  %5407 = vmatprep.subr.bf16.mxu0 %v7506_v56  ;;  %v7162_v52 = vld [vmem:[%s10400_s12 + $0x130] sm:$0xff]  ;;  %v7171_v56 = vld [vmem:[%s10400_s12 + $0x178] sm:$0xff] }
0x1571   :  { %v7170_v47 = vld [vmem:[%s10400_s12 + $0x170] sm:$0xff] }
0x15cd   :  { %v8280_v6 = vpop.f32.mrf.mxu1 }
0x15cf   :  { %v4929_v7 = vpop.f32.mrf.mxu1 }
0x15d0   :  { %8283 = vmatprep.mubr.msk.f32.mxu1 %vm510_vm1, %v4929_v7 }
0x15d1   :  { %8284 = vmatmul.mubr.msk.f32.vlgmr.msra.gmra.mxu1 %vm510_vm1, %v8280_v6  ;;  %v7484_v6 = vld [vmem:[%s10403_s11 + $0x1] ss:$0 sm:$0xff] }
0x15d2   :  { %5384 = vmatprep.mubr.bf16.mxu1 %v8651_v0  ;;  %5365 = vmatpush1.bf16.msra.mxu1 %v7503_v43  ;;  %v7494_v43 = vcombine.high %v7160_v23, %v7168_v26  ;;  %v8465_v23 = vld [vmem:[%s10401_s14 + $0x440] sm:$0xff]  }
0x15d3   :  { %5366 = vmatprep.subr.bf16.mxu1 %v7488_v51  ;;  %v7516_v51 = vcombine.high %v7179_v41, %v7187_v28  ;;  %v8466_v26 = vld [vmem:[%s10401_s14 + $0x4c0] sm:$0xff]  }
0x15d6   :  { %5367 = vmatpush1.bf16.msra.mxu1 %v7487_v4  ;;  %v7514_v4 = vcombine.high %v7178_v45, %v7186_v21 }
0x15d7   :  { %5450 = vmatprep.subr.bf16.mxu1 %v7508_v58  ;;  %v7500_v58 = vcombine.high %v7163_v55, %v7171_v56 }
0x1691   :  { %v8285_v8 = vpop.f32.mrf.mxu1 }
0x1692   :  { %v5020_v9 = vadd.f32 %v8285_v8, %v4733_v36  ;;  %v7158_v8 = vld [vmem:[%s10400_s12 + $0x110] sm:$0xff] }
0x1693   :  { %v5010_v10 = vpop.f32.mrf.mxu1 }
0x1694   :  { %v5019_v11 = vadd.f32 %v5010_v10, %v4732_v39  ;;  %v5024_v12 = vsel %vm414_vm0, %v5020_v9, 0.0  ;;  %v7166_v39 = vld [vmem:[%s10400_s12 + $0x150] sm:$0xff]  ;;  %v7167_v10 = vld [vmem:[%s10400_s12 + $0x158] sm:$0xff] }
0x1695   :  { %5025 = vadd.xlane.f32.xlu0 %v5024_v12 }
0x1696   :  { %v5021_v25 = vsel %vm414_vm0, %v5019_v11, 0.0 }
0x1697   :  { %5022 = vadd.xlane.f32.xlu1 %v5021_v25 }
0x171e   :  { %v5026_v53 = vpop.xlane.xlu0 %5025 }
0x171f   :  { %v5028_v14 = vmul.f32 0.03125, %v5026_v53  ;;  %v7490_v53 = vcombine.high %v7158_v8, %v7166_v39 }
0x1720   :  { %v5023_v54 = vpop.xlane.xlu1 %5022 }
0x1721   :  { %v5030_v17 = vsub.f32 %v5020_v9, %v5028_v14  ;;  %v5027_v18 = vmul.f32 0.03125, %v5023_v54  ;;  %v7159_v9 = vld [vmem:[%s10400_s12 + $0x118] sm:$0xff]  ;;  %v7176_v54 = vld [vmem:[%s10400_s12 + $0x1a0] sm:$0xff] }
0x1722   :  { %v7492_v14 = vcombine.high %v7159_v9, %v7167_v10 }
0x1723   :  { %v5029_v62 = vsub.f32 %v5019_v11, %v5027_v18  ;;  %v5032_v44 = vmul.f32 %v5030_v17, %v5030_v17  ;;  %v7177_v18 = vld [vmem:[%s10400_s12 + $0x1a8] sm:$0xff] }
0x1725   :  { %v5036_v19 = vsel %vm414_vm0, %v5032_v44, 0.0  ;;  %v5031_v20 = vmul.f32 %v5029_v62, %v5029_v62  ;;  %v7489_v44 = vcombine.low %v7158_v8, %v7166_v39  ;;  %v8450_v8 = vld [vmem:[%s10401_s14 + $0x4e0] sm:$0xff]  }
0x1726   :  { %5037 = vadd.xlane.f32.xlu1 %v5036_v19  ;;  %v7491_v19 = vcombine.low %v7159_v9, %v7167_v10  ;;  %v8451_v39 = vld [vmem:[%s10401_s14 + $0x420] sm:$0xff]   ;;  %v8453_v10 = vld [vmem:[%s10401_s14 + $0x458] sm:$0xff]  }
0x1727   :  { %v5033_v24 = vsel %vm414_vm0, %v5031_v20, 0.0  ;;  %v8452_v9 = vld [vmem:[%s10401_s14 + $0x4a0] sm:$0xff]  }
0x1728   :  { %5034 = vadd.xlane.f32.xlu0 %v5033_v24 }
0x17af   :  { %v5038_v48 = vpop.xlane.xlu1 %5037 }
0x17b0   :  { %v5040_v16 = vmul.f32 0.03125, %v5038_v48  ;;  %v7497_v48 = vcombine.low %v7162_v52, %v7170_v47 }
0x17b1   :  { %v5035_v34 = vpop.xlane.xlu0 %5034 }
0x17b2   :  { %v5042_v59 = vadd.f32 1e-05, %v5040_v16  ;;  %v5039_v13 = vmul.f32 0.03125, %v5035_v34  ;;  %v7499_v16 = vcombine.low %v7163_v55, %v7171_v56  ;;  %v8437_v34 = vld [vmem:[%s10401_s14 + $0x478] sm:$0xff]  }
0x17b4   :  { %8637 = vrsqrt.f32 %v5042_v59  ;;  %v5041_v30 = vadd.f32 1e-05, %v5039_v13  ;;  %v8438_v59 = vld [vmem:[%s10401_s14 + $0x4f8] sm:$0xff]  }
0x17b5   :  { %v8439_v13 = vld [vmem:[%s10401_s14 + $0x438] sm:$0xff]  }
0x17b6   :  { %8639 = vrsqrt.f32 %v5041_v30  ;;  %v8440_v30 = vld [vmem:[%s10401_s14 + $0x4b8] sm:$0xff]  }
0x17c1   :  { %v8638_v40 = vpop.eup %8637 }
0x17c2   :  { %v5046_v35 = vmul.f32 %v8638_v40, %v5030_v17  ;;  %v7184_v17 = vld [vmem:[%s10400_s12 + $0x1e0] sm:$0xff]  ;;  %v8441_v40 = vld [vmem:[%s10401_s14 + $0x470] sm:$0xff]  }
0x17c3   :  { %v8640_v61 = vpop.eup %8639  ;;  %v7510_v20 = vcombine.high %v7176_v54, %v7184_v17  ;;  %v7509_v37 = vcombine.low %v7176_v54, %v7184_v17  ;;  %v8457_v54 = vld [vmem:[%s10401_s14 + $0x450] sm:$0xff]  }
0x17c4   :  { %v5054_v36 = vmul.f32 %v7483_v60, %v5046_v35  ;;  %v5045_v5 = vmul.f32 %v8640_v61, %v5029_v62  ;;  %v7185_v62 = vld [vmem:[%s10400_s12 + $0x1e8] sm:$0xff]  ;;  %v8444_v35 = vld [vmem:[%s10401_s14 + $0x4b0] sm:$0xff]  }
0x17c5   :  { %v7512_v24 = vcombine.high %v7177_v18, %v7185_v62  ;;  %v7511_v42 = vcombine.low %v7177_v18, %v7185_v62  ;;  %v8445_v61 = vld [vmem:[%s10401_s14 + $0x468] sm:$0xff]   ;;  %v8458_v17 = vld [vmem:[%s10401_s14 + $0x4d0] sm:$0xff]  }
0x17c6   :  { %v5053_v7 = vmul.f32 %v7483_v60, %v5045_v5  ;;  %v9823_v11 = vadd.f32 %v7484_v6, %v5054_v36  ;;  %v8443_v60 = vld [vmem:[%s10401_s14 + $0x430] sm:$0xff]   ;;  %v8446_v36 = vld [vmem:[%s10401_s14 + $0x4e8] sm:$0xff]  }
0x17c7   :  { %v8447_v5 = vld [vmem:[%s10401_s14 + $0x428] sm:$0xff]   ;;  %v8459_v18 = vld [vmem:[%s10401_s14 + $0x410] sm:$0xff]  }
0x17c8   :  { %v9825_v12 = vadd.f32 %v7484_v6, %v5053_v7  ;;  %v8448_v6 = vld [vmem:[%s10401_s14 + $0x4a8] sm:$0xff]   ;;  %v8449_v7 = vld [vmem:[%s10401_s14 + $0x460] sm:$0xff]   ;;  %v8460_v62 = vld [vmem:[%s10401_s14 + $0x490] sm:$0xff]  }
0x17ca   :  { %v9829_v25 = vpack.c.bf16 %v9823_v11, %v9825_v12 }
0x17cc   :  { %7517 = vmatmul.mubr.msk.bf16.vlgmr.msra.gmra.mxu0 %vm414_vm0, %v9829_v25  ;;  %7518 = vmatmul.mubr.msk.bf16.vlgmr.msra.gmra.mxu1 %vm414_vm0, %v9829_v25 }
0x17cd   :  { %5408 = vmatpush1.bf16.msra.mxu0 %v7505_v57  ;;  %5451 = vmatpush1.bf16.msra.mxu1 %v7507_v49  ;;  %v7515_v57 = vcombine.low %v7179_v41, %v7187_v28  ;;  %v7498_v49 = vcombine.high %v7162_v52, %v7170_v47 }
0x17ce   :  { %5409 = vmatprep.subr.bf16.mxu0 %v7490_v53  ;;  %5452 = vmatprep.subr.bf16.mxu1 %v7492_v14  ;;  %v8455_v53 = vld [vmem:[%s10401_s14 + $0x418] sm:$0xff]  }
0x17cf   :  { %5427 = vmatprep.mubr.bf16.mxu0 %v8651_v0  ;;  %5470 = vmatprep.mubr.bf16.mxu1 %v8651_v0  ;;  %v8456_v14 = vld [vmem:[%s10401_s14 + $0x498] sm:$0xff]  }
0x17d1   :  { %5410 = vmatpush1.bf16.msra.mxu0 %v7489_v44  ;;  %5453 = vmatpush1.bf16.msra.mxu1 %v7491_v19  ;;  %v8461_v44 = vld [vmem:[%s10401_s14 + $0x448] sm:$0xff]  }
0x17d2   :  { %5493 = vmatprep.subr.bf16.mxu0 %v7510_v20  ;;  %5536 = vmatprep.subr.bf16.mxu1 %v7512_v24  ;;  %v8462_v19 = vld [vmem:[%s10401_s14 + $0x4c8] sm:$0xff]  }
0x17d3   :  { %v8463_v20 = vld [vmem:[%s10401_s14 + $0x408] sm:$0xff]  }
0x17d4   :  { %7519 = vmatmul.mubr.msk.bf16.vlgmr.msra.gmra.mxu0 %vm414_vm0, %v9829_v25  ;;  %7520 = vmatmul.mubr.msk.bf16.vlgmr.msra.gmra.mxu1 %vm414_vm0, %v9829_v25  ;;  %v8464_v24 = vld [vmem:[%s10401_s14 + $0x488] sm:$0xff]  }
0x17d5   :  { %5494 = vmatpush1.bf16.msra.mxu0 %v7509_v37  ;;  %5537 = vmatpush1.bf16.msra.mxu1 %v7511_v42  ;;  %v8469_v37 = vld [vmem:[%s10401_s14 + $0x578] sm:$0xff]  }
0x17d6   :  { %5495 = vmatprep.subr.bf16.mxu0 %v7494_v43  ;;  %5538 = vmatprep.subr.bf16.mxu1 %v7496_v27  ;;  %v8470_v42 = vld [vmem:[%s10401_s14 + $0x5f8] sm:$0xff]   ;;  %v10006_v43 = vld [vmem:[%s10404_s13 + $0x10] sm:$0xff] }
0x17d7   :  { %5513 = vmatprep.mubr.bf16.mxu0 %v8651_v0  ;;  %5556 = vmatprep.mubr.bf16.mxu1 %v8651_v0  ;;  %v5073_v21 = vrot.slane %v10006_v43, %v9194_v63  ;;  %v5081_v41 = vrot.slane %v10006_v43, %v9197_v1  ;;  %v5069_v28 = vrot.slane %v10006_v43, %v9200_v2 }
0x17d9   :  { %5496 = vmatpush1.bf16.msra.mxu0 %v7493_v32  ;;  %5539 = vmatpush1.bf16.msra.mxu1 %v7495_v46  ;;  %v5077_v32 = vrot.slane %v10006_v43, %v9203_v3 }
0x17da   :  { %5579 = vmatprep.subr.bf16.mxu0 %v7514_v4  ;;  %5622 = vmatprep.subr.bf16.mxu1 %v7516_v51 }
0x17dc   :  { %7521 = vmatmul.mubr.msk.bf16.vlgmr.msra.gmra.mxu0 %vm414_vm0, %v9829_v25  ;;  %7522 = vmatmul.mubr.msk.bf16.vlgmr.msra.gmra.mxu1 %vm414_vm0, %v9829_v25 }
0x17dd   :  { %5580 = vmatpush1.bf16.msra.mxu0 %v7513_v50  ;;  %5623 = vmatpush1.bf16.msra.mxu1 %v7515_v57 }
0x17de   :  { %5581 = vmatprep.subr.bf16.mxu0 %v7498_v49  ;;  %5624 = vmatprep.subr.bf16.mxu1 %v7500_v58 }
0x17df   :  { %5599 = vmatprep.mubr.bf16.mxu0 %v8651_v0  ;;  %5642 = vmatprep.mubr.bf16.mxu1 %v8651_v0  ;;  %v8442_v0 = vld [vmem:[%s10401_s14 + $0x4f0] sm:$0xff]  }
0x17e1   :  { %5582 = vmatpush1.bf16.msra.mxu0 %v7497_v48  ;;  %5625 = vmatpush1.bf16.msra.mxu1 %v7499_v16 }
0x17e2   :  { %7933 = vmatprep.subr.bf16.mxu0 %v8437_v34  ;;  %7955 = vmatprep.subr.bf16.mxu1 %v8438_v59 }
0x17e4   :  { %7523 = vmatmul.mubr.msk.bf16.vlgmr.msra.gmra.mxu0 %vm414_vm0, %v9829_v25  ;;  %7524 = vmatmul.mubr.msk.bf16.vlgmr.msra.gmra.mxu1 %vm414_vm0, %v9829_v25  ;;  %v8454_v25 = vld [vmem:[%s10401_s14 + $0x4d8] sm:$0xff]  }
0x17e5   :  { %7934 = vmatpush3.bf16.msra.mxu0 %v8439_v13  ;;  %7956 = vmatpush3.bf16.msra.mxu1 %v8440_v30 }
0x17e6   :  { %7935 = vmatprep.subr.bf16.mxu0 %v8441_v40  ;;  %7957 = vmatprep.subr.bf16.mxu1 %v8442_v0  ;;  %v5089_v0 = vrot.slane %v10006_v43, %v9219_v31 }
0x17e9   :  { %7936 = vmatpush3.bf16.msra.mxu0 %v8443_v60  ;;  %7958 = vmatpush3.bf16.msra.mxu1 %v8444_v35  ;;  %v5097_v60 = vrot.slane %v10006_v43, %v9222_v15 }
0x17ea   :  { %7937 = vmatprep.subr.bf16.mxu0 %v8445_v61  ;;  %7959 = vmatprep.subr.bf16.mxu1 %v8446_v36 }
0x17ed   :  { %7938 = vmatpush3.bf16.msra.mxu0 %v8447_v5  ;;  %7960 = vmatpush3.bf16.msra.mxu1 %v8448_v6 }
0x17ee   :  { %7939 = vmatprep.subr.bf16.mxu0 %v8449_v7  ;;  %7961 = vmatprep.subr.bf16.mxu1 %v8450_v8 }
0x17f1   :  { %7940 = vmatpush3.bf16.msra.mxu0 %v8451_v39  ;;  %7962 = vmatpush3.bf16.msra.mxu1 %v8452_v9 }
0x17f2   :  { %7941 = vmatprep.subr.bf16.mxu0 %v8453_v10  ;;  %7963 = vmatprep.subr.bf16.mxu1 %v8454_v25  ;;  %v8471_v25 = vld [vmem:[%s10401_s14 + $0x538] sm:$0xff]  }
0x17f5   :  { %7942 = vmatpush3.bf16.msra.mxu0 %v8455_v53  ;;  %7964 = vmatpush3.bf16.msra.mxu1 %v8456_v14  ;;  %v8472_v53 = vld [vmem:[%s10401_s14 + $0x5b8] sm:$0xff]  }
0x17f6   :  { %7943 = vmatprep.subr.bf16.mxu0 %v8457_v54  ;;  %7965 = vmatprep.subr.bf16.mxu1 %v8458_v17 }
0x17f9   :  { %7944 = vmatpush3.bf16.msra.mxu0 %v8459_v18  ;;  %7966 = vmatpush3.bf16.msra.mxu1 %v8460_v62  ;;  %v8473_v62 = vld [vmem:[%s10401_s14 + $0x570] sm:$0xff]  }
0x17fa   :  { %7945 = vmatprep.subr.bf16.mxu0 %v8461_v44  ;;  %7967 = vmatprep.subr.bf16.mxu1 %v8462_v19  ;;  %v8474_v44 = vld [vmem:[%s10401_s14 + $0x5f0] sm:$0xff]  }
0x17fd   :  { %7946 = vmatpush3.bf16.msra.mxu0 %v8463_v20  ;;  %7968 = vmatpush3.bf16.msra.mxu1 %v8464_v24 }
0x17fe   :  { %7947 = vmatprep.subr.bf16.mxu0 %v8465_v23  ;;  %7969 = vmatprep.subr.bf16.mxu1 %v8466_v26 }
0x1801   :  { %7948 = vmatpush3.bf16.msra.mxu0 %v8467_v29  ;;  %7970 = vmatpush3.bf16.msra.mxu1 %v8468_v33  ;;  %v8475_v33 = vld [vmem:[%s10401_s14 + $0x530] sm:$0xff]  }
0x1802   :  { %7977 = vmatprep.subr.bf16.mxu0 %v8469_v37  ;;  %7999 = vmatprep.subr.bf16.mxu1 %v8470_v42  ;;  %v8476_v37 = vld [vmem:[%s10401_s14 + $0x5b0] sm:$0xff]   ;;  %v8477_v42 = vld [vmem:[%s10401_s14 + $0x568] sm:$0xff]  }
0x188c   :  { %v5343_v27 = vpop.f32.mrf.mxu0  ;;  %v5386_v45 = vpop.f32.mrf.mxu1 }
0x188d   :  { %v5344_v57 = vadd.f32 %v5343_v27, %v5069_v28  ;;  %v5387_v49 = vadd.f32 %v5386_v45, %v5077_v32 }
0x188e   :  { %v5345_v46 = vpop.f32.mrf.mxu0  ;;  %v5388_v4 = vpop.f32.mrf.mxu1 }
0x188f   :  { %v5346_v47 = vadd.f32 %v5345_v46, %v5073_v21  ;;  %v5389_v55 = vadd.f32 %v5388_v4, %v5081_v41  ;;  %v5653_v6 = vmax.f32 %v5344_v57, 0.0  ;;  %v5655_v7 = vmax.f32 %v5387_v49, 0.0  ;;  %v8479_v4 = vld [vmem:[%s10401_s14 + $0x528] sm:$0xff]   ;;  %v8484_v57 = vld [vmem:[%s10401_s14 + $0x5a0] sm:$0xff]   ;;  %v8485_v49 = vld [vmem:[%s10401_s14 + $0x558] sm:$0xff]  }
0x1890   :  { %v5347_v51 = vpop.f32.mrf.mxu0  ;;  %v5390_v52 = vpop.f32.mrf.mxu1 }
0x1891   :  { %v5348_v56 = vadd.f32 %v5347_v51, %v5069_v28  ;;  %v5391_v50 = vadd.f32 %v5390_v52, %v5077_v32  ;;  %v5654_v35 = vmax.f32 %v5346_v47, 0.0  ;;  %v5656_v61 = vmax.f32 %v5389_v55, 0.0  ;;  %v8478_v28 = vld [vmem:[%s10401_s14 + $0x5e8] sm:$0xff]   ;;  %v8481_v52 = vld [vmem:[%s10401_s14 + $0x560] sm:$0xff]  }
0x1892   :  { %v5349_v58 = vpop.f32.mrf.mxu0  ;;  %v5392_v48 = vpop.f32.mrf.mxu1  ;;  %v8480_v51 = vld [vmem:[%s10401_s14 + $0x5a8] sm:$0xff]   ;;  %v8482_v47 = vld [vmem:[%s10401_s14 + $0x5e0] sm:$0xff]  }
0x1893   :  { %v5350_v16 = vadd.f32 %v5349_v58, %v5073_v21  ;;  %v5393_v34 = vadd.f32 %v5392_v48, %v5081_v41  ;;  %v5669_v59 = vmax.f32 %v5348_v56, 0.0  ;;  %v5671_v13 = vmax.f32 %v5391_v50, 0.0  ;;  %v8483_v56 = vld [vmem:[%s10401_s14 + $0x520] sm:$0xff]   ;;  %v8486_v58 = vld [vmem:[%s10401_s14 + $0x5d8] sm:$0xff]  }
0x1894   :  { %v10016_v30 = vpop.f32.mrf.mxu0  ;;  %v10018_v40 = vpop.f32.mrf.mxu1 }
0x1895   :  { %v5670_v36 = vmax.f32 %v5350_v16, 0.0  ;;  %v5672_v5 = vmax.f32 %v5393_v34, 0.0  ;;  %v5685_v14 = vpack.c.bf16 %v5669_v59, %v5653_v6  ;;  %v5687_v54 = vpack.c.bf16 %v5671_v13, %v5655_v7  ;;  %v8487_v16 = vld [vmem:[%s10401_s14 + $0x518] sm:$0xff]   ;;  %v8489_v13 = vld [vmem:[%s10401_s14 + $0x550] sm:$0xff]   ;;  %v8494_v6 = vld [vmem:[%s10401_s14 + $0x5c8] sm:$0xff]  }
0x1896   :  { %v5431_v8 = vpop.f32.mrf.mxu0  ;;  %v5474_v39 = vpop.f32.mrf.mxu1  ;;  %v8488_v59 = vld [vmem:[%s10401_s14 + $0x598] sm:$0xff]   ;;  %v5085_v7 = vrot.slane %v10006_v43, %v9301_v38 }
0x1897   :  { %v5686_v9 = vpack.c.bf16 %v5670_v36, %v5654_v35  ;;  %v5688_v10 = vpack.c.bf16 %v5672_v5, %v5656_v61  ;;  %v5432_v19 = vadd.f32 %v5431_v8, %v5089_v0  ;;  %v5475_v20 = vadd.f32 %v5474_v39, %v5097_v60  ;;  %v8491_v35 = vld [vmem:[%s10401_s14 + $0x510] sm:$0xff]   ;;  %v8493_v5 = vld [vmem:[%s10401_s14 + $0x548] sm:$0xff]   ;;  %v10115_v39 = vld [vmem:[%s10404_s13 + $0x18] sm:$0xff] }
0x1898   :  { %v10030_v17 = vpop.f32.mrf.mxu0  ;;  %v10032_v18 = vpop.f32.mrf.mxu1  ;;  %v8492_v36 = vld [vmem:[%s10401_s14 + $0x590] sm:$0xff]   ;;  %v5093_v8 = vrot.slane %v10006_v43, %v9304_v22  ;;  %v8496_v43 = vld [vmem:[%s10401_s14 + $0x588] sm:$0xff]  }
0x1899   :  { %6507 = vmatprep.mubr.bf16.mxu0 %v5686_v9  ;;  %6548 = vmatprep.mubr.bf16.mxu1 %v5688_v10  ;;  %v5658_v27 = vmax.f32 %v5432_v19, 0.0  ;;  %v5660_v45 = vmax.f32 %v5475_v20, 0.0  ;;  %v8495_v10 = vld [vmem:[%s10401_s14 + $0x508] sm:$0xff]  }
0x189a   :  { %v5435_v24 = vpop.f32.mrf.mxu0  ;;  %v5478_v23 = vpop.f32.mrf.mxu1  ;;  %6508 = vmatmul.mubr.bf16.vlgmr.msra.gmra.mxu0 %v5685_v14  ;;  %6549 = vmatmul.mubr.bf16.vlgmr.msra.gmra.mxu1 %v5687_v54  ;;  %v8497_v54 = vld [vmem:[%s10401_s14 + $0x540] sm:$0xff]   ;;  %v5473_v20 = vadd.f32 %v10018_v40, %v5093_v8 }
0x189b   :  { %v5436_v26 = vadd.f32 %v5435_v24, %v5089_v0  ;;  %v5479_v29 = vadd.f32 %v5478_v23, %v5097_v60  ;;  %7978 = vmatpush3.bf16.msra.mxu0 %v8471_v25  ;;  %8000 = vmatpush3.bf16.msra.mxu1 %v8472_v53  ;;  %v8490_v0 = vld [vmem:[%s10401_s14 + $0x5d0] sm:$0xff]   ;;  %v5434_v25 = vadd.f32 %v10030_v17, %v5085_v7  ;;  %v8499_v23 = vld [vmem:[%s10401_s14 + $0x500] sm:$0xff]  }
0x189c   :  { %7979 = vmatprep.subr.bf16.mxu0 %v8473_v62  ;;  %8001 = vmatprep.subr.bf16.mxu1 %v8474_v44  ;;  %v10064_v55 = vpop.f32.mrf.mxu0  ;;  %v10069_v50 = vpop.f32.mrf.mxu1  ;;  %v5105_v53 = vrot.slane %v10115_v39, %v9194_v63  ;;  %v5477_v62 = vadd.f32 %v10032_v18, %v5093_v8  ;;  %v5113_v44 = vrot.slane %v10115_v39, %v9197_v1  ;;  %v8498_v63 = vld [vmem:[%s10401_s14 + $0x5c0] sm:$0xff]  }
0x189d   :  { %v5674_v21 = vmax.f32 %v5436_v26, 0.0  ;;  %v5676_v41 = vmax.f32 %v5479_v29, 0.0  ;;  %v5430_v17 = vadd.f32 %v10016_v30, %v5085_v7  ;;  %v5673_v18 = vmax.f32 %v5434_v25, 0.0  ;;  %v8500_v1 = vld [vmem:[%s10401_s14 + $0x580] sm:$0xff]   ;;  %v8501_v30 = vld [vmem:[%s10401_s14 + $0x678] sm:$0xff]  }
0x189e   :  { %v5517_v48 = vpop.f32.mrf.mxu0  ;;  %v5560_v34 = vpop.f32.mrf.mxu1  ;;  %v5675_v29 = vmax.f32 %v5477_v62, 0.0  ;;  %v8518_v7 = vld [vmem:[%s10401_s14 + $0x6d8] sm:$0xff]  }
0x189f   :  { %v5690_v32 = vpack.c.bf16 %v5674_v21, %v5658_v27  ;;  %v5692_v46 = vpack.c.bf16 %v5676_v41, %v5660_v45  ;;  %7980 = vmatpush3.bf16.msra.mxu0 %v8475_v33  ;;  %8002 = vmatpush3.bf16.msra.mxu1 %v8476_v37  ;;  %v5518_v26 = vadd.f32 %v5517_v48, %v5105_v53  ;;  %v8502_v33 = vld [vmem:[%s10401_s14 + $0x6f8] sm:$0xff]   ;;  %v5657_v37 = vmax.f32 %v5430_v17, 0.0  ;;  %v8510_v48 = vld [vmem:[%s10401_s14 + $0x6e8] sm:$0xff]  }
0x18a0   :  { %7981 = vmatprep.subr.bf16.mxu0 %v8477_v42  ;;  %8003 = vmatprep.subr.bf16.mxu1 %v8478_v28  ;;  %v10092_v60 = vpop.f32.mrf.mxu0  ;;  %v10097_v61 = vpop.f32.mrf.mxu1  ;;  %v5561_v40 = vadd.f32 %v5560_v34, %v5113_v44  ;;  %v5659_v27 = vmax.f32 %v5473_v20, 0.0  ;;  %v8503_v21 = vld [vmem:[%s10401_s14 + $0x638] sm:$0xff]   ;;  %v8512_v34 = vld [vmem:[%s10401_s14 + $0x6a8] sm:$0xff]   ;;  %v5109_v20 = vrot.slane %v10115_v39, %v9203_v3  ;;  %v8529_v3 = vld [vmem:[%s10401_s14 + $0x640] sm:$0xff]  }
0x18a1   :  { %6589 = vmatprep.mubr.bf16.mxu0 %v5690_v32  ;;  %6630 = vmatprep.mubr.bf16.mxu1 %v5692_v46  ;;  %v5689_v41 = vpack.c.bf16 %v5673_v18, %v5657_v37  ;;  %v5662_v28 = vmax.f32 %v5518_v26, 0.0  ;;  %v8504_v32 = vld [vmem:[%s10401_s14 + $0x6b8] sm:$0xff]   ;;  %v8526_v17 = vld [vmem:[%s10401_s14 + $0x6c8] sm:$0xff]   ;;  %v5121_v26 = vrot.slane %v10115_v39, %v9219_v31  ;;  %v8530_v31 = vld [vmem:[%s10401_s14 + $0x6c0] sm:$0xff]  }
0x18a2   :  { %v5521_v9 = vpop.f32.mrf.mxu0  ;;  %v5564_v14 = vpop.f32.mrf.mxu1  ;;  %v5691_v46 = vpack.c.bf16 %v5675_v29, %v5659_v27  ;;  %v8520_v25 = vld [vmem:[%s10401_s14 + $0x698] sm:$0xff]   ;;  %v5129_v29 = vrot.slane %v10115_v39, %v9222_v15  ;;  %v8532_v15 = vld [vmem:[%s10401_s14 + $0x680] sm:$0xff]  }
0x18a3   :  { %7982 = vmatpush3.bf16.msra.mxu0 %v8479_v4  ;;  %8004 = vmatpush3.bf16.msra.mxu1 %v8480_v51  ;;  %v5522_v19 = vadd.f32 %v5521_v9, %v5105_v53  ;;  %v5565_v24 = vadd.f32 %v5564_v14, %v5113_v44  ;;  %v5664_v4 = vmax.f32 %v5561_v40, 0.0  ;;  %v8505_v51 = vld [vmem:[%s10401_s14 + $0x670] sm:$0xff]   ;;  %v8519_v9 = vld [vmem:[%s10401_s14 + $0x618] sm:$0xff]  }
0x18a4   :  { %7983 = vmatprep.subr.bf16.mxu0 %v8481_v52  ;;  %8005 = vmatprep.subr.bf16.mxu1 %v8482_v47  ;;  %v8506_v47 = vld [vmem:[%s10401_s14 + $0x6f0] sm:$0xff]  }
0x18a5   :  { %v5678_v42 = vmax.f32 %v5522_v19, 0.0  ;;  %v5680_v45 = vmax.f32 %v5565_v24, 0.0  ;;  %v8521_v53 = vld [vmem:[%s10401_s14 + $0x650] sm:$0xff]   ;;  %v5101_v19 = vrot.slane %v10115_v39, %v9200_v2  ;;  %v8528_v2 = vld [vmem:[%s10401_s14 + $0x688] sm:$0xff]  }
0x18a6   :  { %v8522_v14 = vld [vmem:[%s10401_s14 + $0x6d0] sm:$0xff]  }
0x18a7   :  { %7984 = vmatpush3.bf16.msra.mxu0 %v8483_v56  ;;  %8006 = vmatpush3.bf16.msra.mxu1 %v8484_v57  ;;  %v5694_v52 = vpack.c.bf16 %v5678_v42, %v5662_v28  ;;  %v5696_v56 = vpack.c.bf16 %v5680_v45, %v5664_v4  ;;  %v8507_v57 = vld [vmem:[%s10401_s14 + $0x630] sm:$0xff]   ;;  %v5520_v18 = vadd.f32 %v10092_v60, %v5101_v19  ;;  %v8531_v42 = vld [vmem:[%s10401_s14 + $0x600] sm:$0xff]   ;;  %v8535_v4 = vld [vmem:[%s10401_s14 + $0x738] sm:$0xff]  }
0x18a8   :  { %7985 = vmatprep.subr.bf16.mxu0 %v8485_v49  ;;  %8007 = vmatprep.subr.bf16.mxu1 %v8486_v58  ;;  %v8508_v49 = vld [vmem:[%s10401_s14 + $0x6b0] sm:$0xff]   ;;  %v8509_v58 = vld [vmem:[%s10401_s14 + $0x668] sm:$0xff]   ;;  %v5516_v60 = vadd.f32 %v10064_v55, %v5101_v19  ;;  %v8533_v55 = vld [vmem:[%s10401_s14 + $0x778] sm:$0xff]  }
0x18a9   :  { %v8524_v44 = vld [vmem:[%s10401_s14 + $0x690] sm:$0xff]  }
0x18aa   :  { %v8556_v19 = vld [vmem:[%s10401_s14 + $0x790] sm:$0xff]  }
0x18ab   :  { %7986 = vmatpush3.bf16.msra.mxu0 %v8487_v16  ;;  %8008 = vmatpush3.bf16.msra.mxu1 %v8488_v59  ;;  %v8511_v16 = vld [vmem:[%s10401_s14 + $0x628] sm:$0xff]   ;;  %v8513_v59 = vld [vmem:[%s10401_s14 + $0x660] sm:$0xff]  }
0x18ac   :  { %7987 = vmatprep.subr.bf16.mxu0 %v8489_v13  ;;  %8009 = vmatprep.subr.bf16.mxu1 %v8490_v0  ;;  %v8514_v13 = vld [vmem:[%s10401_s14 + $0x6e0] sm:$0xff]   ;;  %v10185_v0 = vpop.f32.mrf.mxu0 }
0x18ae   :  { %v5603_v8 = vpop.f32.mrf.mxu0 }
0x18af   :  { %7988 = vmatpush3.bf16.msra.mxu0 %v8491_v35  ;;  %8010 = vmatpush3.bf16.msra.mxu1 %v8492_v36  ;;  %v8515_v35 = vld [vmem:[%s10401_s14 + $0x620] sm:$0xff]   ;;  %v10190_v36 = vpop.f32.mrf.mxu1  ;;  %v5604_v27 = vadd.f32 %v5603_v8, %v5121_v26 }
0x18b0   :  { %7989 = vmatprep.subr.bf16.mxu0 %v8493_v5  ;;  %8011 = vmatprep.subr.bf16.mxu1 %v8494_v6  ;;  %v8516_v5 = vld [vmem:[%s10401_s14 + $0x6a0] sm:$0xff]   ;;  %v8517_v6 = vld [vmem:[%s10401_s14 + $0x658] sm:$0xff]  }
0x18b1   :  { %v8546_v8 = vld [vmem:[%s10401_s14 + $0x7e0] sm:$0xff]  }
0x18b3   :  { %7990 = vmatpush3.bf16.msra.mxu0 %v8495_v10  ;;  %8012 = vmatpush3.bf16.msra.mxu1 %v8496_v43  ;;  %v5646_v10 = vpop.f32.mrf.mxu1  ;;  %v10213_v43 = vpop.f32.mrf.mxu0 }
0x18b4   :  { %7991 = vmatprep.subr.bf16.mxu0 %v8497_v54  ;;  %8013 = vmatprep.subr.bf16.mxu1 %v8498_v63  ;;  %v8523_v54 = vld [vmem:[%s10401_s14 + $0x610] sm:$0xff]   ;;  %v8525_v63 = vld [vmem:[%s10401_s14 + $0x648] sm:$0xff]  }
0x18b5   :  { %v10218_v62 = vpop.f32.mrf.mxu1  ;;  %v5607_v24 = vpop.f32.mrf.mxu0 }
0x18b6   :  { %v5608_v40 = vadd.f32 %v5607_v24, %v5121_v26  ;;  %v8558_v24 = vld [vmem:[%s10401_s14 + $0x7c8] sm:$0xff]  }
0x18b7   :  { %7992 = vmatpush3.bf16.msra.mxu0 %v8499_v23  ;;  %8014 = vmatpush3.bf16.msra.mxu1 %v8500_v1  ;;  %v8527_v23 = vld [vmem:[%s10401_s14 + $0x608] sm:$0xff]   ;;  %v5650_v1 = vpop.f32.mrf.mxu1 }
0x18b8   :  { %8021 = vmatprep.subr.bf16.mxu0 %v8501_v30  ;;  %8043 = vmatprep.subr.bf16.mxu1 %v8502_v33  ;;  %v5563_v30 = vadd.f32 %v10097_v61, %v5109_v20  ;;  %v5559_v33 = vadd.f32 %v10069_v50, %v5109_v20  ;;  %v5651_v37 = vadd.f32 %v5650_v1, %v5129_v29  ;;  %v5677_v61 = vmax.f32 %v5520_v18, 0.0  ;;  %v8557_v20 = vld [vmem:[%s10401_s14 + $0x748] sm:$0xff]  }
0x18b9   :  { %v5647_v50 = vadd.f32 %v5646_v10, %v5129_v29  ;;  %v5682_v28 = vmax.f32 %v5608_v40, 0.0  ;;  %v8548_v10 = vld [vmem:[%s10401_s14 + $0x7a0] sm:$0xff]   ;;  %v5125_v18 = vrot.slane %v10115_v39, %v9304_v22  ;;  %v8559_v26 = vld [vmem:[%s10401_s14 + $0x708] sm:$0xff]  }
0x18ba   :  { %6590 = vmatmul.mubr.bf16.vlgmr.msra.gmra.mxu0 %v5689_v41  ;;  %6631 = vmatmul.mubr.bf16.vlgmr.msra.gmra.mxu1 %v5691_v46  ;;  %v5679_v45 = vmax.f32 %v5563_v30, 0.0  ;;  %v5661_v41 = vmax.f32 %v5516_v60, 0.0  ;;  %v5684_v46 = vmax.f32 %v5651_v37, 0.0  ;;  %v8562_v22 = vld [vmem:[%s10401_s14 + $0x7c0] sm:$0xff]  }
0x18bb   :  { %8022 = vmatpush3.bf16.msra.mxu0 %v8503_v21  ;;  %6671 = vmatprep.mubr.bf16.mxu0 %v5694_v52  ;;  %v8534_v21 = vld [vmem:[%s10401_s14 + $0x7f8] sm:$0xff]   ;;  %v5666_v52 = vmax.f32 %v5604_v27, 0.0  ;;  %v8563_v30 = vld [vmem:[%s10401_s14 + $0x700] sm:$0xff]  }
0x18bc   :  { %8044 = vmatpush3.bf16.msra.mxu1 %v8504_v32  ;;  %6712 = vmatprep.mubr.bf16.mxu1 %v5696_v56  ;;  %v5663_v32 = vmax.f32 %v5559_v33, 0.0 }
0x18bd   :  { %8023 = vmatprep.subr.bf16.mxu0 %v8505_v51  ;;  %8045 = vmatprep.subr.bf16.mxu1 %v8506_v47  ;;  %v5693_v51 = vpack.c.bf16 %v5677_v61, %v5661_v41  ;;  %v8536_v47 = vld [vmem:[%s10401_s14 + $0x7b8] sm:$0xff]  }
0x18be   :  { %v5695_v56 = vpack.c.bf16 %v5679_v45, %v5663_v32 }
0x18bf   :  { %8024 = vmatpush3.bf16.msra.mxu0 %v8507_v57  ;;  %v5668_v57 = vmax.f32 %v5647_v50, 0.0 }
0x18c0   :  { %8046 = vmatpush3.bf16.msra.mxu1 %v8508_v49  ;;  %8025 = vmatprep.subr.bf16.mxu0 %v8509_v58  ;;  %v8537_v49 = vld [vmem:[%s10401_s14 + $0x770] sm:$0xff]   ;;  %v5698_v58 = vpack.c.bf16 %v5682_v28, %v5666_v52  ;;  %v7525_v52 = vld [vmem:[%s10405_s15 + $0x1] ss:$0 sm:$0xff] }
0x18c1   :  { %8047 = vmatprep.subr.bf16.mxu1 %v8510_v48  ;;  %v8538_v48 = vld [vmem:[%s10401_s14 + $0x7f0] sm:$0xff]  }
0x18c3   :  { %8026 = vmatpush3.bf16.msra.mxu0 %v8511_v16  ;;  %v5700_v16 = vpack.c.bf16 %v5684_v46, %v5668_v57 }
0x18c4   :  { %8048 = vmatpush3.bf16.msra.mxu1 %v8512_v34  ;;  %8027 = vmatprep.subr.bf16.mxu0 %v8513_v59  ;;  %v8539_v34 = vld [vmem:[%s10401_s14 + $0x730] sm:$0xff]  }
0x18c5   :  { %8049 = vmatprep.subr.bf16.mxu1 %v8514_v13  ;;  %v8540_v59 = vld [vmem:[%s10401_s14 + $0x7b0] sm:$0xff]   ;;  %v8541_v13 = vld [vmem:[%s10401_s14 + $0x768] sm:$0xff]  }
0x18c7   :  { %8028 = vmatpush3.bf16.msra.mxu0 %v8515_v35  ;;  %v8542_v35 = vld [vmem:[%s10401_s14 + $0x7e8] sm:$0xff]  }
0x18c8   :  { %8050 = vmatpush3.bf16.msra.mxu1 %v8516_v5  ;;  %8029 = vmatprep.subr.bf16.mxu0 %v8517_v6  ;;  %v8543_v5 = vld [vmem:[%s10401_s14 + $0x728] sm:$0xff]  }
0x18c9   :  { %8051 = vmatprep.subr.bf16.mxu1 %v8518_v7  ;;  %v8544_v6 = vld [vmem:[%s10401_s14 + $0x7a8] sm:$0xff]   ;;  %v8545_v7 = vld [vmem:[%s10401_s14 + $0x760] sm:$0xff]  }
0x18cb   :  { %8030 = vmatpush3.bf16.msra.mxu0 %v8519_v9  ;;  %v8547_v9 = vld [vmem:[%s10401_s14 + $0x720] sm:$0xff]  }
0x18cc   :  { %8052 = vmatpush3.bf16.msra.mxu1 %v8520_v25  ;;  %8031 = vmatprep.subr.bf16.mxu0 %v8521_v53  ;;  %v8549_v25 = vld [vmem:[%s10401_s14 + $0x758] sm:$0xff]  }
0x18cd   :  { %8053 = vmatprep.subr.bf16.mxu1 %v8522_v14  ;;  %v8550_v53 = vld [vmem:[%s10401_s14 + $0x7d8] sm:$0xff]  }
0x18ce   :  { %v8551_v14 = vld [vmem:[%s10401_s14 + $0x718] sm:$0xff]  }
0x18cf   :  { %8032 = vmatpush3.bf16.msra.mxu0 %v8523_v54  ;;  %v8552_v54 = vld [vmem:[%s10401_s14 + $0x798] sm:$0xff]  }
0x18d0   :  { %8054 = vmatpush3.bf16.msra.mxu1 %v8524_v44  ;;  %8033 = vmatprep.subr.bf16.mxu0 %v8525_v63  ;;  %v8553_v44 = vld [vmem:[%s10401_s14 + $0x750] sm:$0xff]  }
0x18d1   :  { %8055 = vmatprep.subr.bf16.mxu1 %v8526_v17  ;;  %v8554_v63 = vld [vmem:[%s10401_s14 + $0x7d0] sm:$0xff]  }
0x18d2   :  { %v8555_v17 = vld [vmem:[%s10401_s14 + $0x710] sm:$0xff]  }
0x18d3   :  { %8034 = vmatpush3.bf16.msra.mxu0 %v8527_v23  ;;  %v5117_v23 = vrot.slane %v10115_v39, %v9301_v38  ;;  %v8561_v38 = vld [vmem:[%s10401_s14 + $0x740] sm:$0xff]  }
0x18d4   :  { %8056 = vmatpush3.bf16.msra.mxu1 %v8528_v2  ;;  %8035 = vmatprep.subr.bf16.mxu0 %v8529_v3  ;;  %v8560_v2 = vld [vmem:[%s10401_s14 + $0x788] sm:$0xff]   ;;  %v5649_v3 = vadd.f32 %v10218_v62, %v5125_v18  ;;  %v8564_v62 = vld [vmem:[%s10401_s14 + $0x780] sm:$0xff]  }
0x18d5   :  { %8057 = vmatprep.subr.bf16.mxu1 %v8530_v31  ;;  %v5606_v1 = vadd.f32 %v10213_v43, %v5117_v23  ;;  %v5602_v39 = vadd.f32 %v10185_v0, %v5117_v23  ;;  %v5645_v43 = vadd.f32 %v10190_v36, %v5125_v18 }
0x18d6   :  { %v5683_v31 = vmax.f32 %v5649_v3, 0.0 }
0x18d7   :  { %8036 = vmatpush3.bf16.msra.mxu0 %v8531_v42  ;;  %v5681_v29 = vmax.f32 %v5606_v1, 0.0  ;;  %v5665_v60 = vmax.f32 %v5602_v39, 0.0  ;;  %v5667_v40 = vmax.f32 %v5645_v43, 0.0 }
0x18d8   :  { %8058 = vmatpush3.bf16.msra.mxu1 %v8532_v15  ;;  %8065 = vmatprep.subr.bf16.mxu0 %v8533_v55 }
0x18d9   :  { %8087 = vmatprep.subr.bf16.mxu1 %v8534_v21  ;;  %v5697_v0 = vpack.c.bf16 %v5681_v29, %v5665_v60  ;;  %v5699_v36 = vpack.c.bf16 %v5683_v31, %v5667_v40 }
0x18da   :  { %6672 = vmatmul.mubr.bf16.vlgmr.msra.gmra.mxu0 %v5693_v51 }
0x18db   :  { %6713 = vmatmul.mubr.bf16.vlgmr.msra.gmra.mxu1 %v5695_v56  ;;  %8066 = vmatpush3.bf16.msra.mxu0 %v8535_v4 }
0x18dc   :  { %6753 = vmatprep.mubr.bf16.mxu0 %v5698_v58  ;;  %8088 = vmatpush3.bf16.msra.mxu1 %v8536_v47 }
0x18dd   :  { %6794 = vmatprep.mubr.bf16.mxu1 %v5700_v16  ;;  %8067 = vmatprep.subr.bf16.mxu0 %v8537_v49 }
0x18de   :  { %8089 = vmatprep.subr.bf16.mxu1 %v8538_v48 }
0x18df   :  { %8068 = vmatpush3.bf16.msra.mxu0 %v8539_v34 }
0x18e0   :  { %8090 = vmatpush3.bf16.msra.mxu1 %v8540_v59  ;;  %8069 = vmatprep.subr.bf16.mxu0 %v8541_v13 }
0x18e1   :  { %8091 = vmatprep.subr.bf16.mxu1 %v8542_v35 }
0x18e3   :  { %8070 = vmatpush3.bf16.msra.mxu0 %v8543_v5 }
0x18e4   :  { %8092 = vmatpush3.bf16.msra.mxu1 %v8544_v6  ;;  %8071 = vmatprep.subr.bf16.mxu0 %v8545_v7 }
0x18e5   :  { %8093 = vmatprep.subr.bf16.mxu1 %v8546_v8 }
0x18e7   :  { %8072 = vmatpush3.bf16.msra.mxu0 %v8547_v9 }
0x18e8   :  { %8094 = vmatpush3.bf16.msra.mxu1 %v8548_v10  ;;  %8073 = vmatprep.subr.bf16.mxu0 %v8549_v25 }
0x18e9   :  { %8095 = vmatprep.subr.bf16.mxu1 %v8550_v53 }
0x18eb   :  { %8074 = vmatpush3.bf16.msra.mxu0 %v8551_v14 }
0x18ec   :  { %8096 = vmatpush3.bf16.msra.mxu1 %v8552_v54  ;;  %8075 = vmatprep.subr.bf16.mxu0 %v8553_v44 }
0x18ed   :  { %8097 = vmatprep.subr.bf16.mxu1 %v8554_v63 }
0x18ef   :  { %8076 = vmatpush3.bf16.msra.mxu0 %v8555_v17 }
0x18f0   :  { %8098 = vmatpush3.bf16.msra.mxu1 %v8556_v19  ;;  %8077 = vmatprep.subr.bf16.mxu0 %v8557_v20 }
0x18f1   :  { %8099 = vmatprep.subr.bf16.mxu1 %v8558_v24 }
0x18f3   :  { %8078 = vmatpush3.bf16.msra.mxu0 %v8559_v26 }
0x18f4   :  { %8100 = vmatpush3.bf16.msra.mxu1 %v8560_v2  ;;  %8079 = vmatprep.subr.bf16.mxu0 %v8561_v38 }
0x18f5   :  { %8101 = vmatprep.subr.bf16.mxu1 %v8562_v22 }
0x18f7   :  { %8080 = vmatpush3.bf16.msra.mxu0 %v8563_v30 }
0x18f8   :  { %8102 = vmatpush3.bf16.msra.mxu1 %v8564_v62 }
0x18fa   :  { %6754 = vmatmul.mubr.bf16.vlgmr.msra.gmra.mxu0 %v5697_v0 }
0x18fb   :  { %6795 = vmatmul.mubr.bf16.vlgmr.msra.gmra.mxu1 %v5699_v36 }
0x195a   :  { %v7949_v33 = vpop.f32.mrf.mxu0  ;;  %v7971_v37 = vpop.f32.mrf.mxu1 }
0x195c   :  { %v7950_v42 = vpop.f32.mrf.mxu0  ;;  %v7972_v61 = vpop.f32.mrf.mxu1 }
0x195d   :  { %v7951_v51 = vadd.f32 %v7950_v42, %v7949_v33  ;;  %v7973_v16 = vadd.f32 %v7972_v61, %v7971_v37 }
0x195e   :  { %v7952_v27 = vpop.f32.mrf.mxu0  ;;  %v7974_v15 = vpop.f32.mrf.mxu1 }
0x195f   :  { %v6510_v57 = vadd.f32 %v7951_v51, %v7525_v52 }
0x1960   :  { %v7953_v55 = vpop.f32.mrf.mxu0  ;;  %v7975_v50 = vpop.f32.mrf.mxu1 }
0x1961   :  { %v7954_v49 = vadd.f32 %v7953_v55, %v7952_v27  ;;  %v6551_v59 = vadd.f32 %v7973_v16, %v6510_v57  ;;  %v7976_v6 = vadd.f32 %v7975_v50, %v7974_v15 }
0x1963   :  { %v6513_v13 = vadd.f32 %v7954_v49, %v7525_v52  ;;  %v8663_v52 = vmov 0.0  }
0x1964   :  { %8286 = vmatprep.subr.mxu0 %v8663_v52  ;;  %8290 = vmatprep.mubr.msk.f32.mxu0 %vm8664_vm3, %v8663_v52 }
0x1965   :  { %v6554_v9 = vadd.f32 %v7976_v6, %v6513_v13  ;;  %v8649_v13 = vld [vmem:[%s10402_s10 + $0x1] ss:$0 sm:$0xff] }
0x1966   :  { %v8650_v6 = vld [vmem:[%s10403_s11 + $0x1] ss:$0 sm:$0xff] }
0x197a   :  { %v7993_v45 = vpop.f32.mrf.mxu0  ;;  %v8015_v21 = vpop.f32.mrf.mxu1 }
0x197c   :  { %v7994_v41 = vpop.f32.mrf.mxu0  ;;  %v8016_v28 = vpop.f32.mrf.mxu1 }
0x197d   :  { %v7995_v34 = vadd.f32 %v7994_v41, %v7993_v45  ;;  %v8017_v10 = vadd.f32 %v8016_v28, %v8015_v21 }
0x197e   :  { %v7996_v32 = vpop.f32.mrf.mxu0  ;;  %v8018_v46 = vpop.f32.mrf.mxu1 }
0x197f   :  { %v6592_v7 = vadd.f32 %v7995_v34, %v6551_v59 }
0x1980   :  { %v7997_v4 = vpop.f32.mrf.mxu0  ;;  %v8019_v56 = vpop.f32.mrf.mxu1 }
0x1981   :  { %v7998_v8 = vadd.f32 %v7997_v4, %v7996_v32  ;;  %v6633_v54 = vadd.f32 %v8017_v10, %v6592_v7  ;;  %v8020_v63 = vadd.f32 %v8019_v56, %v8018_v46  ;;  %v25_v10 = vstv %s10407_s17 }
0x1982   :  { %26 = vst [vmem:[#allocation3] sm:$0x1] %v25_v10 }
0x1983   :  { %v6595_v44 = vadd.f32 %v7998_v8, %v6554_v9  ;;  %v6835_v9 = vld [vmem:[%s10406_s5] sm:$0x3] }
0x1985   :  { %v6636_v23 = vadd.f32 %v8020_v63, %v6595_v44 }
0x1989   :  { %v7656_v63 = vld [vmem:[#allocation3] ss:$0 sm:$0xff] }
0x199a   :  { %v8037_v47 = vpop.f32.mrf.mxu0 }
0x199b   :  { %v8059_v58 = vpop.f32.mrf.mxu1 }
0x199c   :  { %v8038_v48 = vpop.f32.mrf.mxu0 }
0x199d   :  { %v8060_v35 = vpop.f32.mrf.mxu1  ;;  %v8039_v25 = vadd.f32 %v8038_v48, %v8037_v47 }
0x199e   :  { %v8040_v5 = vpop.f32.mrf.mxu0  ;;  %v8061_v18 = vadd.f32 %v8060_v35, %v8059_v58 }
0x199f   :  { %v8062_v53 = vpop.f32.mrf.mxu1  ;;  %v6674_v17 = vadd.f32 %v8039_v25, %v6633_v54  ;;  %v7655_v25 = vld [vmem:[%s10408_s16] ss:$0 sm:$0xff] }
0x19a0   :  { %v8041_v14 = vpop.f32.mrf.mxu0 }
0x19a1   :  { %v8042_v19 = vadd.f32 %v8041_v14, %v8040_v5  ;;  %v8063_v20 = vpop.f32.mrf.mxu1  ;;  %v6715_v2 = vadd.f32 %v8061_v18, %v6674_v17 }
0x19a2   :  { %v8064_v43 = vadd.f32 %v8063_v20, %v8062_v53 }
0x19a3   :  { %v6677_v38 = vadd.f32 %v8042_v19, %v6636_v23 }
0x19a5   :  { %v6718_v60 = vadd.f32 %v8064_v43, %v6677_v38 }
0x19ba   :  { %v8081_v24 = vpop.f32.mrf.mxu0 }
0x19bb   :  { %v8103_v26 = vpop.f32.mrf.mxu1 }
0x19bc   :  { %v8082_v1 = vpop.f32.mrf.mxu0 }
0x19bd   :  { %v8083_v3 = vadd.f32 %v8082_v1, %v8081_v24  ;;  %v8104_v22 = vpop.f32.mrf.mxu1 }
0x19be   :  { %v8084_v39 = vpop.f32.mrf.mxu0  ;;  %v8105_v29 = vadd.f32 %v8104_v22, %v8103_v26 }
0x19bf   :  { %v6756_v30 = vadd.f32 %v8083_v3, %v6715_v2  ;;  %v8106_v62 = vpop.f32.mrf.mxu1 }
0x19c0   :  { %v8085_v31 = vpop.f32.mrf.mxu0 }
0x19c1   :  { %v6797_v40 = vadd.f32 %v8105_v29, %v6756_v30  ;;  %v8086_v0 = vadd.f32 %v8085_v31, %v8084_v39  ;;  %v8107_v36 = vpop.f32.mrf.mxu1 }
0x19c2   :  { %v8108_v37 = vadd.f32 %v8107_v36, %v8106_v62 }
0x19c3   :  { %v6759_v33 = vadd.f32 %v8086_v0, %v6718_v60  ;;  %v6803_v42 = vadd.f32 %v6797_v40, %v9825_v12 }
0x19c5   :  { %v6800_v61 = vadd.f32 %v8108_v37, %v6759_v33  ;;  %v6805_v27 = vsel %vm414_vm0, %v6803_v42, 0.0 }
0x19c6   :  { %6806 = vadd.xlane.f32.xlu1 %v6805_v27 }
0x19c7   :  { %v6804_v15 = vadd.f32 %v6800_v61, %v9823_v11 }
0x19c9   :  { %v6808_v55 = vsel %vm414_vm0, %v6804_v15, 0.0 }
0x19ca   :  { %6809 = vadd.xlane.f32.xlu0 %v6808_v55 }
0x1a4f   :  { %v6807_v45 = vpop.xlane.xlu1 %6806 }
0x1a50   :  { %v6811_v50 = vmul.f32 0.03125, %v6807_v45 }
0x1a52   :  { %v6813_v21 = vsub.f32 %v6803_v42, %v6811_v50 }
0x1a53   :  { %v6810_v41 = vpop.xlane.xlu0 %6809 }
0x1a54   :  { %v6812_v28 = vmul.f32 0.03125, %v6810_v41  ;;  %v6815_v32 = vmul.f32 %v6813_v21, %v6813_v21 }
0x1a56   :  { %v6814_v46 = vsub.f32 %v6804_v15, %v6812_v28  ;;  %v6817_v4 = vsel %vm414_vm0, %v6815_v32, 0.0 }
0x1a57   :  { %6818 = vadd.xlane.f32.xlu1 %v6817_v4 }
0x1a58   :  { %v6816_v12 = vmul.f32 %v6814_v46, %v6814_v46 }
0x1a5a   :  { %v6820_v51 = vsel %vm414_vm0, %v6816_v12, 0.0 }
0x1a5b   :  { %6821 = vadd.xlane.f32.xlu0 %v6820_v51 }
0x1ae0   :  { %v6819_v11 = vpop.xlane.xlu1 %6818 }
0x1ae1   :  { %v6823_v47 = vmul.f32 0.03125, %v6819_v11 }
0x1ae3   :  { %v6825_v56 = vadd.f32 1e-05, %v6823_v47 }
0x1ae4   :  { %v6822_v57 = vpop.xlane.xlu0 %6821 }
0x1ae5   :  { %8641 = vrsqrt.f32 %v6825_v56  ;;  %v6824_v49 = vmul.f32 0.03125, %v6822_v57 }
0x1ae7   :  { %v6826_v58 = vadd.f32 1e-05, %v6824_v49 }
0x1ae9   :  { %8643 = vrsqrt.f32 %v6826_v58 }
0x1af2   :  { %v8642_v48 = vpop.eup %8641 }
0x1af3   :  { %v6829_v16 = vmul.f32 %v8642_v48, %v6813_v21 }
0x1af5   :  { %v6831_v5 = vmul.f32 %v8649_v13, %v6829_v16 }
0x1af6   :  { %v8644_v34 = vpop.eup %8643 }
0x1af7   :  { %v6830_v59 = vmul.f32 %v8644_v34, %v6814_v46  ;;  %v6833_v8 = vadd.f32 %v8650_v6, %v6831_v5 }
0x1af9   :  { %v6832_v35 = vmul.f32 %v8649_v13, %v6830_v59 }
0x1afb   :  { %v6834_v7 = vadd.f32 %v8650_v6, %v6832_v35 }
0x1afd   :  { %8287 = vmatpush3.msra.mxu0 %v6834_v7 }
0x1afe   :  { %8288 = vmatprep.subr.mxu0 %v8663_v52 }
0x1aff   :  { %8289 = vmatpush3.msra.mxu0 %v6833_v8 }
0x1b00   :  { %8291 = vmatmul.mubr.msk.f32.vlgmr.msra.gmra.mxu0 %vm598_vm2, %v6835_v9 }
0x1bc0   :  { %v6905_v53 = vpop.f32.mrf.mxu0 }
0x1bc1   :  { %v6916_v14 = vmul.f32 %v7655_v25, %v6905_v53 }
0x1bc2   :  { %v8292_v54 = vpop.f32.mrf.mxu0 }
0x1bc3   :  { %v6918_v44 = vsel %vm6917_vm4, %v6916_v14, 0.0 }
0x1bc4   :  { %6919 = vadd.xlane.f32.xlu0 %v6918_v44 }
0x1c4d   :  { %v6920_v17 = vpop.xlane.xlu0 %6919 }
0x1c4e   :  { %v6928_v19 = vadd.f32 %v7656_v63, %v6920_v17 }
0x1c50   :  { %6930 = vst.msk [vmem:[%s10409_s18] sm:$0x3] %vm6929_vm5, %v6928_v19 }

</bundles_post_ra>
